<compile_context>
chip_gen: v7x
topology: tpu7x:2x2x1
jax: 0.10.0
libtpu: 0.0.40
codegen_flags: <defaults>
</compile_context>

<pallas_src>
import math
import numpy as np
import jax
import jax.numpy as jnp
from jax.experimental import pallas as pl
from jax.experimental.pallas import tpu as pltpu

# module constants (from training.py)
BLOCK_SIZE = 32
N_EMBD = 384

# chosen small config
NUM_HEADS = 4
HEAD_SIZE = 32                      # head_size * num_heads = 128
D_HEADS = NUM_HEADS * HEAD_SIZE     # 128
B = 4
T = BLOCK_SIZE                      # run the full block_size for real MXU fill

NEG_INF = -1e30                     # large finite negative (NaN-safe masking)


# --------------------------------------------------------------------------
# Fused kernel: one grid step = G batch elements.
#   qkv = x @ W_qkv                       (G*T, 3*H*hs)  -- one lane-dense matmul
#   per (g, h): wei = softmax(q_h k_h^T + causal_mask)    (scale folded into Wq)
#               out_h = wei v_h
#   y = concat(out) @ Wp + bp             (G*T, n_embd)  -- lane-dense store
# All matmuls: bf16 operands, f32 accumulation. Softmax math in f32.
# --------------------------------------------------------------------------
def mha_fused_kernel(x_ref, wqkv_ref, wp_ref, bp_ref, o_ref):
    G, Tt, C = x_ref.shape
    x = x_ref[...].reshape(G * Tt, C)                      # (G*T, C) bf16
    qkv = jnp.dot(x, wqkv_ref[...],
                  preferred_element_type=jnp.float32)      # (G*T, 3*D_HEADS) f32

    # in-kernel causal additive mask (T, T), f32
    row = jax.lax.broadcasted_iota(jnp.int32, (Tt, Tt), 0)
    col = jax.lax.broadcasted_iota(jnp.int32, (Tt, Tt), 1)
    mask = jnp.where(row >= col, 0.0, NEG_INF).astype(jnp.float32)

    outs = []
    for g in range(G):
        qkv_g = qkv[g * Tt:(g + 1) * Tt, :]                # (T, 3*D_HEADS) f32
        head_outs = []
        for h in range(NUM_HEADS):
            lo = h * HEAD_SIZE
            qh = qkv_g[:, lo:lo + HEAD_SIZE].astype(jnp.bfloat16)
            kh = qkv_g[:, D_HEADS + lo:D_HEADS + lo + HEAD_SIZE].astype(jnp.bfloat16)
            vh = qkv_g[:, 2 * D_HEADS + lo:2 * D_HEADS + lo + HEAD_SIZE].astype(jnp.bfloat16)

            # q k^T without materializing a transpose: contract shared last dim.
            wei = jax.lax.dot_general(
                qh, kh, dimension_numbers=(((1,), (1,)), ((), ())),
                preferred_element_type=jnp.float32) + mask           # (T, T) f32

            m = jnp.max(wei, axis=-1, keepdims=True)
            e = jnp.exp(wei - m)
            s = jnp.sum(e, axis=-1, keepdims=True)
            p = (e * pl.reciprocal(s, approx=True)).astype(jnp.bfloat16)  # EUP slot
            head_outs.append(jnp.dot(p, vh,
                                     preferred_element_type=jnp.float32))  # (T, hs)
        outs.append(jnp.concatenate(head_outs, axis=-1))   # (T, D_HEADS)

    cat = jnp.concatenate(outs, axis=0).astype(jnp.bfloat16)   # (G*T, D_HEADS)
    y = jnp.dot(cat, wp_ref[...],
                preferred_element_type=jnp.float32) + bp_ref[...]   # (G*T, n_embd)
    o_ref[...] = y.reshape(G, Tt, -1).astype(o_ref.dtype)


def _num_grid_steps(batch):
    """v7x has 2 TensorCores -> keep a 2-way parallel batch grid there.
    v5e/v6e are single-TC -> collapse to one grid step (no per-step overhead,
    bigger matmul M, single pass over the resident weights)."""
    try:
        kind = jax.devices()[0].device_kind.lower()
    except Exception:
        kind = ""
    two_tc = "7" in kind
    return 2 if (two_tc and batch % 2 == 0) else 1


def multi_head_attention(x, wqkv, wp, bp2):
    """x: (B,T,C) f32/bf16; wqkv: (C,3*H*hs) bf16 (scale folded into Wq);
       wp: (H*hs, n_embd) bf16; bp2: (1, n_embd) f32  ->  (B,T,n_embd) f32."""
    Bb, Tt, C = x.shape
    three_d = wqkv.shape[1]
    Dh, Dout = wp.shape
    xb = x.astype(wqkv.dtype)

    steps = _num_grid_steps(Bb)
    G = Bb // steps

    flops = (2 * Bb * Tt * C * three_d                        # QKV matmul
             + Bb * NUM_HEADS * 4 * Tt * Tt * HEAD_SIZE       # q k^T and p v
             + 2 * Bb * Tt * Dh * Dout)                       # output projection
    cost = pl.CostEstimate(
        flops=int(flops),
        transcendentals=int(Bb * NUM_HEADS * Tt * (Tt + 1)),  # exp + reciprocal
        bytes_accessed=int(xb.nbytes + wqkv.nbytes + wp.nbytes + bp2.nbytes
                           + Bb * Tt * Dout * 4))

    return pl.pallas_call(
        mha_fused_kernel,
        out_shape=jax.ShapeDtypeStruct((Bb, Tt, Dout), jnp.float32),
        grid=(steps,),
        in_specs=[
            pl.BlockSpec((G, Tt, C), lambda b: (b, 0, 0)),
            pl.BlockSpec((C, three_d), lambda b: (0, 0)),
            pl.BlockSpec((Dh, Dout), lambda b: (0, 0)),
            pl.BlockSpec((1, Dout), lambda b: (0, 0)),
        ],
        out_specs=pl.BlockSpec((G, Tt, Dout), lambda b: (b, 0, 0)),
        compiler_params=pltpu.CompilerParams(
            dimension_semantics=("parallel",)),
        cost_estimate=cost,
    )(xb, wqkv, wp, bp2)


# --------------------------------------------------------------------------
# one-time parameter preparation (NOT per call): stack heads, fold the
# 1/sqrt(head_size) attention scale into Wq, cast weights to bf16.
# --------------------------------------------------------------------------
def prepare_params(wq, wk, wv, wp, bp, dtype=jnp.bfloat16):
    scale = HEAD_SIZE ** -0.5
    to_cat = lambda w: jnp.transpose(w, (1, 0, 2)).reshape(N_EMBD, D_HEADS)
    wqkv = jnp.concatenate(
        [to_cat(wq * scale), to_cat(wk), to_cat(wv)], axis=1)   # (C, 3*H*hs)
    return (wqkv.astype(dtype),
            wp.astype(dtype),
            bp.reshape(1, N_EMBD).astype(jnp.float32))


# --------------------------------------------------------------------------
# pure-JAX reference mirroring the kernel's numerics (bf16 MXU operands,
# f32 accumulation / softmax), same causal masking.
# --------------------------------------------------------------------------
def reference(x, wqkv, wp, bp2):
    Bb, Tt, _ = x.shape
    xf = x.astype(jnp.bfloat16).astype(jnp.float32)
    wf = wqkv.astype(jnp.float32)
    qkv = jnp.einsum("btc,cd->btd", xf, wf)                    # (B,T,3*D) f32
    q, k, v = jnp.split(qkv, 3, axis=-1)

    def heads(a):
        a = a.reshape(Bb, Tt, NUM_HEADS, HEAD_SIZE)
        return a.astype(jnp.bfloat16).astype(jnp.float32)      # mirror bf16 operands

    qh, kh, vh = heads(q), heads(k), heads(v)
    row = jnp.arange(Tt)[:, None]
    col = jnp.arange(Tt)[None, :]
    mask = jnp.where(row >= col, 0.0, NEG_INF).astype(jnp.float32)
    wei = jnp.einsum("bqhd,bkhd->bhqk", qh, kh) + mask         # scale is in Wq
    p = jax.nn.softmax(wei, axis=-1)
    p = p.astype(jnp.bfloat16).astype(jnp.float32)
    out = jnp.einsum("bhqk,bkhd->bqhd", p, vh).reshape(Bb, Tt, D_HEADS)
    out = out.astype(jnp.bfloat16).astype(jnp.float32)
    return out @ wp.astype(jnp.float32) + bp2


if __name__ == "__main__":
    key = jax.random.PRNGKey(0)
    kx, kq, kk, kv, kp, kb = jax.random.split(key, 6)

    x = jax.random.normal(kx, (B, T, N_EMBD), dtype=jnp.float32)

    # deterministic parameter init (shapes match nn.Linear weights, transposed
    # so the kernel computes x @ W):
    #   key/query/value: Linear(n_embd, head_size, bias=False) -> (H, C, hs)
    #   proj: Linear(head_size*num_heads, n_embd)              -> (H*hs, n_embd) + bias
    s_in = 1.0 / math.sqrt(N_EMBD)
    s_pr = 1.0 / math.sqrt(D_HEADS)
    wq = jax.random.uniform(kq, (NUM_HEADS, N_EMBD, HEAD_SIZE), jnp.float32, -s_in, s_in)
    wk = jax.random.uniform(kk, (NUM_HEADS, N_EMBD, HEAD_SIZE), jnp.float32, -s_in, s_in)
    wv = jax.random.uniform(kv, (NUM_HEADS, N_EMBD, HEAD_SIZE), jnp.float32, -s_in, s_in)
    wp = jax.random.uniform(kp, (D_HEADS, N_EMBD), jnp.float32, -s_pr, s_pr)
    bp = jax.random.uniform(kb, (N_EMBD,), jnp.float32, -s_pr, s_pr)

    wqkv, wp_b, bp2 = prepare_params(wq, wk, wv, wp, bp)

    out = multi_head_attention(x, wqkv, wp_b, bp2)
    out = jax.block_until_ready(out)

    ref = reference(x, wqkv, wp_b, bp2)
    np.testing.assert_allclose(np.asarray(out), np.asarray(ref), rtol=5e-3, atol=5e-3)

    print("KERNEL_OK")
</pallas_src>

<mosaic_0001>
module attributes {stable_mosaic.version = 11 : i64} {
  func.func @mha_fused_kernel(%arg0: i32, %arg1: memref<4x32x384xbf16, #tpu.memory_space<vmem>>, %arg2: memref<384x384xbf16, #tpu.memory_space<vmem>>, %arg3: memref<128x384xbf16, #tpu.memory_space<vmem>>, %arg4: memref<1x384xf32, #tpu.memory_space<vmem>>, %arg5: memref<4x32x384xf32, #tpu.memory_space<vmem>>) attributes {dimension_semantics = [#tpu.dimension_semantics<parallel>], iteration_bounds = array<i64: 1>, scalar_prefetch = 0 : i64, scratch_operands = 0 : i64, tpu.core_type = #tpu.core_type<tc>, window_params = [{transform_indices = @transform_0, window_bounds = array<i64: 4, 32, 384>}, {pipeline_mode = #tpu.pipeline_mode<synchronous>, transform_indices = @transform_1, window_bounds = array<i64: 384, 384>}, {pipeline_mode = #tpu.pipeline_mode<synchronous>, transform_indices = @transform_2, window_bounds = array<i64: 128, 384>}, {pipeline_mode = #tpu.pipeline_mode<synchronous>, transform_indices = @transform_3, window_bounds = array<i64: 1, 384>}, {transform_indices = @transform_4, window_bounds = array<i64: 4, 32, 384>}]} {
    %c0 = arith.constant 0 : index
    %c0_0 = arith.constant 0 : index
    %c0_1 = arith.constant 0 : index
    %0 = vector.load %arg1[%c0, %c0_0, %c0_1] : memref<4x32x384xbf16, #tpu.memory_space<vmem>>, vector<4x32x384xbf16>
    %1 = vector.shape_cast %0 : vector<4x32x384xbf16> to vector<128x384xbf16>
    %c0_2 = arith.constant 0 : index
    %c0_3 = arith.constant 0 : index
    %2 = vector.load %arg2[%c0_2, %c0_3] : memref<384x384xbf16, #tpu.memory_space<vmem>>, vector<384x384xbf16>
    %cst = arith.constant dense<0.000000e+00> : vector<128x384xf32>
    %3 = tpu.matmul %1, %2, %cst {dimension_numbers = #tpu.dot_dimension_numbers<[1], [0], [0], [1], [0, 0, 1, 1], [], []>} : vector<128x384xbf16>, vector<384x384xbf16>, vector<128x384xf32> -> vector<128x384xf32>
    %4 = tpu.iota {dimensions = array<i32: 0>} : vector<32x32xi32>
    %5 = tpu.iota {dimensions = array<i32: 1>} : vector<32x32xi32>
    %6 = arith.cmpi sge, %4, %5 : vector<32x32xi32>
    %cst_4 = arith.constant 0.000000e+00 : f32
    %cst_5 = arith.constant -1.000000e+30 : f32
    %7 = vector.broadcast %cst_4 : f32 to vector<32x32xf32>
    %8 = vector.broadcast %cst_5 : f32 to vector<32x32xf32>
    %9 = arith.select %6, %7, %8 : vector<32x32xi1>, vector<32x32xf32>
    %10 = vector.extract_strided_slice %3 {offsets = [0, 0], sizes = [32, 384], strides = [1, 1]} : vector<128x384xf32> to vector<32x384xf32>
    %11 = vector.extract_strided_slice %10 {offsets = [0, 0], sizes = [32, 32], strides = [1, 1]} : vector<32x384xf32> to vector<32x32xf32>
    %12 = arith.truncf %11 : vector<32x32xf32> to vector<32x32xbf16>
    %13 = vector.extract_strided_slice %10 {offsets = [0, 128], sizes = [32, 32], strides = [1, 1]} : vector<32x384xf32> to vector<32x32xf32>
    %14 = arith.truncf %13 : vector<32x32xf32> to vector<32x32xbf16>
    %15 = vector.extract_strided_slice %10 {offsets = [0, 256], sizes = [32, 32], strides = [1, 1]} : vector<32x384xf32> to vector<32x32xf32>
    %16 = arith.truncf %15 : vector<32x32xf32> to vector<32x32xbf16>
    %cst_6 = arith.constant dense<0.000000e+00> : vector<32x32xf32>
    %17 = tpu.matmul %12, %14, %cst_6 {dimension_numbers = #tpu.dot_dimension_numbers<[1], [1], [0], [0], [0, 0, 1, 0], [], []>} : vector<32x32xbf16>, vector<32x32xbf16>, vector<32x32xf32> -> vector<32x32xf32>
    %18 = arith.addf %17, %9 : vector<32x32xf32>
    %cst_7 = arith.constant dense<0xFF800000> : vector<32xf32>
    %19 = vector.multi_reduction <maximumf>, %18, %cst_7 [1] : vector<32x32xf32> to vector<32xf32>
    %20 = vector.shape_cast %19 : vector<32xf32> to vector<32x1xf32>
    %21 = vector.broadcast %20 : vector<32x1xf32> to vector<32x32xf32>
    %22 = arith.subf %18, %21 : vector<32x32xf32>
    %23 = math.exp %22 : vector<32x32xf32>
    %cst_8 = arith.constant dense<0.000000e+00> : vector<32xf32>
    %24 = vector.multi_reduction <add>, %23, %cst_8 [1] : vector<32x32xf32> to vector<32xf32>
    %25 = vector.shape_cast %24 : vector<32xf32> to vector<32x1xf32>
    %26 = tpu.reciprocal %25 {approx = true} : vector<32x1xf32> -> vector<32x1xf32>
    %27 = vector.broadcast %26 : vector<32x1xf32> to vector<32x32xf32>
    %28 = arith.mulf %23, %27 : vector<32x32xf32>
    %29 = arith.truncf %28 : vector<32x32xf32> to vector<32x32xbf16>
    %cst_9 = arith.constant dense<0.000000e+00> : vector<32x32xf32>
    %30 = tpu.matmul %29, %16, %cst_9 {dimension_numbers = #tpu.dot_dimension_numbers<[1], [0], [0], [1], [0, 0, 1, 1], [], []>} : vector<32x32xbf16>, vector<32x32xbf16>, vector<32x32xf32> -> vector<32x32xf32>
    %31 = vector.extract_strided_slice %10 {offsets = [0, 32], sizes = [32, 32], strides = [1, 1]} : vector<32x384xf32> to vector<32x32xf32>
    %32 = arith.truncf %31 : vector<32x32xf32> to vector<32x32xbf16>
    %33 = vector.extract_strided_slice %10 {offsets = [0, 160], sizes = [32, 32], strides = [1, 1]} : vector<32x384xf32> to vector<32x32xf32>
    %34 = arith.truncf %33 : vector<32x32xf32> to vector<32x32xbf16>
    %35 = vector.extract_strided_slice %10 {offsets = [0, 288], sizes = [32, 32], strides = [1, 1]} : vector<32x384xf32> to vector<32x32xf32>
    %36 = arith.truncf %35 : vector<32x32xf32> to vector<32x32xbf16>
    %cst_10 = arith.constant dense<0.000000e+00> : vector<32x32xf32>
    %37 = tpu.matmul %32, %34, %cst_10 {dimension_numbers = #tpu.dot_dimension_numbers<[1], [1], [0], [0], [0, 0, 1, 0], [], []>} : vector<32x32xbf16>, vector<32x32xbf16>, vector<32x32xf32> -> vector<32x32xf32>
    %38 = arith.addf %37, %9 : vector<32x32xf32>
    %cst_11 = arith.constant dense<0xFF800000> : vector<32xf32>
    %39 = vector.multi_reduction <maximumf>, %38, %cst_11 [1] : vector<32x32xf32> to vector<32xf32>
    %40 = vector.shape_cast %39 : vector<32xf32> to vector<32x1xf32>
    %41 = vector.broadcast %40 : vector<32x1xf32> to vector<32x32xf32>
    %42 = arith.subf %38, %41 : vector<32x32xf32>
    %43 = math.exp %42 : vector<32x32xf32>
    %cst_12 = arith.constant dense<0.000000e+00> : vector<32xf32>
    %44 = vector.multi_reduction <add>, %43, %cst_12 [1] : vector<32x32xf32> to vector<32xf32>
    %45 = vector.shape_cast %44 : vector<32xf32> to vector<32x1xf32>
    %46 = tpu.reciprocal %45 {approx = true} : vector<32x1xf32> -> vector<32x1xf32>
    %47 = vector.broadcast %46 : vector<32x1xf32> to vector<32x32xf32>
    %48 = arith.mulf %43, %47 : vector<32x32xf32>
    %49 = arith.truncf %48 : vector<32x32xf32> to vector<32x32xbf16>
    %cst_13 = arith.constant dense<0.000000e+00> : vector<32x32xf32>
    %50 = tpu.matmul %49, %36, %cst_13 {dimension_numbers = #tpu.dot_dimension_numbers<[1], [0], [0], [1], [0, 0, 1, 1], [], []>} : vector<32x32xbf16>, vector<32x32xbf16>, vector<32x32xf32> -> vector<32x32xf32>
    %51 = vector.extract_strided_slice %10 {offsets = [0, 64], sizes = [32, 32], strides = [1, 1]} : vector<32x384xf32> to vector<32x32xf32>
    %52 = arith.truncf %51 : vector<32x32xf32> to vector<32x32xbf16>
    %53 = vector.extract_strided_slice %10 {offsets = [0, 192], sizes = [32, 32], strides = [1, 1]} : vector<32x384xf32> to vector<32x32xf32>
    %54 = arith.truncf %53 : vector<32x32xf32> to vector<32x32xbf16>
    %55 = vector.extract_strided_slice %10 {offsets = [0, 320], sizes = [32, 32], strides = [1, 1]} : vector<32x384xf32> to vector<32x32xf32>
    %56 = arith.truncf %55 : vector<32x32xf32> to vector<32x32xbf16>
    %cst_14 = arith.constant dense<0.000000e+00> : vector<32x32xf32>
    %57 = tpu.matmul %52, %54, %cst_14 {dimension_numbers = #tpu.dot_dimension_numbers<[1], [1], [0], [0], [0, 0, 1, 0], [], []>} : vector<32x32xbf16>, vector<32x32xbf16>, vector<32x32xf32> -> vector<32x32xf32>
    %58 = arith.addf %57, %9 : vector<32x32xf32>
    %cst_15 = arith.constant dense<0xFF800000> : vector<32xf32>
    %59 = vector.multi_reduction <maximumf>, %58, %cst_15 [1] : vector<32x32xf32> to vector<32xf32>
    %60 = vector.shape_cast %59 : vector<32xf32> to vector<32x1xf32>
    %61 = vector.broadcast %60 : vector<32x1xf32> to vector<32x32xf32>
    %62 = arith.subf %58, %61 : vector<32x32xf32>
    %63 = math.exp %62 : vector<32x32xf32>
    %cst_16 = arith.constant dense<0.000000e+00> : vector<32xf32>
    %64 = vector.multi_reduction <add>, %63, %cst_16 [1] : vector<32x32xf32> to vector<32xf32>
    %65 = vector.shape_cast %64 : vector<32xf32> to vector<32x1xf32>
    %66 = tpu.reciprocal %65 {approx = true} : vector<32x1xf32> -> vector<32x1xf32>
    %67 = vector.broadcast %66 : vector<32x1xf32> to vector<32x32xf32>
    %68 = arith.mulf %63, %67 : vector<32x32xf32>
    %69 = arith.truncf %68 : vector<32x32xf32> to vector<32x32xbf16>
    %cst_17 = arith.constant dense<0.000000e+00> : vector<32x32xf32>
    %70 = tpu.matmul %69, %56, %cst_17 {dimension_numbers = #tpu.dot_dimension_numbers<[1], [0], [0], [1], [0, 0, 1, 1], [], []>} : vector<32x32xbf16>, vector<32x32xbf16>, vector<32x32xf32> -> vector<32x32xf32>
    %71 = vector.extract_strided_slice %10 {offsets = [0, 96], sizes = [32, 32], strides = [1, 1]} : vector<32x384xf32> to vector<32x32xf32>
    %72 = arith.truncf %71 : vector<32x32xf32> to vector<32x32xbf16>
    %73 = vector.extract_strided_slice %10 {offsets = [0, 224], sizes = [32, 32], strides = [1, 1]} : vector<32x384xf32> to vector<32x32xf32>
    %74 = arith.truncf %73 : vector<32x32xf32> to vector<32x32xbf16>
    %75 = vector.extract_strided_slice %10 {offsets = [0, 352], sizes = [32, 32], strides = [1, 1]} : vector<32x384xf32> to vector<32x32xf32>
    %76 = arith.truncf %75 : vector<32x32xf32> to vector<32x32xbf16>
    %cst_18 = arith.constant dense<0.000000e+00> : vector<32x32xf32>
    %77 = tpu.matmul %72, %74, %cst_18 {dimension_numbers = #tpu.dot_dimension_numbers<[1], [1], [0], [0], [0, 0, 1, 0], [], []>} : vector<32x32xbf16>, vector<32x32xbf16>, vector<32x32xf32> -> vector<32x32xf32>
    %78 = arith.addf %77, %9 : vector<32x32xf32>
    %cst_19 = arith.constant dense<0xFF800000> : vector<32xf32>
    %79 = vector.multi_reduction <maximumf>, %78, %cst_19 [1] : vector<32x32xf32> to vector<32xf32>
    %80 = vector.shape_cast %79 : vector<32xf32> to vector<32x1xf32>
    %81 = vector.broadcast %80 : vector<32x1xf32> to vector<32x32xf32>
    %82 = arith.subf %78, %81 : vector<32x32xf32>
    %83 = math.exp %82 : vector<32x32xf32>
    %cst_20 = arith.constant dense<0.000000e+00> : vector<32xf32>
    %84 = vector.multi_reduction <add>, %83, %cst_20 [1] : vector<32x32xf32> to vector<32xf32>
    %85 = vector.shape_cast %84 : vector<32xf32> to vector<32x1xf32>
    %86 = tpu.reciprocal %85 {approx = true} : vector<32x1xf32> -> vector<32x1xf32>
    %87 = vector.broadcast %86 : vector<32x1xf32> to vector<32x32xf32>
    %88 = arith.mulf %83, %87 : vector<32x32xf32>
    %89 = arith.truncf %88 : vector<32x32xf32> to vector<32x32xbf16>
    %cst_21 = arith.constant dense<0.000000e+00> : vector<32x32xf32>
    %90 = tpu.matmul %89, %76, %cst_21 {dimension_numbers = #tpu.dot_dimension_numbers<[1], [0], [0], [1], [0, 0, 1, 1], [], []>} : vector<32x32xbf16>, vector<32x32xbf16>, vector<32x32xf32> -> vector<32x32xf32>
    %91 = tpu.concatenate %30, %50, %70, %90 in 1 : vector<32x32xf32>, vector<32x32xf32>, vector<32x32xf32>, vector<32x32xf32> -> vector<32x128xf32>
    %92 = vector.extract_strided_slice %3 {offsets = [32, 0], sizes = [32, 384], strides = [1, 1]} : vector<128x384xf32> to vector<32x384xf32>
    %93 = vector.extract_strided_slice %92 {offsets = [0, 0], sizes = [32, 32], strides = [1, 1]} : vector<32x384xf32> to vector<32x32xf32>
    %94 = arith.truncf %93 : vector<32x32xf32> to vector<32x32xbf16>
    %95 = vector.extract_strided_slice %92 {offsets = [0, 128], sizes = [32, 32], strides = [1, 1]} : vector<32x384xf32> to vector<32x32xf32>
    %96 = arith.truncf %95 : vector<32x32xf32> to vector<32x32xbf16>
    %97 = vector.extract_strided_slice %92 {offsets = [0, 256], sizes = [32, 32], strides = [1, 1]} : vector<32x384xf32> to vector<32x32xf32>
    %98 = arith.truncf %97 : vector<32x32xf32> to vector<32x32xbf16>
    %cst_22 = arith.constant dense<0.000000e+00> : vector<32x32xf32>
    %99 = tpu.matmul %94, %96, %cst_22 {dimension_numbers = #tpu.dot_dimension_numbers<[1], [1], [0], [0], [0, 0, 1, 0], [], []>} : vector<32x32xbf16>, vector<32x32xbf16>, vector<32x32xf32> -> vector<32x32xf32>
    %100 = arith.addf %99, %9 : vector<32x32xf32>
    %cst_23 = arith.constant dense<0xFF800000> : vector<32xf32>
    %101 = vector.multi_reduction <maximumf>, %100, %cst_23 [1] : vector<32x32xf32> to vector<32xf32>
    %102 = vector.shape_cast %101 : vector<32xf32> to vector<32x1xf32>
    %103 = vector.broadcast %102 : vector<32x1xf32> to vector<32x32xf32>
    %104 = arith.subf %100, %103 : vector<32x32xf32>
    %105 = math.exp %104 : vector<32x32xf32>
    %cst_24 = arith.constant dense<0.000000e+00> : vector<32xf32>
    %106 = vector.multi_reduction <add>, %105, %cst_24 [1] : vector<32x32xf32> to vector<32xf32>
    %107 = vector.shape_cast %106 : vector<32xf32> to vector<32x1xf32>
    %108 = tpu.reciprocal %107 {approx = true} : vector<32x1xf32> -> vector<32x1xf32>
    %109 = vector.broadcast %108 : vector<32x1xf32> to vector<32x32xf32>
    %110 = arith.mulf %105, %109 : vector<32x32xf32>
    %111 = arith.truncf %110 : vector<32x32xf32> to vector<32x32xbf16>
    %cst_25 = arith.constant dense<0.000000e+00> : vector<32x32xf32>
    %112 = tpu.matmul %111, %98, %cst_25 {dimension_numbers = #tpu.dot_dimension_numbers<[1], [0], [0], [1], [0, 0, 1, 1], [], []>} : vector<32x32xbf16>, vector<32x32xbf16>, vector<32x32xf32> -> vector<32x32xf32>
    %113 = vector.extract_strided_slice %92 {offsets = [0, 32], sizes = [32, 32], strides = [1, 1]} : vector<32x384xf32> to vector<32x32xf32>
    %114 = arith.truncf %113 : vector<32x32xf32> to vector<32x32xbf16>
    %115 = vector.extract_strided_slice %92 {offsets = [0, 160], sizes = [32, 32], strides = [1, 1]} : vector<32x384xf32> to vector<32x32xf32>
    %116 = arith.truncf %115 : vector<32x32xf32> to vector<32x32xbf16>
    %117 = vector.extract_strided_slice %92 {offsets = [0, 288], sizes = [32, 32], strides = [1, 1]} : vector<32x384xf32> to vector<32x32xf32>
    %118 = arith.truncf %117 : vector<32x32xf32> to vector<32x32xbf16>
    %cst_26 = arith.constant dense<0.000000e+00> : vector<32x32xf32>
    %119 = tpu.matmul %114, %116, %cst_26 {dimension_numbers = #tpu.dot_dimension_numbers<[1], [1], [0], [0], [0, 0, 1, 0], [], []>} : vector<32x32xbf16>, vector<32x32xbf16>, vector<32x32xf32> -> vector<32x32xf32>
    %120 = arith.addf %119, %9 : vector<32x32xf32>
    %cst_27 = arith.constant dense<0xFF800000> : vector<32xf32>
    %121 = vector.multi_reduction <maximumf>, %120, %cst_27 [1] : vector<32x32xf32> to vector<32xf32>
    %122 = vector.shape_cast %121 : vector<32xf32> to vector<32x1xf32>
    %123 = vector.broadcast %122 : vector<32x1xf32> to vector<32x32xf32>
    %124 = arith.subf %120, %123 : vector<32x32xf32>
    %125 = math.exp %124 : vector<32x32xf32>
    %cst_28 = arith.constant dense<0.000000e+00> : vector<32xf32>
    %126 = vector.multi_reduction <add>, %125, %cst_28 [1] : vector<32x32xf32> to vector<32xf32>
    %127 = vector.shape_cast %126 : vector<32xf32> to vector<32x1xf32>
    %128 = tpu.reciprocal %127 {approx = true} : vector<32x1xf32> -> vector<32x1xf32>
    %129 = vector.broadcast %128 : vector<32x1xf32> to vector<32x32xf32>
    %130 = arith.mulf %125, %129 : vector<32x32xf32>
    %131 = arith.truncf %130 : vector<32x32xf32> to vector<32x32xbf16>
    %cst_29 = arith.constant dense<0.000000e+00> : vector<32x32xf32>
    %132 = tpu.matmul %131, %118, %cst_29 {dimension_numbers = #tpu.dot_dimension_numbers<[1], [0], [0], [1], [0, 0, 1, 1], [], []>} : vector<32x32xbf16>, vector<32x32xbf16>, vector<32x32xf32> -> vector<32x32xf32>
    %133 = vector.extract_strided_slice %92 {offsets = [0, 64], sizes = [32, 32], strides = [1, 1]} : vector<32x384xf32> to vector<32x32xf32>
    %134 = arith.truncf %133 : vector<32x32xf32> to vector<32x32xbf16>
    %135 = vector.extract_strided_slice %92 {offsets = [0, 192], sizes = [32, 32], strides = [1, 1]} : vector<32x384xf32> to vector<32x32xf32>
    %136 = arith.truncf %135 : vector<32x32xf32> to vector<32x32xbf16>
    %137 = vector.extract_strided_slice %92 {offsets = [0, 320], sizes = [32, 32], strides = [1, 1]} : vector<32x384xf32> to vector<32x32xf32>
    %138 = arith.truncf %137 : vector<32x32xf32> to vector<32x32xbf16>
    %cst_30 = arith.constant dense<0.000000e+00> : vector<32x32xf32>
    %139 = tpu.matmul %134, %136, %cst_30 {dimension_numbers = #tpu.dot_dimension_numbers<[1], [1], [0], [0], [0, 0, 1, 0], [], []>} : vector<32x32xbf16>, vector<32x32xbf16>, vector<32x32xf32> -> vector<32x32xf32>
    %140 = arith.addf %139, %9 : vector<32x32xf32>
    %cst_31 = arith.constant dense<0xFF800000> : vector<32xf32>
    %141 = vector.multi_reduction <maximumf>, %140, %cst_31 [1] : vector<32x32xf32> to vector<32xf32>
    %142 = vector.shape_cast %141 : vector<32xf32> to vector<32x1xf32>
    %143 = vector.broadcast %142 : vector<32x1xf32> to vector<32x32xf32>
    %144 = arith.subf %140, %143 : vector<32x32xf32>
    %145 = math.exp %144 : vector<32x32xf32>
    %cst_32 = arith.constant dense<0.000000e+00> : vector<32xf32>
    %146 = vector.multi_reduction <add>, %145, %cst_32 [1] : vector<32x32xf32> to vector<32xf32>
    %147 = vector.shape_cast %146 : vector<32xf32> to vector<32x1xf32>
    %148 = tpu.reciprocal %147 {approx = true} : vector<32x1xf32> -> vector<32x1xf32>
    %149 = vector.broadcast %148 : vector<32x1xf32> to vector<32x32xf32>
    %150 = arith.mulf %145, %149 : vector<32x32xf32>
    %151 = arith.truncf %150 : vector<32x32xf32> to vector<32x32xbf16>
    %cst_33 = arith.constant dense<0.000000e+00> : vector<32x32xf32>
    %152 = tpu.matmul %151, %138, %cst_33 {dimension_numbers = #tpu.dot_dimension_numbers<[1], [0], [0], [1], [0, 0, 1, 1], [], []>} : vector<32x32xbf16>, vector<32x32xbf16>, vector<32x32xf32> -> vector<32x32xf32>
    %153 = vector.extract_strided_slice %92 {offsets = [0, 96], sizes = [32, 32], strides = [1, 1]} : vector<32x384xf32> to vector<32x32xf32>
    %154 = arith.truncf %153 : vector<32x32xf32> to vector<32x32xbf16>
    %155 = vector.extract_strided_slice %92 {offsets = [0, 224], sizes = [32, 32], strides = [1, 1]} : vector<32x384xf32> to vector<32x32xf32>
    %156 = arith.truncf %155 : vector<32x32xf32> to vector<32x32xbf16>
    %157 = vector.extract_strided_slice %92 {offsets = [0, 352], sizes = [32, 32], strides = [1, 1]} : vector<32x384xf32> to vector<32x32xf32>
    %158 = arith.truncf %157 : vector<32x32xf32> to vector<32x32xbf16>
    %cst_34 = arith.constant dense<0.000000e+00> : vector<32x32xf32>
    %159 = tpu.matmul %154, %156, %cst_34 {dimension_numbers = #tpu.dot_dimension_numbers<[1], [1], [0], [0], [0, 0, 1, 0], [], []>} : vector<32x32xbf16>, vector<32x32xbf16>, vector<32x32xf32> -> vector<32x32xf32>
    %160 = arith.addf %159, %9 : vector<32x32xf32>
    %cst_35 = arith.constant dense<0xFF800000> : vector<32xf32>
    %161 = vector.multi_reduction <maximumf>, %160, %cst_35 [1] : vector<32x32xf32> to vector<32xf32>
    %162 = vector.shape_cast %161 : vector<32xf32> to vector<32x1xf32>
    %163 = vector.broadcast %162 : vector<32x1xf32> to vector<32x32xf32>
    %164 = arith.subf %160, %163 : vector<32x32xf32>
    %165 = math.exp %164 : vector<32x32xf32>
    %cst_36 = arith.constant dense<0.000000e+00> : vector<32xf32>
    %166 = vector.multi_reduction <add>, %165, %cst_36 [1] : vector<32x32xf32> to vector<32xf32>
    %167 = vector.shape_cast %166 : vector<32xf32> to vector<32x1xf32>
    %168 = tpu.reciprocal %167 {approx = true} : vector<32x1xf32> -> vector<32x1xf32>
    %169 = vector.broadcast %168 : vector<32x1xf32> to vector<32x32xf32>
    %170 = arith.mulf %165, %169 : vector<32x32xf32>
    %171 = arith.truncf %170 : vector<32x32xf32> to vector<32x32xbf16>
    %cst_37 = arith.constant dense<0.000000e+00> : vector<32x32xf32>
    %172 = tpu.matmul %171, %158, %cst_37 {dimension_numbers = #tpu.dot_dimension_numbers<[1], [0], [0], [1], [0, 0, 1, 1], [], []>} : vector<32x32xbf16>, vector<32x32xbf16>, vector<32x32xf32> -> vector<32x32xf32>
    %173 = tpu.concatenate %112, %132, %152, %172 in 1 : vector<32x32xf32>, vector<32x32xf32>, vector<32x32xf32>, vector<32x32xf32> -> vector<32x128xf32>
    %174 = vector.extract_strided_slice %3 {offsets = [64, 0], sizes = [32, 384], strides = [1, 1]} : vector<128x384xf32> to vector<32x384xf32>
    %175 = vector.extract_strided_slice %174 {offsets = [0, 0], sizes = [32, 32], strides = [1, 1]} : vector<32x384xf32> to vector<32x32xf32>
    %176 = arith.truncf %175 : vector<32x32xf32> to vector<32x32xbf16>
    %177 = vector.extract_strided_slice %174 {offsets = [0, 128], sizes = [32, 32], strides = [1, 1]} : vector<32x384xf32> to vector<32x32xf32>
    %178 = arith.truncf %177 : vector<32x32xf32> to vector<32x32xbf16>
    %179 = vector.extract_strided_slice %174 {offsets = [0, 256], sizes = [32, 32], strides = [1, 1]} : vector<32x384xf32> to vector<32x32xf32>
    %180 = arith.truncf %179 : vector<32x32xf32> to vector<32x32xbf16>
    %cst_38 = arith.constant dense<0.000000e+00> : vector<32x32xf32>
    %181 = tpu.matmul %176, %178, %cst_38 {dimension_numbers = #tpu.dot_dimension_numbers<[1], [1], [0], [0], [0, 0, 1, 0], [], []>} : vector<32x32xbf16>, vector<32x32xbf16>, vector<32x32xf32> -> vector<32x32xf32>
    %182 = arith.addf %181, %9 : vector<32x32xf32>
    %cst_39 = arith.constant dense<0xFF800000> : vector<32xf32>
    %183 = vector.multi_reduction <maximumf>, %182, %cst_39 [1] : vector<32x32xf32> to vector<32xf32>
    %184 = vector.shape_cast %183 : vector<32xf32> to vector<32x1xf32>
    %185 = vector.broadcast %184 : vector<32x1xf32> to vector<32x32xf32>
    %186 = arith.subf %182, %185 : vector<32x32xf32>
    %187 = math.exp %186 : vector<32x32xf32>
    %cst_40 = arith.constant dense<0.000000e+00> : vector<32xf32>
    %188 = vector.multi_reduction <add>, %187, %cst_40 [1] : vector<32x32xf32> to vector<32xf32>
    %189 = vector.shape_cast %188 : vector<32xf32> to vector<32x1xf32>
    %190 = tpu.reciprocal %189 {approx = true} : vector<32x1xf32> -> vector<32x1xf32>
    %191 = vector.broadcast %190 : vector<32x1xf32> to vector<32x32xf32>
    %192 = arith.mulf %187, %191 : vector<32x32xf32>
    %193 = arith.truncf %192 : vector<32x32xf32> to vector<32x32xbf16>
    %cst_41 = arith.constant dense<0.000000e+00> : vector<32x32xf32>
    %194 = tpu.matmul %193, %180, %cst_41 {dimension_numbers = #tpu.dot_dimension_numbers<[1], [0], [0], [1], [0, 0, 1, 1], [], []>} : vector<32x32xbf16>, vector<32x32xbf16>, vector<32x32xf32> -> vector<32x32xf32>
    %195 = vector.extract_strided_slice %174 {offsets = [0, 32], sizes = [32, 32], strides = [1, 1]} : vector<32x384xf32> to vector<32x32xf32>
    %196 = arith.truncf %195 : vector<32x32xf32> to vector<32x32xbf16>
    %197 = vector.extract_strided_slice %174 {offsets = [0, 160], sizes = [32, 32], strides = [1, 1]} : vector<32x384xf32> to vector<32x32xf32>
    %198 = arith.truncf %197 : vector<32x32xf32> to vector<32x32xbf16>
    %199 = vector.extract_strided_slice %174 {offsets = [0, 288], sizes = [32, 32], strides = [1, 1]} : vector<32x384xf32> to vector<32x32xf32>
    %200 = arith.truncf %199 : vector<32x32xf32> to vector<32x32xbf16>
    %cst_42 = arith.constant dense<0.000000e+00> : vector<32x32xf32>
    %201 = tpu.matmul %196, %198, %cst_42 {dimension_numbers = #tpu.dot_dimension_numbers<[1], [1], [0], [0], [0, 0, 1, 0], [], []>} : vector<32x32xbf16>, vector<32x32xbf16>, vector<32x32xf32> -> vector<32x32xf32>
    %202 = arith.addf %201, %9 : vector<32x32xf32>
    %cst_43 = arith.constant dense<0xFF800000> : vector<32xf32>
    %203 = vector.multi_reduction <maximumf>, %202, %cst_43 [1] : vector<32x32xf32> to vector<32xf32>
    %204 = vector.shape_cast %203 : vector<32xf32> to vector<32x1xf32>
    %205 = vector.broadcast %204 : vector<32x1xf32> to vector<32x32xf32>
    %206 = arith.subf %202, %205 : vector<32x32xf32>
    %207 = math.exp %206 : vector<32x32xf32>
    %cst_44 = arith.constant dense<0.000000e+00> : vector<32xf32>
    %208 = vector.multi_reduction <add>, %207, %cst_44 [1] : vector<32x32xf32> to vector<32xf32>
    %209 = vector.shape_cast %208 : vector<32xf32> to vector<32x1xf32>
    %210 = tpu.reciprocal %209 {approx = true} : vector<32x1xf32> -> vector<32x1xf32>
    %211 = vector.broadcast %210 : vector<32x1xf32> to vector<32x32xf32>
    %212 = arith.mulf %207, %211 : vector<32x32xf32>
    %213 = arith.truncf %212 : vector<32x32xf32> to vector<32x32xbf16>
    %cst_45 = arith.constant dense<0.000000e+00> : vector<32x32xf32>
    %214 = tpu.matmul %213, %200, %cst_45 {dimension_numbers = #tpu.dot_dimension_numbers<[1], [0], [0], [1], [0, 0, 1, 1], [], []>} : vector<32x32xbf16>, vector<32x32xbf16>, vector<32x32xf32> -> vector<32x32xf32>
    %215 = vector.extract_strided_slice %174 {offsets = [0, 64], sizes = [32, 32], strides = [1, 1]} : vector<32x384xf32> to vector<32x32xf32>
    %216 = arith.truncf %215 : vector<32x32xf32> to vector<32x32xbf16>
    %217 = vector.extract_strided_slice %174 {offsets = [0, 192], sizes = [32, 32], strides = [1, 1]} : vector<32x384xf32> to vector<32x32xf32>
    %218 = arith.truncf %217 : vector<32x32xf32> to vector<32x32xbf16>
    %219 = vector.extract_strided_slice %174 {offsets = [0, 320], sizes = [32, 32], strides = [1, 1]} : vector<32x384xf32> to vector<32x32xf32>
    %220 = arith.truncf %219 : vector<32x32xf32> to vector<32x32xbf16>
    %cst_46 = arith.constant dense<0.000000e+00> : vector<32x32xf32>
    %221 = tpu.matmul %216, %218, %cst_46 {dimension_numbers = #tpu.dot_dimension_numbers<[1], [1], [0], [0], [0, 0, 1, 0], [], []>} : vector<32x32xbf16>, vector<32x32xbf16>, vector<32x32xf32> -> vector<32x32xf32>
    %222 = arith.addf %221, %9 : vector<32x32xf32>
    %cst_47 = arith.constant dense<0xFF800000> : vector<32xf32>
    %223 = vector.multi_reduction <maximumf>, %222, %cst_47 [1] : vector<32x32xf32> to vector<32xf32>
    %224 = vector.shape_cast %223 : vector<32xf32> to vector<32x1xf32>
    %225 = vector.broadcast %224 : vector<32x1xf32> to vector<32x32xf32>
    %226 = arith.subf %222, %225 : vector<32x32xf32>
    %227 = math.exp %226 : vector<32x32xf32>
    %cst_48 = arith.constant dense<0.000000e+00> : vector<32xf32>
    %228 = vector.multi_reduction <add>, %227, %cst_48 [1] : vector<32x32xf32> to vector<32xf32>
    %229 = vector.shape_cast %228 : vector<32xf32> to vector<32x1xf32>
    %230 = tpu.reciprocal %229 {approx = true} : vector<32x1xf32> -> vector<32x1xf32>
    %231 = vector.broadcast %230 : vector<32x1xf32> to vector<32x32xf32>
    %232 = arith.mulf %227, %231 : vector<32x32xf32>
    %233 = arith.truncf %232 : vector<32x32xf32> to vector<32x32xbf16>
    %cst_49 = arith.constant dense<0.000000e+00> : vector<32x32xf32>
    %234 = tpu.matmul %233, %220, %cst_49 {dimension_numbers = #tpu.dot_dimension_numbers<[1], [0], [0], [1], [0, 0, 1, 1], [], []>} : vector<32x32xbf16>, vector<32x32xbf16>, vector<32x32xf32> -> vector<32x32xf32>
    %235 = vector.extract_strided_slice %174 {offsets = [0, 96], sizes = [32, 32], strides = [1, 1]} : vector<32x384xf32> to vector<32x32xf32>
    %236 = arith.truncf %235 : vector<32x32xf32> to vector<32x32xbf16>
    %237 = vector.extract_strided_slice %174 {offsets = [0, 224], sizes = [32, 32], strides = [1, 1]} : vector<32x384xf32> to vector<32x32xf32>
    %238 = arith.truncf %237 : vector<32x32xf32> to vector<32x32xbf16>
    %239 = vector.extract_strided_slice %174 {offsets = [0, 352], sizes = [32, 32], strides = [1, 1]} : vector<32x384xf32> to vector<32x32xf32>
    %240 = arith.truncf %239 : vector<32x32xf32> to vector<32x32xbf16>
    %cst_50 = arith.constant dense<0.000000e+00> : vector<32x32xf32>
    %241 = tpu.matmul %236, %238, %cst_50 {dimension_numbers = #tpu.dot_dimension_numbers<[1], [1], [0], [0], [0, 0, 1, 0], [], []>} : vector<32x32xbf16>, vector<32x32xbf16>, vector<32x32xf32> -> vector<32x32xf32>
    %242 = arith.addf %241, %9 : vector<32x32xf32>
    %cst_51 = arith.constant dense<0xFF800000> : vector<32xf32>
    %243 = vector.multi_reduction <maximumf>, %242, %cst_51 [1] : vector<32x32xf32> to vector<32xf32>
    %244 = vector.shape_cast %243 : vector<32xf32> to vector<32x1xf32>
    %245 = vector.broadcast %244 : vector<32x1xf32> to vector<32x32xf32>
    %246 = arith.subf %242, %245 : vector<32x32xf32>
    %247 = math.exp %246 : vector<32x32xf32>
    %cst_52 = arith.constant dense<0.000000e+00> : vector<32xf32>
    %248 = vector.multi_reduction <add>, %247, %cst_52 [1] : vector<32x32xf32> to vector<32xf32>
    %249 = vector.shape_cast %248 : vector<32xf32> to vector<32x1xf32>
    %250 = tpu.reciprocal %249 {approx = true} : vector<32x1xf32> -> vector<32x1xf32>
    %251 = vector.broadcast %250 : vector<32x1xf32> to vector<32x32xf32>
    %252 = arith.mulf %247, %251 : vector<32x32xf32>
    %253 = arith.truncf %252 : vector<32x32xf32> to vector<32x32xbf16>
    %cst_53 = arith.constant dense<0.000000e+00> : vector<32x32xf32>
    %254 = tpu.matmul %253, %240, %cst_53 {dimension_numbers = #tpu.dot_dimension_numbers<[1], [0], [0], [1], [0, 0, 1, 1], [], []>} : vector<32x32xbf16>, vector<32x32xbf16>, vector<32x32xf32> -> vector<32x32xf32>
    %255 = tpu.concatenate %194, %214, %234, %254 in 1 : vector<32x32xf32>, vector<32x32xf32>, vector<32x32xf32>, vector<32x32xf32> -> vector<32x128xf32>
    %256 = vector.extract_strided_slice %3 {offsets = [96, 0], sizes = [32, 384], strides = [1, 1]} : vector<128x384xf32> to vector<32x384xf32>
    %257 = vector.extract_strided_slice %256 {offsets = [0, 0], sizes = [32, 32], strides = [1, 1]} : vector<32x384xf32> to vector<32x32xf32>
    %258 = arith.truncf %257 : vector<32x32xf32> to vector<32x32xbf16>
    %259 = vector.extract_strided_slice %256 {offsets = [0, 128], sizes = [32, 32], strides = [1, 1]} : vector<32x384xf32> to vector<32x32xf32>
    %260 = arith.truncf %259 : vector<32x32xf32> to vector<32x32xbf16>
    %261 = vector.extract_strided_slice %256 {offsets = [0, 256], sizes = [32, 32], strides = [1, 1]} : vector<32x384xf32> to vector<32x32xf32>
    %262 = arith.truncf %261 : vector<32x32xf32> to vector<32x32xbf16>
    %cst_54 = arith.constant dense<0.000000e+00> : vector<32x32xf32>
    %263 = tpu.matmul %258, %260, %cst_54 {dimension_numbers = #tpu.dot_dimension_numbers<[1], [1], [0], [0], [0, 0, 1, 0], [], []>} : vector<32x32xbf16>, vector<32x32xbf16>, vector<32x32xf32> -> vector<32x32xf32>
    %264 = arith.addf %263, %9 : vector<32x32xf32>
    %cst_55 = arith.constant dense<0xFF800000> : vector<32xf32>
    %265 = vector.multi_reduction <maximumf>, %264, %cst_55 [1] : vector<32x32xf32> to vector<32xf32>
    %266 = vector.shape_cast %265 : vector<32xf32> to vector<32x1xf32>
    %267 = vector.broadcast %266 : vector<32x1xf32> to vector<32x32xf32>
    %268 = arith.subf %264, %267 : vector<32x32xf32>
    %269 = math.exp %268 : vector<32x32xf32>
    %cst_56 = arith.constant dense<0.000000e+00> : vector<32xf32>
    %270 = vector.multi_reduction <add>, %269, %cst_56 [1] : vector<32x32xf32> to vector<32xf32>
    %271 = vector.shape_cast %270 : vector<32xf32> to vector<32x1xf32>
    %272 = tpu.reciprocal %271 {approx = true} : vector<32x1xf32> -> vector<32x1xf32>
    %273 = vector.broadcast %272 : vector<32x1xf32> to vector<32x32xf32>
    %274 = arith.mulf %269, %273 : vector<32x32xf32>
    %275 = arith.truncf %274 : vector<32x32xf32> to vector<32x32xbf16>
    %cst_57 = arith.constant dense<0.000000e+00> : vector<32x32xf32>
    %276 = tpu.matmul %275, %262, %cst_57 {dimension_numbers = #tpu.dot_dimension_numbers<[1], [0], [0], [1], [0, 0, 1, 1], [], []>} : vector<32x32xbf16>, vector<32x32xbf16>, vector<32x32xf32> -> vector<32x32xf32>
    %277 = vector.extract_strided_slice %256 {offsets = [0, 32], sizes = [32, 32], strides = [1, 1]} : vector<32x384xf32> to vector<32x32xf32>
    %278 = arith.truncf %277 : vector<32x32xf32> to vector<32x32xbf16>
    %279 = vector.extract_strided_slice %256 {offsets = [0, 160], sizes = [32, 32], strides = [1, 1]} : vector<32x384xf32> to vector<32x32xf32>
    %280 = arith.truncf %279 : vector<32x32xf32> to vector<32x32xbf16>
    %281 = vector.extract_strided_slice %256 {offsets = [0, 288], sizes = [32, 32], strides = [1, 1]} : vector<32x384xf32> to vector<32x32xf32>
    %282 = arith.truncf %281 : vector<32x32xf32> to vector<32x32xbf16>
    %cst_58 = arith.constant dense<0.000000e+00> : vector<32x32xf32>
    %283 = tpu.matmul %278, %280, %cst_58 {dimension_numbers = #tpu.dot_dimension_numbers<[1], [1], [0], [0], [0, 0, 1, 0], [], []>} : vector<32x32xbf16>, vector<32x32xbf16>, vector<32x32xf32> -> vector<32x32xf32>
    %284 = arith.addf %283, %9 : vector<32x32xf32>
    %cst_59 = arith.constant dense<0xFF800000> : vector<32xf32>
    %285 = vector.multi_reduction <maximumf>, %284, %cst_59 [1] : vector<32x32xf32> to vector<32xf32>
    %286 = vector.shape_cast %285 : vector<32xf32> to vector<32x1xf32>
    %287 = vector.broadcast %286 : vector<32x1xf32> to vector<32x32xf32>
    %288 = arith.subf %284, %287 : vector<32x32xf32>
    %289 = math.exp %288 : vector<32x32xf32>
    %cst_60 = arith.constant dense<0.000000e+00> : vector<32xf32>
    %290 = vector.multi_reduction <add>, %289, %cst_60 [1] : vector<32x32xf32> to vector<32xf32>
    %291 = vector.shape_cast %290 : vector<32xf32> to vector<32x1xf32>
    %292 = tpu.reciprocal %291 {approx = true} : vector<32x1xf32> -> vector<32x1xf32>
    %293 = vector.broadcast %292 : vector<32x1xf32> to vector<32x32xf32>
    %294 = arith.mulf %289, %293 : vector<32x32xf32>
    %295 = arith.truncf %294 : vector<32x32xf32> to vector<32x32xbf16>
    %cst_61 = arith.constant dense<0.000000e+00> : vector<32x32xf32>
    %296 = tpu.matmul %295, %282, %cst_61 {dimension_numbers = #tpu.dot_dimension_numbers<[1], [0], [0], [1], [0, 0, 1, 1], [], []>} : vector<32x32xbf16>, vector<32x32xbf16>, vector<32x32xf32> -> vector<32x32xf32>
    %297 = vector.extract_strided_slice %256 {offsets = [0, 64], sizes = [32, 32], strides = [1, 1]} : vector<32x384xf32> to vector<32x32xf32>
    %298 = arith.truncf %297 : vector<32x32xf32> to vector<32x32xbf16>
    %299 = vector.extract_strided_slice %256 {offsets = [0, 192], sizes = [32, 32], strides = [1, 1]} : vector<32x384xf32> to vector<32x32xf32>
    %300 = arith.truncf %299 : vector<32x32xf32> to vector<32x32xbf16>
    %301 = vector.extract_strided_slice %256 {offsets = [0, 320], sizes = [32, 32], strides = [1, 1]} : vector<32x384xf32> to vector<32x32xf32>
    %302 = arith.truncf %301 : vector<32x32xf32> to vector<32x32xbf16>
    %cst_62 = arith.constant dense<0.000000e+00> : vector<32x32xf32>
    %303 = tpu.matmul %298, %300, %cst_62 {dimension_numbers = #tpu.dot_dimension_numbers<[1], [1], [0], [0], [0, 0, 1, 0], [], []>} : vector<32x32xbf16>, vector<32x32xbf16>, vector<32x32xf32> -> vector<32x32xf32>
    %304 = arith.addf %303, %9 : vector<32x32xf32>
    %cst_63 = arith.constant dense<0xFF800000> : vector<32xf32>
    %305 = vector.multi_reduction <maximumf>, %304, %cst_63 [1] : vector<32x32xf32> to vector<32xf32>
    %306 = vector.shape_cast %305 : vector<32xf32> to vector<32x1xf32>
    %307 = vector.broadcast %306 : vector<32x1xf32> to vector<32x32xf32>
    %308 = arith.subf %304, %307 : vector<32x32xf32>
    %309 = math.exp %308 : vector<32x32xf32>
    %cst_64 = arith.constant dense<0.000000e+00> : vector<32xf32>
    %310 = vector.multi_reduction <add>, %309, %cst_64 [1] : vector<32x32xf32> to vector<32xf32>
    %311 = vector.shape_cast %310 : vector<32xf32> to vector<32x1xf32>
    %312 = tpu.reciprocal %311 {approx = true} : vector<32x1xf32> -> vector<32x1xf32>
    %313 = vector.broadcast %312 : vector<32x1xf32> to vector<32x32xf32>
    %314 = arith.mulf %309, %313 : vector<32x32xf32>
    %315 = arith.truncf %314 : vector<32x32xf32> to vector<32x32xbf16>
    %cst_65 = arith.constant dense<0.000000e+00> : vector<32x32xf32>
    %316 = tpu.matmul %315, %302, %cst_65 {dimension_numbers = #tpu.dot_dimension_numbers<[1], [0], [0], [1], [0, 0, 1, 1], [], []>} : vector<32x32xbf16>, vector<32x32xbf16>, vector<32x32xf32> -> vector<32x32xf32>
    %317 = vector.extract_strided_slice %256 {offsets = [0, 96], sizes = [32, 32], strides = [1, 1]} : vector<32x384xf32> to vector<32x32xf32>
    %318 = arith.truncf %317 : vector<32x32xf32> to vector<32x32xbf16>
    %319 = vector.extract_strided_slice %256 {offsets = [0, 224], sizes = [32, 32], strides = [1, 1]} : vector<32x384xf32> to vector<32x32xf32>
    %320 = arith.truncf %319 : vector<32x32xf32> to vector<32x32xbf16>
    %321 = vector.extract_strided_slice %256 {offsets = [0, 352], sizes = [32, 32], strides = [1, 1]} : vector<32x384xf32> to vector<32x32xf32>
    %322 = arith.truncf %321 : vector<32x32xf32> to vector<32x32xbf16>
    %cst_66 = arith.constant dense<0.000000e+00> : vector<32x32xf32>
    %323 = tpu.matmul %318, %320, %cst_66 {dimension_numbers = #tpu.dot_dimension_numbers<[1], [1], [0], [0], [0, 0, 1, 0], [], []>} : vector<32x32xbf16>, vector<32x32xbf16>, vector<32x32xf32> -> vector<32x32xf32>
    %324 = arith.addf %323, %9 : vector<32x32xf32>
    %cst_67 = arith.constant dense<0xFF800000> : vector<32xf32>
    %325 = vector.multi_reduction <maximumf>, %324, %cst_67 [1] : vector<32x32xf32> to vector<32xf32>
    %326 = vector.shape_cast %325 : vector<32xf32> to vector<32x1xf32>
    %327 = vector.broadcast %326 : vector<32x1xf32> to vector<32x32xf32>
    %328 = arith.subf %324, %327 : vector<32x32xf32>
    %329 = math.exp %328 : vector<32x32xf32>
    %cst_68 = arith.constant dense<0.000000e+00> : vector<32xf32>
    %330 = vector.multi_reduction <add>, %329, %cst_68 [1] : vector<32x32xf32> to vector<32xf32>
    %331 = vector.shape_cast %330 : vector<32xf32> to vector<32x1xf32>
    %332 = tpu.reciprocal %331 {approx = true} : vector<32x1xf32> -> vector<32x1xf32>
    %333 = vector.broadcast %332 : vector<32x1xf32> to vector<32x32xf32>
    %334 = arith.mulf %329, %333 : vector<32x32xf32>
    %335 = arith.truncf %334 : vector<32x32xf32> to vector<32x32xbf16>
    %cst_69 = arith.constant dense<0.000000e+00> : vector<32x32xf32>
    %336 = tpu.matmul %335, %322, %cst_69 {dimension_numbers = #tpu.dot_dimension_numbers<[1], [0], [0], [1], [0, 0, 1, 1], [], []>} : vector<32x32xbf16>, vector<32x32xbf16>, vector<32x32xf32> -> vector<32x32xf32>
    %337 = tpu.concatenate %276, %296, %316, %336 in 1 : vector<32x32xf32>, vector<32x32xf32>, vector<32x32xf32>, vector<32x32xf32> -> vector<32x128xf32>
    %338 = tpu.concatenate %91, %173, %255, %337 in 0 : vector<32x128xf32>, vector<32x128xf32>, vector<32x128xf32>, vector<32x128xf32> -> vector<128x128xf32>
    %339 = arith.truncf %338 : vector<128x128xf32> to vector<128x128xbf16>
    %c0_70 = arith.constant 0 : index
    %c0_71 = arith.constant 0 : index
    %340 = vector.load %arg3[%c0_70, %c0_71] : memref<128x384xbf16, #tpu.memory_space<vmem>>, vector<128x384xbf16>
    %cst_72 = arith.constant dense<0.000000e+00> : vector<128x384xf32>
    %341 = tpu.matmul %339, %340, %cst_72 {dimension_numbers = #tpu.dot_dimension_numbers<[1], [0], [0], [1], [0, 0, 1, 1], [], []>} : vector<128x128xbf16>, vector<128x384xbf16>, vector<128x384xf32> -> vector<128x384xf32>
    %c0_73 = arith.constant 0 : index
    %c0_74 = arith.constant 0 : index
    %342 = vector.load %arg4[%c0_73, %c0_74] : memref<1x384xf32, #tpu.memory_space<vmem>>, vector<1x384xf32>
    %343 = vector.broadcast %342 : vector<1x384xf32> to vector<128x384xf32>
    %344 = arith.addf %341, %343 : vector<128x384xf32>
    %345 = vector.shape_cast %344 : vector<128x384xf32> to vector<4x32x384xf32>
    %c0_75 = arith.constant 0 : index
    %c0_76 = arith.constant 0 : index
    %c0_77 = arith.constant 0 : index
    %346 = vector.load %arg5[%c0_75, %c0_76, %c0_77] : memref<4x32x384xf32, #tpu.memory_space<vmem>>, vector<4x32x384xf32>
    tpu.vector_store %arg5[%c0_75, %c0_76, %c0_77], %345 {strides = array<i32>} : memref<4x32x384xf32, #tpu.memory_space<vmem>>, vector<4x32x384xf32>,
    return
  }
  func.func @transform_0(%arg0: i32) -> (i32, i32, i32) {
    %c0_i32 = arith.constant 0 : i32
    %c0_i32_0 = arith.constant 0 : i32
    %c0_i32_1 = arith.constant 0 : i32
    return %arg0, %c0_i32, %c0_i32_0 : i32, i32, i32
  }
  func.func @transform_1(%arg0: i32) -> (i32, i32) {
    %c0_i32 = arith.constant 0 : i32
    %c0_i32_0 = arith.constant 0 : i32
    %c0_i32_1 = arith.constant 0 : i32
    return %c0_i32, %c0_i32_0 : i32, i32
  }
  func.func @transform_2(%arg0: i32) -> (i32, i32) {
    %c0_i32 = arith.constant 0 : i32
    %c0_i32_0 = arith.constant 0 : i32
    %c0_i32_1 = arith.constant 0 : i32
    return %c0_i32, %c0_i32_0 : i32, i32
  }
  func.func @transform_3(%arg0: i32) -> (i32, i32) {
    %c0_i32 = arith.constant 0 : i32
    %c0_i32_0 = arith.constant 0 : i32
    %c0_i32_1 = arith.constant 0 : i32
    return %c0_i32, %c0_i32_0 : i32, i32
  }
  func.func @transform_4(%arg0: i32) -> (i32, i32, i32) {
    %c0_i32 = arith.constant 0 : i32
    %c0_i32_0 = arith.constant 0 : i32
    %c0_i32_1 = arith.constant 0 : i32
    return %arg0, %c0_i32, %c0_i32_0 : i32, i32, i32
  }
}

</mosaic_0001>

<bundles_post_ra>
// kernel: tpu_custom_call.1
= control target key start
LH: loop header
LB: loop body
LE: loop exit
PB: predicated region body
PF: predicated region fallthrough
CT: control target
= control target key end

     0   :  { %9 = vsyncpa [#allocation3], 0  ;;  %s7240_s0 = inlined_call_operand.hbm [shape: bf16[4,32,384], index: 0, kind: input, shape index: {}]   ;;  %s7241_s1 = inlined_call_operand.hbm [shape: bf16[384,384], index: 1, kind: input, shape index: {}]   ;;  %s7242_s2 = inlined_call_operand.hbm [shape: bf16[128,384], index: 2, kind: input, shape index: {}]   ;;  %s7243_s3 = inlined_call_operand.vmem [shape: f32[1,384], index: 3, kind: input, shape index: {}]   ;;  %s7244_s4 = inlined_call_operand.hbm [shape: f32[4,32,384], index: 4, kind: output, shape index: {}]  }
   0x1   :  { %10 = vsyncpa [#allocation6], 0 }
   0x2   :  { %11 = vsyncpa [#allocation4], 0  ;;  %s6082_s15 = smov [#allocation5]   ;;  %s6083_s17 = smov [#allocation2]  }
   0x3   :  { %s29_s16 = sshll.u32 %s6082_s15, 4  ;;  %s17_s18 = sshll.u32 %s6083_s17, 4  ;;  %s30_s16 = int_to_ptr.vmem [resolvable:$true] %s29_s16  ;;  %s6120_s18 = int_to_ptr.vmem [resolvable:$true] %s17_s18 }
   0x4   :  { %s5988_s21 = scalar_lea.hbm %s7241_s1, 9216 }
   0x5   :  { %p5989_p0 = scmp.ne.s32.totalorder %s7241_s1, %s5988_s21  ;;  %p5992_p1 = scmp.lt.u32.totalorder %s5988_s21, %s7241_s1 }
   0x7   :  { %p5994_p2 = pnand %p5992_p1, %p5989_p0 }
   0x9   :  { %5997 = shalt.err (!%p5994_p2)
}
   0xa   :  { %s5998_s26 = scalar_lea.vmem %s30_s16, 9216  ;;  %p6003_p4 = scmp.lt.s32.totalorder %s30_s16, %s30_s16 }
   0xb   :  { %p5999_p3 = scmp.ne.s32.totalorder %s30_s16, %s5998_s26  ;;  %p6004_p5 = scmp.lt.s32.totalorder %s5998_s26, %s5998_s26 }
   0xd   :  { %p6005_p6 = por %p6004_p5, %p6003_p4 }
   0xf   :  { %p6006_p7 = pnand %p6005_p6, %p5999_p3 }
  0x11   :  { %6009 = shalt.err (!%p6006_p7)
}
  0x12   :  { %s6084_s27 = smov 192   ;;  %s6085_s28 = smov 12  }
  0x13   :  { %35 = dma.hbm_to_vmem [thread:$0]  %s7241_s1, 9216, %s30_s16, [#allocation6], %s6084_s27, %s6084_s27, %s6085_s28  }
  0x14   :  { %s6010_s7 = scalar_lea.hbm %s7240_s0, 3072 }
  0x15   :  { %p6011_p8 = scmp.ne.s32.totalorder %s7240_s0, %s6010_s7  ;;  %p6014_p9 = scmp.lt.u32.totalorder %s6010_s7, %s7240_s0 }
  0x17   :  { %p6016_p10 = pnand %p6014_p9, %p6011_p8 }
  0x19   :  { %6019 = shalt.err (!%p6016_p10)
}
  0x1a   :  { %s6020_s12 = scalar_lea.vmem %s6120_s18, 3072  ;;  %p6025_p12 = scmp.lt.s32.totalorder %s6120_s18, %s6120_s18 }
  0x1b   :  { %p6021_p11 = scmp.ne.s32.totalorder %s6120_s18, %s6020_s12  ;;  %p6026_p13 = scmp.lt.s32.totalorder %s6020_s12, %s6020_s12 }
  0x1d   :  { %p6027_p0 = por %p6026_p13, %p6025_p12 }
  0x1f   :  { %p6028_p1 = pnand %p6027_p0, %p6021_p11 }
  0x21   :  { %6031 = shalt.err (!%p6028_p1)
}
  0x22   :  { %23 = dma.hbm_to_vmem [thread:$0]  %s7240_s0, 3072, %s6120_s18, [#allocation3], %s6084_s27, %s6084_s27, %s6085_s28  }
  0x23   :  { %s6086_s14 = smov [#allocation7]   ;;  %s6032_s19 = scalar_lea.hbm %s7242_s2, 3072 }
  0x24   :  { %s41_s15 = sshll.u32 %s6086_s14, 4  ;;  %p6033_p2 = scmp.ne.s32.totalorder %s7242_s2, %s6032_s19  ;;  %s42_s15 = int_to_ptr.vmem [resolvable:$true] %s41_s15 }
  0x25   :  { %p6036_p3 = scmp.lt.u32.totalorder %s6032_s19, %s7242_s2 }
  0x27   :  { %p6038_p4 = pnand %p6036_p3, %p6033_p2 }
  0x29   :  { %6041 = shalt.err (!%p6038_p4)
}
  0x2a   :  { %s6042_s24 = scalar_lea.vmem %s42_s15, 3072  ;;  %p6047_p6 = scmp.lt.s32.totalorder %s42_s15, %s42_s15 }
  0x2b   :  { %p6043_p5 = scmp.ne.s32.totalorder %s42_s15, %s6042_s24  ;;  %p6048_p7 = scmp.lt.s32.totalorder %s6042_s24, %s6042_s24 }
  0x2d   :  { %p6049_p8 = por %p6048_p7, %p6047_p6 }
  0x2f   :  { %p6050_p9 = pnand %p6049_p8, %p6043_p5 }
  0x31   :  { %6053 = shalt.err (!%p6050_p9)
}
  0x32   :  { %47 = dma.hbm_to_vmem [thread:$0]  %s7242_s2, 3072, %s42_s15, [#allocation6], %s6084_s27, %s6084_s27, %s6085_s28  }
  0x33   :  { %6076 = dma.done.wait [#allocation3], 3072  }
  0x34   :  { %6077 = vsyncadd [#allocation3], 4294964224 }
  0x35   :  { %6078 = dma.done.wait [#allocation6], 12288  }
  0x36   :  { %6079 = vsyncadd [#allocation6], 4294955008  ;;  %v5572_v0 = vld [vmem:[#allocation5 + $0x4] ss:$12 sps:$4 sm:$0xff]   ;;  %v5574_v1 = vld [vmem:[#allocation5] ss:$12 sps:$4 sm:$0xff]  }
  0x37   :  { %700 = vmatprep.subr.bf16.mxu0 %v5572_v0  ;;  %v5575_v2 = vld [vmem:[#allocation5 + $0x1c] ss:$12 sps:$4 sm:$0xff]   ;;  %v5577_v3 = vld [vmem:[#allocation5 + $0x18] ss:$12 sps:$4 sm:$0xff]   ;;  %v5578_v4 = vld [vmem:[#allocation5 + $0x34] ss:$12 sps:$4 sm:$0xff]  }
  0x38   :  { %701 = vmatpush1.bf16.msra.mxu0 %v5574_v1  ;;  %v5580_v5 = vld [vmem:[#allocation5 + $0x30] ss:$12 sps:$4 sm:$0xff]   ;;  %v5581_v6 = vld [vmem:[#allocation5 + $0x4c] ss:$12 sps:$4 sm:$0xff]   ;;  %v5583_v7 = vld [vmem:[#allocation5 + $0x48] ss:$12 sps:$4 sm:$0xff]  }
  0x39   :  { %702 = vmatprep.subr.bf16.mxu0 %v5575_v2  ;;  %v5584_v8 = vld [vmem:[#allocation5 + $0x64] ss:$12 sps:$4 sm:$0xff]   ;;  %v5586_v9 = vld [vmem:[#allocation5 + $0x60] ss:$12 sps:$4 sm:$0xff]   ;;  %v5587_v10 = vld [vmem:[#allocation5 + $0x7c] ss:$12 sps:$4 sm:$0xff]  }
  0x3a   :  { %v5589_v11 = vld [vmem:[#allocation5 + $0x78] ss:$12 sps:$4 sm:$0xff]   ;;  %v5590_v12 = vld [vmem:[#allocation5 + $0x94] ss:$12 sps:$4 sm:$0xff]   ;;  %v5592_v14 = vld [vmem:[#allocation5 + $0x90] ss:$12 sps:$4 sm:$0xff]  }
  0x3b   :  { %v5622_v13 = vld [vmem:[#allocation2 + $0x4] ss:$12 sps:$4 sm:$0xff]   ;;  %v5593_v15 = vld [vmem:[#allocation5 + $0xac] ss:$12 sps:$4 sm:$0xff]   ;;  %v5595_v16 = vld [vmem:[#allocation5 + $0xa8] ss:$12 sps:$4 sm:$0xff]  }
  0x3c   :  { %703 = vmatpush1.bf16.msra.mxu0 %v5577_v3  ;;  %732 = vmatprep.mubr.bf16.mxu0 %v5622_v13  ;;  %v5596_v17 = vld [vmem:[#allocation5 + $0xc4] ss:$12 sps:$4 sm:$0xff]   ;;  %v5598_v18 = vld [vmem:[#allocation5 + $0xc0] ss:$12 sps:$4 sm:$0xff]   ;;  %v5599_v19 = vld [vmem:[#allocation5 + $0xdc] ss:$12 sps:$4 sm:$0xff]  }
  0x3d   :  { %704 = vmatprep.subr.bf16.mxu0 %v5578_v4  ;;  %958 = vmatprep.mubr.bf16.mxu1 %v5622_v13  ;;  %v5601_v20 = vld [vmem:[#allocation5 + $0xd8] ss:$12 sps:$4 sm:$0xff]   ;;  %v5602_v21 = vld [vmem:[#allocation5 + $0xf4] ss:$12 sps:$4 sm:$0xff]   ;;  %v5604_v22 = vld [vmem:[#allocation5 + $0xf0] ss:$12 sps:$4 sm:$0xff]  }
  0x3e   :  { %v5605_v23 = vld [vmem:[#allocation5 + $0x10c] ss:$12 sps:$4 sm:$0xff]   ;;  %v5607_v24 = vld [vmem:[#allocation5 + $0x108] ss:$12 sps:$4 sm:$0xff]   ;;  %v5608_v25 = vld [vmem:[#allocation5 + $0x124] ss:$12 sps:$4 sm:$0xff]  }
  0x3f   :  { %v5610_v26 = vld [vmem:[#allocation5 + $0x120] ss:$12 sps:$4 sm:$0xff]   ;;  %v5611_v27 = vld [vmem:[#allocation5 + $0x13c] ss:$12 sps:$4 sm:$0xff]   ;;  %v5613_v28 = vld [vmem:[#allocation5 + $0x138] ss:$12 sps:$4 sm:$0xff]  }
  0x40   :  { %705 = vmatpush1.bf16.msra.mxu0 %v5580_v5  ;;  %v5614_v29 = vld [vmem:[#allocation5 + $0x154] ss:$12 sps:$4 sm:$0xff]   ;;  %v5616_v32 = vld [vmem:[#allocation5 + $0x150] ss:$12 sps:$4 sm:$0xff]   ;;  %v5680_v35 = vld [vmem:[#allocation5 + $0xf8] ss:$12 sps:$4 sm:$0xff]  }
  0x41   :  { %706 = vmatprep.subr.bf16.mxu0 %v5581_v6  ;;  %v5676_v30 = vld [vmem:[#allocation5 + $0xc8] ss:$12 sps:$4 sm:$0xff]   ;;  %v5678_v33 = vld [vmem:[#allocation5 + $0xe0] ss:$12 sps:$4 sm:$0xff]   ;;  %v5681_v38 = vld [vmem:[#allocation5 + $0x38] ss:$12 sps:$4 sm:$0xff]  }
  0x42   :  { %v5677_v31 = vld [vmem:[#allocation5 + $0x8] ss:$12 sps:$4 sm:$0xff]   ;;  %4831 = vmatprep.subr.bf16.mxu1 %v5676_v30  ;;  %v5679_v34 = vld [vmem:[#allocation5 + $0x20] ss:$12 sps:$4 sm:$0xff]   ;;  %v5682_v39 = vld [vmem:[#allocation5 + $0x110] ss:$12 sps:$4 sm:$0xff]  }
  0x43   :  { %4832 = vmatpush3.bf16.msra.mxu1 %v5677_v31  ;;  %v5617_v36 = vld [vmem:[#allocation5 + $0x16c] ss:$12 sps:$4 sm:$0xff]   ;;  %v5619_v37 = vld [vmem:[#allocation5 + $0x168] ss:$12 sps:$4 sm:$0xff]   ;;  %v5631_v41 = vld [vmem:[#allocation5 + $0x184] ss:$12 sps:$4 sm:$0xff]  }
  0x44   :  { %707 = vmatpush1.bf16.msra.mxu0 %v5583_v7  ;;  %4833 = vmatprep.subr.bf16.mxu1 %v5678_v33  ;;  %v5620_v40 = vld [vmem:[#allocation2] ss:$12 sps:$4 sm:$0xff]   ;;  %v5623_v42 = vld [vmem:[#allocation2 + $0x1c] ss:$12 sps:$4 sm:$0xff]   ;;  %v5635_v47 = vld [vmem:[#allocation5 + $0x198] ss:$12 sps:$4 sm:$0xff]  }
  0x45   :  { %708 = vmatprep.subr.bf16.mxu0 %v5584_v8  ;;  %v5629_v43 = vld [vmem:[#allocation5 + $0x180] ss:$12 sps:$4 sm:$0xff]   ;;  %v5683_v44 = vld [vmem:[#allocation5 + $0x50] ss:$12 sps:$4 sm:$0xff]   ;;  %v5684_v46 = vld [vmem:[#allocation5 + $0x128] ss:$12 sps:$4 sm:$0xff]  }
  0x46   :  { %v5637_v45 = vld [vmem:[#allocation5 + $0x19c] ss:$12 sps:$4 sm:$0xff]   ;;  %v5686_v49 = vld [vmem:[#allocation5 + $0x140] ss:$12 sps:$4 sm:$0xff]   ;;  %v5625_v50 = vld [vmem:[#allocation2 + $0x18] ss:$12 sps:$4 sm:$0xff]  }
  0x47   :  { %4834 = vmatpush3.bf16.msra.mxu1 %v5679_v34  ;;  %v5685_v48 = vld [vmem:[#allocation5 + $0x68] ss:$12 sps:$4 sm:$0xff]   ;;  %v5641_v53 = vld [vmem:[#allocation5 + $0x1b0] ss:$12 sps:$4 sm:$0xff]   ;;  %v5687_v54 = vld [vmem:[#allocation5 + $0x80] ss:$12 sps:$4 sm:$0xff]  }
  0x48   :  { %709 = vmatpush1.bf16.msra.mxu0 %v5586_v9  ;;  %4835 = vmatprep.subr.bf16.mxu1 %v5680_v35  ;;  %v5643_v51 = vld [vmem:[#allocation5 + $0x1b4] ss:$12 sps:$4 sm:$0xff]   ;;  %v5649_v55 = vld [vmem:[#allocation5 + $0x1cc] ss:$12 sps:$4 sm:$0xff]   ;;  %v5655_v59 = vld [vmem:[#allocation5 + $0x1e4] ss:$12 sps:$4 sm:$0xff]  }
  0x49   :  { %710 = vmatprep.subr.bf16.mxu0 %v5587_v10  ;;  %v5626_v52 = vld [vmem:[#allocation2 + $0x34] ss:$12 sps:$4 sm:$0xff]   ;;  %v5688_v56 = vld [vmem:[#allocation5 + $0x158] ss:$12 sps:$4 sm:$0xff]   ;;  %v5690_v60 = vld [vmem:[#allocation5 + $0x170] ss:$12 sps:$4 sm:$0xff]  }
  0x4a   :  { %v5647_v57 = vld [vmem:[#allocation5 + $0x1c8] ss:$12 sps:$4 sm:$0xff]   ;;  %v5689_v58 = vld [vmem:[#allocation5 + $0x98] ss:$12 sps:$4 sm:$0xff]   ;;  %v5628_v61 = vld [vmem:[#allocation2 + $0x30] ss:$12 sps:$4 sm:$0xff]  }
  0x4b   :  { %4836 = vmatpush3.bf16.msra.mxu1 %v5681_v38  ;;  %v5691_v62 = vld [vmem:[#allocation5 + $0xb0] ss:$12 sps:$4 sm:$0xff]   ;;  %v5632_v63 = vld [vmem:[#allocation2 + $0x4c] ss:$12 sps:$4 sm:$0xff]   ;;  %v5692_v2 = vld [vmem:[#allocation5 + $0x188] ss:$12 sps:$4 sm:$0xff]  }
  0x4c   :  { %711 = vmatpush1.bf16.msra.mxu0 %v5589_v11  ;;  %4837 = vmatprep.subr.bf16.mxu1 %v5682_v39  ;;  %v5653_v0 = vld [vmem:[#allocation5 + $0x1e0] ss:$12 sps:$4 sm:$0xff]   ;;  %v5658_v1 = vld [vmem:[#allocation5 + $0x1fc] ss:$12 sps:$4 sm:$0xff]   ;;  %v5656_v3 = vld [vmem:[#allocation5 + $0x1f8] ss:$12 sps:$4 sm:$0xff]  }
  0x4d   :  { %712 = vmatprep.subr.bf16.mxu0 %v5590_v12  ;;  %v5693_v4 = vld [vmem:[#allocation5 + $0x1a0] ss:$12 sps:$4 sm:$0xff]   ;;  %v5634_v6 = vld [vmem:[#allocation2 + $0x48] ss:$12 sps:$4 sm:$0xff]   ;;  %v5638_v7 = vld [vmem:[#allocation2 + $0x64] ss:$12 sps:$4 sm:$0xff]  }
  0x4e   :  { %v5664_v5 = vld [vmem:[#allocation5 + $0x214] ss:$12 sps:$4 sm:$0xff]   ;;  %v5662_v8 = vld [vmem:[#allocation5 + $0x210] ss:$12 sps:$4 sm:$0xff]   ;;  %v5667_v9 = vld [vmem:[#allocation5 + $0x22c] ss:$12 sps:$4 sm:$0xff]  }
  0x4f   :  { %4838 = vmatpush3.bf16.msra.mxu1 %v5683_v44  ;;  %v5694_v10 = vld [vmem:[#allocation5 + $0x1b8] ss:$12 sps:$4 sm:$0xff]   ;;  %v5665_v11 = vld [vmem:[#allocation5 + $0x228] ss:$12 sps:$4 sm:$0xff]   ;;  %v5695_v12 = vld [vmem:[#allocation5 + $0x1d0] ss:$12 sps:$4 sm:$0xff]  }
  0x50   :  { %713 = vmatpush1.bf16.msra.mxu0 %v5592_v14  ;;  %4839 = vmatprep.subr.bf16.mxu1 %v5684_v46  ;;  %v5640_v13 = vld [vmem:[#allocation2 + $0x60] ss:$12 sps:$4 sm:$0xff]   ;;  %v5644_v14 = vld [vmem:[#allocation2 + $0x7c] ss:$12 sps:$4 sm:$0xff]   ;;  %v5674_v31 = vld [vmem:[#allocation2 + $0x98] ss:$12 sps:$4 sm:$0xff]  }
  0x51   :  { %714 = vmatprep.subr.bf16.mxu0 %v5593_v15  ;;  %v5696_v15 = vld [vmem:[#allocation5 + $0x1e8] ss:$12 sps:$4 sm:$0xff]   ;;  %v5673_v30 = vld [vmem:[#allocation2 + $0x80] ss:$12 sps:$4 sm:$0xff]   ;;  %vm1141_vm0 = vcmask 261120   ;;  %s6089_s2 = smov 96  }
  0x52   :  { %s6090_s25 = smov 64   ;;  %s6091_s26 = smov 32   ;;  %vm1890_vm5 = vcmask 523264   ;;  %vm1895_vm6 = vcmask 785408  }
  0x53   :  { %4840 = vmatpush3.bf16.msra.mxu1 %v5685_v48 }
  0x54   :  { %715 = vmatpush1.bf16.msra.mxu0 %v5595_v16  ;;  %4841 = vmatprep.subr.bf16.mxu1 %v5686_v49  ;;  %v5697_v16 = vld [vmem:[#allocation5 + $0x200] ss:$12 sps:$4 sm:$0xff]  }
  0x55   :  { %716 = vmatprep.subr.bf16.mxu0 %v5596_v17  ;;  %v5646_v17 = vld [vmem:[#allocation2 + $0x78] ss:$12 sps:$4 sm:$0xff]  }
  0x57   :  { %4842 = vmatpush3.bf16.msra.mxu1 %v5687_v54 }
  0x58   :  { %717 = vmatpush1.bf16.msra.mxu0 %v5598_v18  ;;  %4843 = vmatprep.subr.bf16.mxu1 %v5688_v56  ;;  %v5650_v18 = vld [vmem:[#allocation2 + $0x94] ss:$12 sps:$4 sm:$0xff]  }
  0x59   :  { %718 = vmatprep.subr.bf16.mxu0 %v5599_v19  ;;  %v5698_v19 = vld [vmem:[#allocation5 + $0x218] ss:$12 sps:$4 sm:$0xff]  }
  0x5b   :  { %4844 = vmatpush3.bf16.msra.mxu1 %v5689_v58 }
  0x5c   :  { %719 = vmatpush1.bf16.msra.mxu0 %v5601_v20  ;;  %4845 = vmatprep.subr.bf16.mxu1 %v5690_v60  ;;  %v5699_v20 = vld [vmem:[#allocation5 + $0x230] ss:$12 sps:$4 sm:$0xff]  }
  0x5d   :  { %720 = vmatprep.subr.bf16.mxu0 %v5602_v21  ;;  %v5652_v21 = vld [vmem:[#allocation2 + $0x90] ss:$12 sps:$4 sm:$0xff]  }
  0x5f   :  { %4846 = vmatpush3.bf16.msra.mxu1 %v5691_v62 }
  0x60   :  { %721 = vmatpush1.bf16.msra.mxu0 %v5604_v22  ;;  %5055 = vmatprep.subr.bf16.mxu1 %v5692_v2  ;;  %v5659_v22 = vld [vmem:[#allocation2 + $0xac] ss:$12 sps:$4 sm:$0xff]  }
  0x61   :  { %722 = vmatprep.subr.bf16.mxu0 %v5605_v23  ;;  %v5661_v23 = vld [vmem:[#allocation2 + $0xa8] ss:$12 sps:$4 sm:$0xff]  }
  0x62   :  { %959 = vmatmul.mubr.bf16.vlgmr.msra.gmra.mrb[0].mxu1 %v5620_v40 }
  0x63   :  { %966 = vmatprep.mubr.bf16.mxu1 %v5623_v42  ;;  %5056 = vmatpush3.bf16.msra.mxu1 %v5692_v2 }
  0x64   :  { %723 = vmatpush1.bf16.msra.mxu0 %v5607_v24  ;;  %5057 = vmatprep.subr.bf16.mxu1 %v5693_v4  ;;  %v7245_v24 = vmov 0  }
  0x65   :  { %724 = vmatprep.subr.bf16.mxu0 %v5608_v25  ;;  %v5668_v25 = vld [vmem:[#allocation2 + $0x8] ss:$12 sps:$4 sm:$0xff]  }
  0x67   :  { %5058 = vmatpush3.bf16.msra.mxu1 %v5693_v4 }
  0x68   :  { %725 = vmatpush1.bf16.msra.mxu0 %v5610_v26  ;;  %5059 = vmatprep.subr.bf16.mxu1 %v5694_v10  ;;  %v5669_v26 = vld [vmem:[#allocation2 + $0x20] ss:$12 sps:$4 sm:$0xff]  }
  0x69   :  { %726 = vmatprep.subr.bf16.mxu0 %v5611_v27  ;;  %v5670_v27 = vld [vmem:[#allocation2 + $0x38] ss:$12 sps:$4 sm:$0xff]  }
  0x6a   :  { %967 = vmatmul.mubr.bf16.gmra.mrb[4].mxu1 %v5625_v50 }
  0x6b   :  { %974 = vmatprep.mubr.bf16.mxu1 %v5626_v52  ;;  %5060 = vmatpush3.bf16.msra.mxu1 %v5694_v10 }
  0x6c   :  { %727 = vmatpush1.bf16.msra.mxu0 %v5613_v28  ;;  %5061 = vmatprep.subr.bf16.mxu1 %v5695_v12  ;;  %v5671_v28 = vld [vmem:[#allocation2 + $0x50] ss:$12 sps:$4 sm:$0xff]  }
  0x6d   :  { %728 = vmatprep.subr.bf16.mxu0 %v5614_v29  ;;  %v5672_v29 = vld [vmem:[#allocation2 + $0x68] ss:$12 sps:$4 sm:$0xff]  }
  0x6f   :  { %5062 = vmatpush3.bf16.msra.mxu1 %v5695_v12 }
  0x70   :  { %729 = vmatpush1.bf16.msra.mxu0 %v5616_v32  ;;  %5063 = vmatprep.subr.bf16.mxu1 %v5696_v15  ;;  %v5675_v32 = vld [vmem:[#allocation2 + $0xb0] ss:$12 sps:$4 sm:$0xff]  }
  0x71   :  { %730 = vmatprep.subr.bf16.mxu0 %v5617_v36 }
  0x72   :  { %975 = vmatmul.mubr.bf16.gmra.mrb[8].mxu1 %v5628_v61 }
  0x73   :  { %982 = vmatprep.mubr.bf16.mxu1 %v5632_v63  ;;  %5064 = vmatpush3.bf16.msra.mxu1 %v5696_v15 }
  0x74   :  { %731 = vmatpush1.bf16.msra.mxu0 %v5619_v37  ;;  %5065 = vmatprep.subr.bf16.mxu1 %v5697_v16 }
  0x75   :  { %813 = vmatprep.subr.bf16.mxu0 %v5631_v41 }
  0x77   :  { %733 = vmatmul.mubr.bf16.vlgmr.msra.gmra.mrb[0].mxu0 %v5620_v40  ;;  %5066 = vmatpush3.bf16.msra.mxu1 %v5697_v16 }
  0x78   :  { %742 = vmatprep.mubr.bf16.mxu0 %v5623_v42  ;;  %814 = vmatpush1.bf16.msra.mxu0 %v5629_v43 }
  0x79   :  { %815 = vmatprep.subr.bf16.mxu0 %v5637_v45  ;;  %5067 = vmatprep.subr.bf16.mxu1 %v5698_v19 }
  0x7a   :  { %983 = vmatmul.mubr.bf16.gmra.mrb[12].mxu1 %v5634_v6 }
  0x7b   :  { %990 = vmatprep.mubr.bf16.mxu1 %v5638_v7  ;;  %5068 = vmatpush3.bf16.msra.mxu1 %v5698_v19 }
  0x7c   :  { %816 = vmatpush1.bf16.msra.mxu0 %v5635_v47  ;;  %5069 = vmatprep.subr.bf16.mxu1 %v5699_v20 }
  0x7d   :  { %817 = vmatprep.subr.bf16.mxu0 %v5643_v51 }
  0x7f   :  { %743 = vmatmul.mubr.bf16.gmra.mrb[4].mxu0 %v5625_v50  ;;  %5070 = vmatpush3.bf16.msra.mxu1 %v5699_v20 }
  0x80   :  { %752 = vmatprep.mubr.bf16.mxu0 %v5626_v52  ;;  %818 = vmatpush1.bf16.msra.mxu0 %v5641_v53 }
  0x81   :  { %819 = vmatprep.subr.bf16.mxu0 %v5649_v55 }
  0x82   :  { %991 = vmatmul.mubr.bf16.gmra.mrb[16].mxu1 %v5640_v13 }
  0x83   :  { %998 = vmatprep.mubr.bf16.mxu1 %v5644_v14 }
  0x84   :  { %820 = vmatpush1.bf16.msra.mxu0 %v5647_v57 }
  0x85   :  { %821 = vmatprep.subr.bf16.mxu0 %v5655_v59 }
  0x87   :  { %753 = vmatmul.mubr.bf16.gmra.mrb[8].mxu0 %v5628_v61 }
  0x88   :  { %762 = vmatprep.mubr.bf16.mxu0 %v5632_v63  ;;  %822 = vmatpush1.bf16.msra.mxu0 %v5653_v0 }
  0x89   :  { %823 = vmatprep.subr.bf16.mxu0 %v5658_v1 }
  0x8a   :  { %999 = vmatmul.mubr.bf16.gmra.mrb[20].mxu1 %v5646_v17 }
  0x8b   :  { %1006 = vmatprep.mubr.bf16.mxu1 %v5650_v18 }
  0x8c   :  { %824 = vmatpush1.bf16.msra.mxu0 %v5656_v3 }
  0x8d   :  { %825 = vmatprep.subr.bf16.mxu0 %v5664_v5 }
  0x8f   :  { %763 = vmatmul.mubr.bf16.gmra.mrb[12].mxu0 %v5634_v6 }
  0x90   :  { %772 = vmatprep.mubr.bf16.mxu0 %v5638_v7  ;;  %826 = vmatpush1.bf16.msra.mxu0 %v5662_v8 }
  0x91   :  { %827 = vmatprep.subr.bf16.mxu0 %v5667_v9 }
  0x92   :  { %1007 = vmatmul.mubr.bf16.gmra.mrb[24].mxu1 %v5652_v21 }
  0x93   :  { %1014 = vmatprep.mubr.bf16.mxu1 %v5659_v22 }
  0x94   :  { %828 = vmatpush1.bf16.msra.mxu0 %v5665_v11 }
  0x97   :  { %773 = vmatmul.mubr.bf16.gmra.mrb[16].mxu0 %v5640_v13 }
  0x98   :  { %782 = vmatprep.mubr.bf16.mxu0 %v5644_v14 }
  0x9a   :  { %1015 = vmatmul.mubr.bf16.gmra.mrb[28].mxu1 %v5661_v23 }
  0x9b   :  { %5071 = vmatprep.mubr.bf16.mxu1 %v5668_v25 }
  0x9f   :  { %783 = vmatmul.mubr.bf16.gmra.mrb[20].mxu0 %v5646_v17 }
  0xa0   :  { %792 = vmatprep.mubr.bf16.mxu0 %v5650_v18 }
  0xa2   :  { %5072 = vmatmul.mubr.bf16.vlgmr.msra.gmra.mrb[32].mxu1 %v5669_v26 }
  0xa3   :  { %5075 = vmatprep.mubr.bf16.mxu1 %v5670_v27 }
  0xa7   :  { %793 = vmatmul.mubr.bf16.gmra.mrb[24].mxu0 %v5652_v21 }
  0xa8   :  { %802 = vmatprep.mubr.bf16.mxu0 %v5659_v22 }
  0xaa   :  { %5076 = vmatmul.mubr.bf16.gmra.mrb[36].mxu1 %v5671_v28 }
  0xab   :  { %5079 = vmatprep.mubr.bf16.mxu1 %v5672_v29 }
  0xaf   :  { %803 = vmatmul.mubr.bf16.gmra.mrb[28].mxu0 %v5661_v23 }
  0xb0   :  { %845 = vmatprep.mubr.bf16.mxu0 %v7245_v24 }
  0xb2   :  { %5080 = vmatmul.mubr.bf16.gmra.mrb[40].mxu1 %v5673_v30 }
  0xb3   :  { %5083 = vmatprep.mubr.bf16.mxu1 %v5674_v31 }
  0xb7   :  { %846 = vmatmul.mubr.bf16.vlgmr.msra.gmra.mrb[0].mxu0 %v5668_v25 }
  0xb8   :  { %855 = vmatprep.mubr.bf16.mxu0 %v7245_v24 }
  0xba   :  { %5084 = vmatmul.mubr.bf16.gmra.mrb[44].mxu1 %v5675_v32 }
  0xbf   :  { %856 = vmatmul.mubr.bf16.gmra.mrb[4].mxu0 %v5669_v26 }
  0xc0   :  { %865 = vmatprep.mubr.bf16.mxu0 %v7245_v24 }
  0xc7   :  { %866 = vmatmul.mubr.bf16.gmra.mrb[8].mxu0 %v5670_v27 }
  0xc8   :  { %875 = vmatprep.mubr.bf16.mxu0 %v7245_v24 }
  0xcf   :  { %876 = vmatmul.mubr.bf16.gmra.mrb[12].mxu0 %v5671_v28 }
  0xd0   :  { %885 = vmatprep.mubr.bf16.mxu0 %v7245_v24 }
  0xd7   :  { %886 = vmatmul.mubr.bf16.gmra.mrb[16].mxu0 %v5672_v29 }
  0xd8   :  { %895 = vmatprep.mubr.bf16.mxu0 %v7245_v24 }
  0xdf   :  { %896 = vmatmul.mubr.bf16.gmra.mrb[20].mxu0 %v5673_v30 }
  0xe0   :  { %905 = vmatprep.mubr.bf16.mxu0 %v7245_v24 }
  0xe7   :  { %906 = vmatmul.mubr.bf16.gmra.mrb[24].mxu0 %v5674_v31 }
  0xe8   :  { %915 = vmatprep.mubr.bf16.mxu0 %v7245_v24 }
  0xef   :  { %916 = vmatmul.mubr.bf16.gmra.mrb[28].mxu0 %v5675_v32 }
 0x135   :  { %v4847_v33 = vpop.f32.mrb[0].mxu1 }
 0x136   :  { %v4848_v34 = vpop.f32.mrb[1].mxu1 }
 0x137   :  { %v6180_v35 = vadd.f32 %v4848_v34, %v4847_v33  ;;  %v4850_v36 = vpop.f32.mrb[2].mxu1 }
 0x138   :  { %v4851_v37 = vpop.f32.mrb[3].mxu1 }
 0x139   :  { %v6182_v38 = vadd.f32 %v4851_v37, %v4850_v36 }
 0x13d   :  { %v4853_v39 = vpop.f32.mrb[4].mxu1 }
 0x13e   :  { %v4854_v40 = vpop.f32.mrb[5].mxu1 }
 0x13f   :  { %v6184_v41 = vadd.f32 %v4854_v40, %v4853_v39  ;;  %v4856_v42 = vpop.f32.mrb[6].mxu1 }
 0x140   :  { %v4857_v43 = vpop.f32.mrb[7].mxu1 }
 0x141   :  { %v6186_v44 = vadd.f32 %v4857_v43, %v4856_v42 }
 0x145   :  { %v4859_v45 = vpop.f32.mrb[8].mxu1 }
 0x146   :  { %v4860_v46 = vpop.f32.mrb[9].mxu1 }
 0x147   :  { %v6188_v47 = vadd.f32 %v4860_v46, %v4859_v45  ;;  %v4862_v48 = vpop.f32.mrb[10].mxu1 }
 0x148   :  { %v4863_v49 = vpop.f32.mrb[11].mxu1 }
 0x149   :  { %v6190_v50 = vadd.f32 %v4863_v49, %v4862_v48 }
 0x14d   :  { %v4865_v51 = vpop.f32.mrb[12].mxu1 }
 0x14e   :  { %v4866_v52 = vpop.f32.mrb[13].mxu1 }
 0x14f   :  { %v6192_v53 = vadd.f32 %v4866_v52, %v4865_v51  ;;  %v4868_v54 = vpop.f32.mrb[14].mxu1 }
 0x150   :  { %v4869_v55 = vpop.f32.mrb[15].mxu1 }
 0x151   :  { %v6194_v56 = vadd.f32 %v4869_v55, %v4868_v54 }
 0x155   :  { %v4871_v57 = vpop.f32.mrb[16].mxu1 }
 0x156   :  { %v4872_v58 = vpop.f32.mrb[17].mxu1 }
 0x157   :  { %v6196_v59 = vadd.f32 %v4872_v58, %v4871_v57  ;;  %v4874_v60 = vpop.f32.mrb[18].mxu1 }
 0x158   :  { %v4875_v61 = vpop.f32.mrb[19].mxu1 }
 0x159   :  { %v6198_v62 = vadd.f32 %v4875_v61, %v4874_v60 }
 0x15d   :  { %v4877_v63 = vpop.f32.mrb[20].mxu1 }
 0x15e   :  { %v4878_v0 = vpop.f32.mrb[21].mxu1 }
 0x15f   :  { %v6200_v1 = vadd.f32 %v4878_v0, %v4877_v63  ;;  %v4880_v2 = vpop.f32.mrb[22].mxu1 }
 0x160   :  { %v4881_v3 = vpop.f32.mrb[23].mxu1 }
 0x161   :  { %v6202_v4 = vadd.f32 %v4881_v3, %v4880_v2 }
 0x165   :  { %v4883_v10 = vpop.f32.mrb[24].mxu1 }
 0x166   :  { %v4884_v12 = vpop.f32.mrb[25].mxu1 }
 0x167   :  { %v6210_v13 = vadd.f32 %v4884_v12, %v4883_v10  ;;  %v4886_v14 = vpop.f32.mrb[26].mxu1 }
 0x168   :  { %v4887_v16 = vpop.f32.mrb[27].mxu1 }
 0x169   :  { %v6216_v17 = vadd.f32 %v4887_v16, %v4886_v14 }
 0x16d   :  { %v4889_v23 = vpop.f32.mrb[28].mxu1 }
 0x16e   :  { %v4890_v26 = vpop.f32.mrb[29].mxu1 }
 0x16f   :  { %v6222_v27 = vadd.f32 %v4890_v26, %v4889_v23  ;;  %v4892_v28 = vpop.f32.mrb[30].mxu1 }
 0x170   :  { %v4893_v30 = vpop.f32.mrb[31].mxu1 }
 0x171   :  { %v6228_v31 = vadd.f32 %v4893_v30, %v4892_v28 }
 0x175   :  { %v5073_v39 = vpop.f32.mrb[32].mxu1 }
 0x176   :  { %v1066_v42 = vadd.f32 %v5073_v39, %v6184_v41  ;;  %v1057_v43 = vpop.f32.mrb[33].mxu1 }
 0x177   :  { %v1058_v45 = vadd.f32 %v6180_v35, %v1057_v43  ;;  %v5074_v46 = vpop.f32.mrb[34].mxu1 }
 0x178   :  { %v1069_v49 = vadd.f32 %v5074_v46, %v6186_v44  ;;  %v1060_v51 = vpop.f32.mrb[35].mxu1 }
 0x179   :  { %v1061_v41 = vadd.f32 %v6182_v38, %v1060_v51 }
 0x17a   :  { %v6246_v54 = vpack.c.bf16 %v1069_v49, %v1066_v42 }
 0x17b   :  { %v6248_v55 = vpack.c.bf16 %v1061_v41, %v1058_v45 }
 0x17d   :  { %v5077_v61 = vpop.f32.mrb[36].mxu1 }
 0x17e   :  { %v1082_v44 = vadd.f32 %v5077_v61, %v6192_v53  ;;  %v1073_v38 = vpop.f32.mrb[37].mxu1 }
 0x17f   :  { %v1074_v0 = vadd.f32 %v6188_v47, %v1073_v38  ;;  %v5078_v2 = vpop.f32.mrb[38].mxu1 }
 0x18a   :  { %v847_v5 = vpop.f32.mrb[0].mxu0 }
 0x18b   :  { %v849_v6 = vpop.f32.mrb[1].mxu0 }
 0x18c   :  { %v851_v7 = vpop.f32.mrb[2].mxu0 }
 0x18d   :  { %v6204_v8 = vpack.c.bf16 %v851_v7, %v847_v5  ;;  %v853_v9 = vpop.f32.mrb[3].mxu0  ;;  %v1085_v5 = vadd.f32 %v5078_v2, %v6194_v56 }
 0x18e   :  { %v6206_v11 = vpack.c.bf16 %v853_v9, %v849_v6  ;;  %v1076_v6 = vpop.f32.mrb[39].mxu1 }
 0x18f   :  { %5091 = vmatprep.mubr.msk.bf16.mxu1 %vm1141_vm0, %v6204_v8  ;;  %v1077_v7 = vadd.f32 %v6190_v50, %v1076_v6  ;;  %v6266_v53 = vpack.c.bf16 %v1085_v5, %v1082_v44  ;;  %v5081_v16 = vpop.f32.mrb[40].mxu1 }
 0x190   :  { %5407 = vmatprep.subr.msk.bf16.mxu1 %vm1141_vm0, %v6206_v11  ;;  %v1149_v15 = vsel %vm1141_vm0, %v6206_v11, 0  ;;  %v1098_v56 = vadd.f32 %v5081_v16, %v6200_v1 }
 0x191   :  { %5088 = vmatpush3.bf16.xpose.msra.mxu1 %v1149_v15  ;;  %v6268_v47 = vpack.c.bf16 %v1077_v7, %v1074_v0  ;;  %v6088_v7 = vmov -1e+30  }
 0x192   :  { %v857_v18 = vpop.f32.mrb[4].mxu0 }
 0x193   :  { %v859_v19 = vpop.f32.mrb[5].mxu0 }
 0x194   :  { %v861_v20 = vpop.f32.mrb[6].mxu0 }
 0x195   :  { %v6218_v21 = vpack.c.bf16 %v861_v20, %v857_v18  ;;  %v863_v22 = vpop.f32.mrb[7].mxu0 }
 0x196   :  { %v6220_v25 = vpack.c.bf16 %v863_v22, %v859_v19  ;;  %v1089_v19 = vpop.f32.mrb[41].mxu1 }
 0x197   :  { %v1090_v50 = vadd.f32 %v6196_v59, %v1089_v19  ;;  %v5082_v20 = vpop.f32.mrb[42].mxu1 }
 0x198   :  { %5408 = vmatprep.subr.msk.bf16.mxu1 %vm1141_vm0, %v6220_v25  ;;  %v1152_v29 = vsel %vm1141_vm0, %v6220_v25, 0  ;;  %v1101_v22 = vadd.f32 %v5082_v20, %v6202_v4  ;;  %v1092_v23 = vpop.f32.mrb[43].mxu1 }
 0x199   :  { %5090 = vmatpush3.bf16.xpose.msra.mxu1 %v1152_v29  ;;  %v1093_v26 = vadd.f32 %v6198_v62, %v1092_v23  ;;  %v5085_v59 = vpop.f32.mrb[44].mxu1 }
 0x19a   :  { %v867_v32 = vpop.f32.mrb[8].mxu0  ;;  %5095 = vmatprep.subr.bf16.mxu1 %v6248_v55  ;;  %v6280_v29 = vpack.c.bf16 %v1101_v22, %v1098_v56  ;;  %v1114_v39 = vadd.f32 %v5085_v59, %v6222_v27  ;;  %v1105_v42 = vpop.f32.mrb[45].mxu1 }
 0x19b   :  { %v869_v33 = vpop.f32.mrb[9].mxu0  ;;  %v1106_v4 = vadd.f32 %v6210_v13, %v1105_v42  ;;  %v5086_v43 = vpop.f32.mrb[46].mxu1 }
 0x19c   :  { %v871_v34 = vpop.f32.mrb[10].mxu0  ;;  %v1117_v62 = vadd.f32 %v5086_v43, %v6228_v31  ;;  %v1108_v45 = vpop.f32.mrb[47].mxu1 }
 0x19d   :  { %v6230_v36 = vpack.c.bf16 %v871_v34, %v867_v32  ;;  %v873_v37 = vpop.f32.mrb[11].mxu0  ;;  %v6282_v32 = vpack.c.bf16 %v1093_v26, %v1090_v50  ;;  %v1109_v46 = vadd.f32 %v6216_v17, %v1108_v45  ;;  %v1120_v17 = vlaneseq }
 0x19e   :  { %v6232_v40 = vpack.c.bf16 %v873_v37, %v869_v33  ;;  %v6292_v49 = vpack.c.bf16 %v1117_v62, %v1114_v39 }
 0x19f   :  { %5155 = vmatprep.mubr.msk.bf16.mxu0 %vm1141_vm0, %v6230_v36  ;;  %v6294_v41 = vpack.c.bf16 %v1109_v46, %v1106_v4  ;;  %v6304_v0 = vshrl.u32 %v1120_v17, 7 }
 0x1a0   :  { %5092 = vmatmul.mubr.msk.bf16.vlgmr.msra.gmra.mrb[48].mxu1 %vm1141_vm0, %v6218_v21  ;;  %5415 = vmatprep.subr.msk.bf16.mxu0 %vm1141_vm0, %v6232_v40  ;;  %v1913_v48 = vsel %vm1141_vm0, %v6232_v40, 0 }
 0x1a1   :  { %5152 = vmatpush3.bf16.xpose.msra.mxu0 %v1913_v48  ;;  %5096 = vmatpush3.bf16.msra.mxu1 %v6248_v55  ;;  %7254 = vst [vmem:[#allocation12_spill] sm:$0xff] %v6304_v0  ;;  %v1123_v2 = vadd.s32 16, %v6304_v0  ;;  %v1124_v5 = vadd.s32 24, %v6304_v0  ;;  %v1122_v6 = vadd.s32 8, %v6304_v0 }
 0x1a2   :  { %v877_v52 = vpop.f32.mrb[12].mxu0  ;;  %5097 = vmatprep.subr.bf16.mxu1 %v6246_v54 }
 0x1a3   :  { %v879_v35 = vpop.f32.mrb[13].mxu0 }
 0x1a4   :  { %v881_v57 = vpop.f32.mrb[14].mxu0 }
 0x1a5   :  { %v6250_v58 = vpack.c.bf16 %v881_v57, %v877_v52  ;;  %v883_v60 = vpop.f32.mrb[15].mxu0  ;;  %5098 = vmatpush3.bf16.msra.mxu1 %v6246_v54 }
 0x1a6   :  { %v6253_v63 = vpack.c.bf16 %v883_v60, %v879_v35 }
 0x1a8   :  { %5416 = vmatprep.subr.msk.bf16.mxu0 %vm1141_vm0, %v6253_v63  ;;  %v1916_v3 = vsel %vm1141_vm0, %v6253_v63, 0 }
 0x1a9   :  { %5154 = vmatpush3.bf16.xpose.msra.mxu0 %v1916_v3  ;;  %v1126_v3 = vand.u32 127, %v1120_v17 }
 0x1aa   :  { %v887_v9 = vpop.f32.mrb[16].mxu0 }
 0x1ab   :  { %v889_v10 = vpop.f32.mrb[17].mxu0  ;;  %vm1129_vm1 = vcmp.ge.s32.totalorder %v1123_v2, %v1126_v3  ;;  %vm1127_vm2 = vcmp.ge.s32.totalorder %v6304_v0, %v1126_v3  ;;  %vm1130_vm3 = vcmp.ge.s32.totalorder %v1124_v5, %v1126_v3  ;;  %vm1128_vm4 = vcmp.ge.s32.totalorder %v1122_v6, %v1126_v3 }
 0x1ac   :  { %v891_v12 = vpop.f32.mrb[18].mxu0  ;;  %v6317_v19 = vsel %vm1128_vm4, 0.0, %v6088_v7 }
 0x1ad   :  { %v6270_v14 = vpack.c.bf16 %v891_v12, %v887_v9  ;;  %v893_v15 = vpop.f32.mrb[19].mxu0  ;;  %v6310_v9 = vsel %vm1129_vm1, 0.0, %v6088_v7 }
 0x1ae   :  { %v6272_v18 = vpack.c.bf16 %v893_v15, %v889_v10  ;;  %v6312_v10 = vsel %vm1127_vm2, 0.0, %v6088_v7  ;;  %v6314_v15 = vsel %vm1130_vm3, 0.0, %v6088_v7 }
 0x1b0   :  { %5156 = vmatmul.mubr.msk.bf16.vlgmr.msra.gmra.mrb[32].mxu0 %vm1141_vm0, %v6250_v58 }
 0x1b2   :  { %v897_v28 = vpop.f32.mrb[20].mxu0 }
 0x1b3   :  { %v899_v30 = vpop.f32.mrb[21].mxu0 }
 0x1b4   :  { %v901_v33 = vpop.f32.mrb[22].mxu0 }
 0x1b5   :  { %v6284_v1 = vpack.c.bf16 %v901_v33, %v897_v28  ;;  %v903_v34 = vpop.f32.mrb[23].mxu0 }
 0x1b6   :  { %v6286_v37 = vpack.c.bf16 %v903_v34, %v899_v30 }
 0x1ba   :  { %v907_v48 = vpop.f32.mrb[24].mxu0 }
 0x1bb   :  { %v909_v51 = vpop.f32.mrb[25].mxu0 }
 0x1bc   :  { %v911_v52 = vpop.f32.mrb[26].mxu0 }
 0x1bd   :  { %v6296_v35 = vpack.c.bf16 %v911_v52, %v907_v48  ;;  %v913_v57 = vpop.f32.mrb[27].mxu0 }
 0x1be   :  { %v6298_v27 = vpack.c.bf16 %v913_v57, %v909_v51 }
 0x1c2   :  { %v917_v60 = vpop.f32.mrb[28].mxu0 }
 0x1c3   :  { %v919_v13 = vpop.f32.mrb[29].mxu0 }
 0x1c4   :  { %v921_v61 = vpop.f32.mrb[30].mxu0 }
 0x1c5   :  { %v6300_v44 = vpack.c.bf16 %v921_v61, %v917_v60  ;;  %v923_v31 = vpop.f32.mrb[31].mxu0 }
 0x1c6   :  { %v6302_v38 = vpack.c.bf16 %v923_v31, %v919_v13 }
 0x273   :  { %v5093_v12 = vpop.f32.mrb[48].mxu1 }
 0x274   :  { %v1197_v16 = vadd.f32 %v5093_v12, %v6310_v9  ;;  %v1188_v56 = vpop.f32.mrb[49].mxu1 }
 0x275   :  { %v1189_v50 = vadd.f32 %v1188_v56, %v6312_v10  ;;  %v5094_v20 = vpop.f32.mrb[50].mxu1 }
 0x276   :  { %v1200_v22 = vadd.f32 %v5094_v20, %v6314_v15  ;;  %v1191_v23 = vpop.f32.mrb[51].mxu1  ;;  %v1209_v26 = vsel %vm1141_vm0, %v1197_v16, -inf }
 0x277   :  { %v1192_v28 = vadd.f32 %v1191_v23, %v6317_v19  ;;  %1210 = vmax.xlane.f32.xlu1 %v1209_v26  ;;  %v1203_v30 = vsel %vm1141_vm0, %v1189_v50, -inf }
 0x278   :  { %1204 = vmax.xlane.f32.xlu0 %v1203_v30  ;;  %v1212_v33 = vsel %vm1141_vm0, %v1200_v22, -inf }
 0x279   :  { %v1206_v34 = vsel %vm1141_vm0, %v1192_v28, -inf }
 0x27b   :  { %1213 = vmax.xlane.f32.xlu1 %v1212_v33 }
 0x27c   :  { %1207 = vmax.xlane.f32.xlu0 %v1206_v34 }
 0x283   :  { %v6326_v59 = vpop.f32.mrb[32].mxu0 }
 0x284   :  { %v6328_v39 = vpop.f32.mrb[33].mxu0 }
 0x285   :  { %v6330_v42 = vpop.f32.mrb[34].mxu0 }
 0x286   :  { %v6332_v4 = vpop.f32.mrb[35].mxu0 }
 0x304   :  { %v1211_v43 = vpop.xlane.xlu1 %1210 }
 0x305   :  { %v1217_v62 = vsub.f32 %v1197_v16, %v1211_v43  ;;  %v1205_v45 = vpop.xlane.xlu0 %1204 }
 0x306   :  { %v1215_v46 = vsub.f32 %v1189_v50, %v1205_v45 }
 0x307   :  { %v1223_v48 = vmul.f32 1.442695, %v1217_v62 }
 0x308   :  { %v1219_v51 = vmul.f32 1.442695, %v1215_v46  ;;  %v1214_v52 = vpop.xlane.xlu1 %1213 }
 0x309   :  { %5732 = vpow2.f32 %v1223_v48  ;;  %v1218_v57 = vsub.f32 %v1200_v22, %v1214_v52  ;;  %v1208_v60 = vpop.xlane.xlu0 %1207 }
 0x30a   :  { %v1216_v13 = vsub.f32 %v1192_v28, %v1208_v60  ;;  %5734 = vpow2.f32 %v1219_v51 }
 0x30b   :  { %v1225_v61 = vmul.f32 1.442695, %v1218_v57 }
 0x30c   :  { %v1221_v31 = vmul.f32 1.442695, %v1216_v13 }
 0x30e   :  { %5736 = vpow2.f32 %v1221_v31 }
 0x30f   :  { %5738 = vpow2.f32 %v1225_v61 }
 0x313   :  { %v5733_v17 = vpop.eup %5732 }
 0x314   :  { %v1233_v2 = vsel %vm1141_vm0, %v5733_v17, 0.0  ;;  %v5735_v3 = vpop.eup %5734 }
 0x315   :  { %1234 = vadd.xlane.f32.xlu0 %v1233_v2  ;;  %v1227_v6 = vsel %vm1141_vm0, %v5735_v3, 0.0 }
 0x318   :  { %v5737_v5 = vpop.eup %5736 }
 0x319   :  { %1228 = vadd.xlane.f32.xlu0 %v1227_v6  ;;  %v1230_v7 = vsel %vm1141_vm0, %v5737_v5, 0.0  ;;  %v5739_v12 = vpop.eup %5738 }
 0x31a   :  { %1231 = vadd.xlane.f32.xlu1 %v1230_v7  ;;  %v1236_v16 = vsel %vm1141_vm0, %v5739_v12, 0.0 }
 0x31e   :  { %1237 = vadd.xlane.f32.xlu1 %v1236_v16 }
 0x32f   :  { %1312 = vrot.lane.b32.xlu0 %v6206_v11, %s6089_s2  ;;  %1314 = vrot.lane.b32.xlu1 %v6220_v25, %s6089_s2 }
 0x333   :  { %1306 = vrot.lane.b32.xlu1 %v6204_v8, %s6089_s2 }
 0x337   :  { %1308 = vrot.lane.b32.xlu1 %v6218_v21, %s6089_s2 }
 0x3a2   :  { %v1235_v56 = vpop.xlane.xlu0 %1234 }
 0x3a6   :  { %v1229_v50 = vpop.xlane.xlu0 %1228 }
 0x3a7   :  { %5740 = vrcp.f32 %v1229_v50  ;;  %v1232_v20 = vpop.xlane.xlu1 %1231 }
 0x3a8   :  { %5742 = vrcp.f32 %v1232_v20 }
 0x3a9   :  { %5744 = vrcp.f32 %v1235_v56 }
 0x3aa   :  { %v1313_v22 = vpop.permute.xlu0 %1312 }
 0x3ab   :  { %v1238_v23 = vpop.xlane.xlu1 %1237  ;;  %5409 = vmatprep.subr.msk.bf16.mxu1 %vm1141_vm0, %v1313_v22  ;;  %v1323_v57 = vsel %vm1141_vm0, %v1313_v22, 0 }
 0x3ac   :  { %5746 = vrcp.f32 %v1238_v23 }
 0x3af   :  { %v1315_v43 = vpop.permute.xlu1 %1314 }
 0x3b0   :  { %v1326_v60 = vsel %vm1141_vm0, %v1315_v43, 0 }
 0x3b1   :  { %v5741_v26 = vpop.eup %5740 }
 0x3b2   :  { %v5743_v28 = vpop.eup %5742  ;;  %v1243_v30 = vmul.f32 %v5741_v26, %v5735_v3 }
 0x3b3   :  { %v1244_v33 = vmul.f32 %v5743_v28, %v5737_v5  ;;  %v5745_v34 = vpop.eup %5744  ;;  %v1307_v52 = vpop.permute.xlu1 %1306 }
 0x3b4   :  { %v1245_v46 = vmul.f32 %v5745_v34, %v5733_v17 }
 0x3b5   :  { %v1247_v62 = vpack.c.bf16 %v1244_v33, %v1243_v30 }
 0x3b6   :  { %v5747_v45 = vpop.eup %5746 }
 0x3b7   :  { %v1246_v48 = vmul.f32 %v5747_v45, %v5739_v12  ;;  %5099 = vmatprep.mubr.msk.bf16.mxu1 %vm1141_vm0, %v1247_v62  ;;  %v1309_v13 = vpop.permute.xlu1 %1308 }
 0x3b9   :  { %v1248_v51 = vpack.c.bf16 %v1246_v48, %v1245_v46 }
 0x3bb   :  { %5100 = vmatmul.mubr.msk.bf16.vlgmr.msra.gmra.mrb[52].mxu1 %vm1141_vm0, %v1248_v51 }
 0x3bc   :  { %5104 = vmatpush3.bf16.xpose.msra.mxu1 %v1323_v57  ;;  %5107 = vmatprep.mubr.msk.bf16.mxu1 %vm1141_vm0, %v1307_v52 }
 0x3bd   :  { %5410 = vmatprep.subr.msk.bf16.mxu1 %vm1141_vm0, %v1315_v43 }
 0x3c4   :  { %5106 = vmatpush3.bf16.xpose.msra.mxu1 %v1326_v60 }
 0x3cb   :  { %5108 = vmatmul.mubr.msk.bf16.vlgmr.msra.gmra.mrb[56].mxu1 %vm1141_vm0, %v1309_v13 }
 0x48e   :  { %v6354_v61 = vpop.f32.mrb[52].mxu1 }
 0x48f   :  { %7255 = vst [vmem:[#allocation13_spill] sm:$0xff] %v6354_v61  ;;  %v6356_v31 = vpop.f32.mrb[53].mxu1 }
 0x490   :  { %7256 = vst [vmem:[#allocation14_spill] sm:$0xff] %v6356_v31  ;;  %v6358_v17 = vpop.f32.mrb[54].mxu1 }
 0x491   :  { %7257 = vst [vmem:[#allocation15_spill] sm:$0xff] %v6358_v17  ;;  %v6360_v2 = vpop.f32.mrb[55].mxu1 }
 0x492   :  { %7258 = vst [vmem:[#allocation16_spill] sm:$0xff] %v6360_v2 }
 0x49e   :  { %v5109_v3 = vpop.f32.mrb[56].mxu1 }
 0x49f   :  { %v1362_v5 = vpop.f32.mrb[57].mxu1  ;;  %v1371_v16 = vadd.f32 %v5109_v3, %v6310_v9 }
 0x4a0   :  { %v1363_v6 = vadd.f32 %v1362_v5, %v6312_v10  ;;  %v5110_v7 = vpop.f32.mrb[58].mxu1 }
 0x4a1   :  { %v1365_v12 = vpop.f32.mrb[59].mxu1  ;;  %v1374_v22 = vadd.f32 %v5110_v7, %v6314_v15  ;;  %v1383_v23 = vsel %vm1141_vm0, %v1371_v16, -inf }
 0x4a2   :  { %v1366_v56 = vadd.f32 %v1365_v12, %v6317_v19  ;;  %v1377_v50 = vsel %vm1141_vm0, %v1363_v6, -inf }
 0x4a3   :  { %1378 = vmax.xlane.f32.xlu0 %v1377_v50  ;;  %v1386_v26 = vsel %vm1141_vm0, %v1374_v22, -inf }
 0x4a4   :  { %v1380_v20 = vsel %vm1141_vm0, %v1366_v56, -inf }
 0x4a5   :  { %1381 = vmax.xlane.f32.xlu1 %v1380_v20 }
 0x4a7   :  { %1384 = vmax.xlane.f32.xlu0 %v1383_v23 }
 0x4ab   :  { %1387 = vmax.xlane.f32.xlu0 %v1386_v26 }
 0x4b6   :  { %1427 = vrot.lane.b32.xlu1 %v6246_v54, %s6089_s2 }
 0x530   :  { %v1379_v28 = vpop.xlane.xlu0 %1378 }
 0x531   :  { %v1389_v30 = vsub.f32 %v1363_v6, %v1379_v28 }
 0x532   :  { %v1382_v33 = vpop.xlane.xlu1 %1381 }
 0x533   :  { %v1393_v62 = vmul.f32 1.442695, %v1389_v30  ;;  %v1390_v45 = vsub.f32 %v1366_v56, %v1382_v33 }
 0x534   :  { %v1385_v34 = vpop.xlane.xlu0 %1384 }
 0x535   :  { %v1391_v43 = vsub.f32 %v1371_v16, %v1385_v34  ;;  %v1395_v52 = vmul.f32 1.442695, %v1390_v45 }
 0x536   :  { %v1428_v56 = vpop.permute.xlu1 %1427 }
 0x537   :  { %v1397_v46 = vmul.f32 1.442695, %v1391_v43 }
 0x538   :  { %v1388_v48 = vpop.xlane.xlu0 %1387 }
 0x539   :  { %5748 = vpow2.f32 %v1397_v46  ;;  %v1392_v51 = vsub.f32 %v1374_v22, %v1388_v48 }
 0x53a   :  { %5750 = vpow2.f32 %v1393_v62 }
 0x53b   :  { %v1399_v57 = vmul.f32 1.442695, %v1392_v51 }
 0x53d   :  { %5752 = vpow2.f32 %v1399_v57 }
 0x53e   :  { %5754 = vpow2.f32 %v1395_v52 }
 0x543   :  { %v5749_v60 = vpop.eup %5748 }
 0x544   :  { %v1407_v13 = vsel %vm1141_vm0, %v5749_v60, 0.0  ;;  %v5751_v3 = vpop.eup %5750 }
 0x545   :  { %1408 = vadd.xlane.f32.xlu0 %v1407_v13  ;;  %v1401_v6 = vsel %vm1141_vm0, %v5751_v3, 0.0 }
 0x547   :  { %v5753_v5 = vpop.eup %5752 }
 0x548   :  { %v1410_v7 = vsel %vm1141_vm0, %v5753_v5, 0.0  ;;  %v5755_v12 = vpop.eup %5754 }
 0x549   :  { %1402 = vadd.xlane.f32.xlu0 %v1401_v6  ;;  %1411 = vadd.xlane.f32.xlu1 %v1410_v7  ;;  %v1404_v16 = vsel %vm1141_vm0, %v5755_v12, 0.0 }
 0x54d   :  { %1405 = vadd.xlane.f32.xlu1 %v1404_v16 }
 0x55e   :  { %1490 = vrot.lane.b32.xlu1 %v6206_v11, %s6090_s25 }
 0x55f   :  { %1425 = vrot.lane.b32.xlu0 %v6248_v55, %s6089_s2 }
 0x562   :  { %1492 = vrot.lane.b32.xlu1 %v6220_v25, %s6090_s25 }
 0x563   :  { %1486 = vrot.lane.b32.xlu0 %v6204_v8, %s6090_s25 }
 0x566   :  { %1488 = vrot.lane.b32.xlu1 %v6218_v21, %s6090_s25 }
 0x5d2   :  { %v1409_v50 = vpop.xlane.xlu0 %1408 }
 0x5d6   :  { %v1412_v20 = vpop.xlane.xlu1 %1411  ;;  %v1403_v22 = vpop.xlane.xlu0 %1402 }
 0x5d7   :  { %5756 = vrcp.f32 %v1412_v20 }
 0x5d8   :  { %5758 = vrcp.f32 %v1403_v22 }
 0x5d9   :  { %5760 = vrcp.f32 %v1409_v50 }
 0x5da   :  { %v1406_v23 = vpop.xlane.xlu1 %1405  ;;  %v1426_v26 = vpop.permute.xlu0 %1425 }
 0x5db   :  { %5762 = vrcp.f32 %v1406_v23  ;;  %5111 = vmatprep.subr.bf16.mxu1 %v1426_v26 }
 0x5dc   :  { %5112 = vmatpush3.bf16.msra.mxu1 %v1426_v26 }
 0x5dd   :  { %5113 = vmatprep.subr.bf16.mxu1 %v1428_v56 }
 0x5de   :  { %v1491_v28 = vpop.permute.xlu1 %1490  ;;  %v1487_v57 = vpop.permute.xlu0 %1486 }
 0x5df   :  { %v1501_v13 = vsel %vm1141_vm0, %v1491_v28, 0 }
 0x5e0   :  { %5114 = vmatpush3.bf16.msra.mxu1 %v1428_v56 }
 0x5e1   :  { %5411 = vmatprep.subr.msk.bf16.mxu1 %vm1141_vm0, %v1491_v28  ;;  %v5757_v30 = vpop.eup %5756 }
 0x5e2   :  { %v5759_v33 = vpop.eup %5758  ;;  %v1420_v62 = vmul.f32 %v5757_v30, %v5753_v5  ;;  %v1493_v6 = vpop.permute.xlu1 %1492 }
 0x5e3   :  { %v5761_v34 = vpop.eup %5760  ;;  %v1417_v45 = vmul.f32 %v5759_v33, %v5751_v3  ;;  %v1504_v5 = vsel %vm1141_vm0, %v1493_v6, 0 }
 0x5e4   :  { %v1419_v48 = vmul.f32 %v5761_v34, %v5749_v60 }
 0x5e5   :  { %v5763_v43 = vpop.eup %5762 }
 0x5e6   :  { %v1418_v46 = vmul.f32 %v5763_v43, %v5755_v12  ;;  %v1422_v52 = vpack.c.bf16 %v1420_v62, %v1419_v48  ;;  %v1489_v3 = vpop.permute.xlu1 %1488 }
 0x5e8   :  { %v1421_v51 = vpack.c.bf16 %v1418_v46, %v1417_v45 }
 0x5ea   :  { %5115 = vmatprep.mubr.msk.bf16.mxu1 %vm1141_vm0, %v1421_v51 }
 0x5eb   :  { %5116 = vmatmul.mubr.msk.bf16.vlgmr.msra.gmra.mrb[60].mxu1 %vm1141_vm0, %v1422_v52 }
 0x5ec   :  { %5120 = vmatpush3.bf16.xpose.msra.mxu1 %v1501_v13  ;;  %5123 = vmatprep.mubr.msk.bf16.mxu1 %vm1141_vm0, %v1487_v57 }
 0x5ed   :  { %5412 = vmatprep.subr.msk.bf16.mxu1 %vm1141_vm0, %v1493_v6 }
 0x5f4   :  { %5122 = vmatpush3.bf16.xpose.msra.mxu1 %v1504_v5 }
 0x5fb   :  { %5124 = vmatmul.mubr.msk.bf16.vlgmr.msra.gmra.mrb[64].mxu1 %vm1141_vm0, %v1489_v3 }
 0x6be   :  { %v6394_v60 = vpop.f32.mrb[60].mxu1 }
 0x6bf   :  { %v6396_v7 = vpop.f32.mrb[61].mxu1 }
 0x6c0   :  { %v6398_v12 = vpop.f32.mrb[62].mxu1 }
 0x6c1   :  { %v6402_v56 = vpop.f32.mrb[63].mxu1 }
 0x6ce   :  { %v5125_v20 = vpop.f32.mrb[64].mxu1 }
 0x6cf   :  { %v1540_v22 = vpop.f32.mrb[65].mxu1  ;;  %v1549_v30 = vadd.f32 %v5125_v20, %v6310_v9 }
 0x6d0   :  { %v1541_v23 = vadd.f32 %v1540_v22, %v6312_v10  ;;  %v5126_v26 = vpop.f32.mrb[66].mxu1 }
 0x6d1   :  { %v1543_v28 = vpop.f32.mrb[67].mxu1  ;;  %v1552_v62 = vadd.f32 %v5126_v26, %v6314_v15  ;;  %v1561_v45 = vsel %vm1141_vm0, %v1549_v30, -inf }
 0x6d2   :  { %v1544_v33 = vadd.f32 %v1543_v28, %v6317_v19  ;;  %v1555_v34 = vsel %vm1141_vm0, %v1541_v23, -inf }
 0x6d3   :  { %1556 = vmax.xlane.f32.xlu0 %v1555_v34  ;;  %v1564_v46 = vsel %vm1141_vm0, %v1552_v62, -inf }
 0x6d4   :  { %v1558_v43 = vsel %vm1141_vm0, %v1544_v33, -inf }
 0x6d5   :  { %1559 = vmax.xlane.f32.xlu1 %v1558_v43 }
 0x6d7   :  { %1562 = vmax.xlane.f32.xlu0 %v1561_v45 }
 0x6db   :  { %1565 = vmax.xlane.f32.xlu0 %v1564_v46 }
 0x6e6   :  { %1603 = vrot.lane.b32.xlu1 %v6246_v54, %s6090_s25 }
 0x760   :  { %v1557_v48 = vpop.xlane.xlu0 %1556 }
 0x761   :  { %v1567_v51 = vsub.f32 %v1541_v23, %v1557_v48 }
 0x762   :  { %v1560_v52 = vpop.xlane.xlu1 %1559 }
 0x763   :  { %v1571_v6 = vmul.f32 1.442695, %v1567_v51  ;;  %v1568_v5 = vsub.f32 %v1544_v33, %v1560_v52 }
 0x764   :  { %v1563_v57 = vpop.xlane.xlu0 %1562 }
 0x765   :  { %v1569_v13 = vsub.f32 %v1549_v30, %v1563_v57  ;;  %v1573_v26 = vmul.f32 1.442695, %v1568_v5 }
 0x766   :  { %v1604_v48 = vpop.permute.xlu1 %1603 }
 0x767   :  { %v1575_v3 = vmul.f32 1.442695, %v1569_v13 }
 0x768   :  { %v1566_v20 = vpop.xlane.xlu0 %1565 }
 0x769   :  { %5764 = vpow2.f32 %v1575_v3  ;;  %v1570_v22 = vsub.f32 %v1552_v62, %v1566_v20 }
 0x76a   :  { %5766 = vpow2.f32 %v1571_v6 }
 0x76b   :  { %v1577_v28 = vmul.f32 1.442695, %v1570_v22 }
 0x76d   :  { %5768 = vpow2.f32 %v1577_v28 }
 0x76e   :  { %5770 = vpow2.f32 %v1573_v26 }
 0x773   :  { %v5765_v34 = vpop.eup %5764 }
 0x774   :  { %v1585_v43 = vsel %vm1141_vm0, %v5765_v34, 0.0  ;;  %v5767_v45 = vpop.eup %5766 }
 0x775   :  { %1586 = vadd.xlane.f32.xlu0 %v1585_v43  ;;  %v1579_v46 = vsel %vm1141_vm0, %v5767_v45, 0.0 }
 0x777   :  { %v5769_v23 = vpop.eup %5768 }
 0x778   :  { %v1588_v30 = vsel %vm1141_vm0, %v5769_v23, 0.0  ;;  %v5771_v33 = vpop.eup %5770 }
 0x779   :  { %1580 = vadd.xlane.f32.xlu0 %v1579_v46  ;;  %1589 = vadd.xlane.f32.xlu1 %v1588_v30  ;;  %v1582_v62 = vsel %vm1141_vm0, %v5771_v33, 0.0 }
 0x77d   :  { %1583 = vadd.xlane.f32.xlu1 %v1582_v62 }
 0x78e   :  { %1666 = vrot.lane.b32.xlu1 %v6206_v11, %s6091_s26 }
 0x78f   :  { %1601 = vrot.lane.b32.xlu0 %v6248_v55, %s6090_s25 }
 0x792   :  { %1668 = vrot.lane.b32.xlu1 %v6220_v25, %s6091_s26 }
 0x793   :  { %1662 = vrot.lane.b32.xlu0 %v6204_v8, %s6091_s26 }
 0x796   :  { %1664 = vrot.lane.b32.xlu1 %v6218_v21, %s6091_s26 }
 0x802   :  { %v1587_v51 = vpop.xlane.xlu0 %1586 }
 0x806   :  { %v1590_v52 = vpop.xlane.xlu1 %1589  ;;  %v1581_v57 = vpop.xlane.xlu0 %1580 }
 0x807   :  { %5772 = vrcp.f32 %v1590_v52 }
 0x808   :  { %5774 = vrcp.f32 %v1581_v57 }
 0x809   :  { %5776 = vrcp.f32 %v1587_v51 }
 0x80a   :  { %v1584_v11 = vpop.xlane.xlu1 %1583  ;;  %v1602_v13 = vpop.permute.xlu0 %1601 }
 0x80b   :  { %5778 = vrcp.f32 %v1584_v11  ;;  %5127 = vmatprep.subr.bf16.mxu1 %v1602_v13 }
 0x80c   :  { %5128 = vmatpush3.bf16.msra.mxu1 %v1602_v13 }
 0x80d   :  { %5129 = vmatprep.subr.bf16.mxu1 %v1604_v48 }
 0x80e   :  { %v1667_v25 = vpop.permute.xlu1 %1666  ;;  %v1663_v46 = vpop.permute.xlu0 %1662 }
 0x80f   :  { %v1677_v30 = vsel %vm1141_vm0, %v1667_v25, 0 }
 0x810   :  { %5130 = vmatpush3.bf16.msra.mxu1 %v1604_v48 }
 0x811   :  { %5413 = vmatprep.subr.msk.bf16.mxu1 %vm1141_vm0, %v1667_v25  ;;  %v5773_v8 = vpop.eup %5772 }
 0x812   :  { %v5775_v6 = vpop.eup %5774  ;;  %v1598_v3 = vmul.f32 %v5773_v8, %v5769_v23  ;;  %v1669_v62 = vpop.permute.xlu1 %1668 }
 0x813   :  { %v5777_v21 = vpop.eup %5776  ;;  %v1595_v20 = vmul.f32 %v5775_v6, %v5767_v45  ;;  %v1680_v23 = vsel %vm1141_vm0, %v1669_v62, 0 }
 0x814   :  { %v1597_v26 = vmul.f32 %v5777_v21, %v5765_v34 }
 0x815   :  { %v5779_v5 = vpop.eup %5778 }
 0x816   :  { %v1596_v22 = vmul.f32 %v5779_v5, %v5771_v33  ;;  %v1600_v43 = vpack.c.bf16 %v1598_v3, %v1597_v26  ;;  %v1665_v45 = vpop.permute.xlu1 %1664 }
 0x818   :  { %v1599_v28 = vpack.c.bf16 %v1596_v22, %v1595_v20  ;;  %v1956_v20 = vadd.f32 %v6332_v4, %v6317_v19 }
 0x81a   :  { %5131 = vmatprep.mubr.msk.bf16.mxu1 %vm1141_vm0, %v1599_v28 }
 0x81b   :  { %5132 = vmatmul.mubr.msk.bf16.vlgmr.msra.gmra.mrb[68].mxu1 %vm1141_vm0, %v1600_v43  ;;  %v1964_v43 = vadd.f32 %v6330_v42, %v6314_v15 }
 0x81c   :  { %5136 = vmatpush3.bf16.xpose.msra.mxu1 %v1677_v30  ;;  %5139 = vmatprep.mubr.msk.bf16.mxu1 %vm1141_vm0, %v1663_v46  ;;  %v1970_v46 = vsel %vm1141_vm0, %v1956_v20, -inf  ;;  %v1953_v30 = vadd.f32 %v6328_v39, %v6312_v10 }
 0x81d   :  { %5414 = vmatprep.subr.msk.bf16.mxu1 %vm1141_vm0, %v1669_v62  ;;  %v1976_v4 = vsel %vm1141_vm0, %v1964_v43, -inf }
 0x824   :  { %5138 = vmatpush3.bf16.xpose.msra.mxu1 %v1680_v23  ;;  %v1961_v23 = vadd.f32 %v6326_v59, %v6310_v9 }
 0x826   :  { %v1973_v42 = vsel %vm1141_vm0, %v1961_v23, -inf }
 0x82b   :  { %5140 = vmatmul.mubr.msk.bf16.vlgmr.msra.gmra.mrb[72].mxu1 %vm1141_vm0, %v1665_v45  ;;  %v1967_v45 = vsel %vm1141_vm0, %v1953_v30, -inf }
 0x8ee   :  { %v6438_v34 = vpop.f32.mrb[68].mxu1 }
 0x8ef   :  { %v6440_v33 = vpop.f32.mrb[69].mxu1 }
 0x8f0   :  { %v6442_v48 = vpop.f32.mrb[70].mxu1 }
 0x8f1   :  { %v6446_v52 = vpop.f32.mrb[71].mxu1 }
 0x8fe   :  { %v5141_v11 = vpop.f32.mrb[72].mxu1 }
 0x8ff   :  { %v1716_v13 = vpop.f32.mrb[73].mxu1  ;;  %v1725_v21 = vadd.f32 %v5141_v11, %v6310_v9 }
 0x900   :  { %v1717_v25 = vadd.f32 %v1716_v13, %v6312_v10  ;;  %v5142_v8 = vpop.f32.mrb[74].mxu1 }
 0x901   :  { %v1719_v6 = vpop.f32.mrb[75].mxu1  ;;  %v1728_v26 = vadd.f32 %v5142_v8, %v6314_v15  ;;  %v1737_v28 = vsel %vm1141_vm0, %v1725_v21, -inf }
 0x902   :  { %v1720_v5 = vadd.f32 %v1719_v6, %v6317_v19  ;;  %v1731_v3 = vsel %vm1141_vm0, %v1717_v25, -inf }
 0x903   :  { %1732 = vmax.xlane.f32.xlu0 %v1731_v3  ;;  %v1740_v62 = vsel %vm1141_vm0, %v1728_v26, -inf }
 0x904   :  { %v1734_v22 = vsel %vm1141_vm0, %v1720_v5, -inf }
 0x905   :  { %1735 = vmax.xlane.f32.xlu1 %v1734_v22 }
 0x907   :  { %1738 = vmax.xlane.f32.xlu0 %v1737_v28 }
 0x909   :  { %1971 = vmax.xlane.f32.xlu1 %v1970_v46 }
 0x90b   :  { %1741 = vmax.xlane.f32.xlu0 %v1740_v62 }
 0x90d   :  { %1977 = vmax.xlane.f32.xlu1 %v1976_v4 }
 0x90f   :  { %1968 = vmax.xlane.f32.xlu0 %v1967_v45 }
 0x913   :  { %1974 = vmax.xlane.f32.xlu0 %v1973_v42 }
 0x990   :  { %v1733_v11 = vpop.xlane.xlu0 %1732 }
 0x992   :  { %v1736_v13 = vpop.xlane.xlu1 %1735 }
 0x993   :  { %v1744_v4 = vsub.f32 %v1720_v5, %v1736_v13 }
 0x994   :  { %v1739_v8 = vpop.xlane.xlu0 %1738 }
 0x995   :  { %v1745_v45 = vsub.f32 %v1725_v21, %v1739_v8  ;;  %v1749_v42 = vmul.f32 1.442695, %v1744_v4 }
 0x996   :  { %v1972_v6 = vpop.xlane.xlu1 %1971 }
 0x997   :  { %v1980_v39 = vsub.f32 %v1956_v20, %v1972_v6  ;;  %v1743_v20 = vsub.f32 %v1717_v25, %v1733_v11  ;;  %v1751_v6 = vmul.f32 1.442695, %v1745_v45 }
 0x998   :  { %v1742_v3 = vpop.xlane.xlu0 %1741 }
 0x999   :  { %v1985_v22 = vmul.f32 1.442695, %v1980_v39  ;;  %v1746_v28 = vsub.f32 %v1728_v26, %v1742_v3 }
 0x99a   :  { %v1978_v46 = vpop.xlane.xlu1 %1977 }
 0x99b   :  { %5780 = vpow2.f32 %v1985_v22  ;;  %v1982_v62 = vsub.f32 %v1964_v43, %v1978_v46  ;;  %v1753_v24 = vmul.f32 1.442695, %v1746_v28  ;;  %v1747_v43 = vmul.f32 1.442695, %v1743_v20 }
 0x99c   :  { %v1969_v59 = vpop.xlane.xlu0 %1968 }
 0x99d   :  { %v1989_v16 = vmul.f32 1.442695, %v1982_v62  ;;  %v1979_v51 = vsub.f32 %v1953_v30, %v1969_v59 }
 0x99f   :  { %5782 = vpow2.f32 %v1989_v16  ;;  %v1983_v57 = vmul.f32 1.442695, %v1979_v51 }
 0x9a0   :  { %5784 = vpow2.f32 %v1753_v24  ;;  %v1975_v50 = vpop.xlane.xlu0 %1974 }
 0x9a1   :  { %5786 = vpow2.f32 %v1983_v57  ;;  %v1981_v0 = vsub.f32 %v1961_v23, %v1975_v50 }
 0x9a2   :  { %5788 = vpow2.f32 %v1749_v42 }
 0x9a3   :  { %v1987_v39 = vmul.f32 1.442695, %v1981_v0 }
 0x9a5   :  { %v6470_v26 = vpop.eup %5780  ;;  %5790 = vpow2.f32 %v1987_v39 }
 0x9a6   :  { %v1994_v5 = vsel %vm1141_vm0, %v6470_v26, 0.0  ;;  %5792 = vpow2.f32 %v1751_v6 }
 0x9a7   :  { %1995 = vadd.xlane.f32.xlu1 %v1994_v5  ;;  %5794 = vpow2.f32 %v1747_v43 }
 0x9a9   :  { %v6474_v16 = vpop.eup %5782 }
 0x9aa   :  { %v5785_v51 = vpop.eup %5784  ;;  %v2000_v24 = vsel %vm1141_vm0, %v6474_v16, 0.0 }
 0x9ab   :  { %v5787_v50 = vpop.eup %5786  ;;  %2001 = vadd.xlane.f32.xlu1 %v2000_v24  ;;  %v1764_v25 = vsel %vm1141_vm0, %v5785_v51, 0.0 }
 0x9ac   :  { %v1991_v0 = vsel %vm1141_vm0, %v5787_v50, 0.0  ;;  %v5789_v57 = vpop.eup %5788 }
 0x9ad   :  { %1992 = vadd.xlane.f32.xlu0 %v1991_v0  ;;  %v1758_v11 = vsel %vm1141_vm0, %v5789_v57, 0.0 }
 0x9af   :  { %v5791_v21 = vpop.eup %5790  ;;  %1765 = vadd.xlane.f32.xlu1 %v1764_v25 }
 0x9b0   :  { %v1997_v30 = vsel %vm1141_vm0, %v5791_v21, 0.0  ;;  %v5793_v23 = vpop.eup %5792 }
 0x9b1   :  { %1998 = vadd.xlane.f32.xlu0 %v1997_v30  ;;  %v1761_v13 = vsel %vm1141_vm0, %v5793_v23, 0.0  ;;  %v5795_v8 = vpop.eup %5794 }
 0x9b2   :  { %v1755_v3 = vsel %vm1141_vm0, %v5795_v8, 0.0 }
 0x9b3   :  { %1759 = vadd.xlane.f32.xlu1 %v1758_v11 }
 0x9b5   :  { %1762 = vadd.xlane.f32.xlu0 %v1761_v13 }
 0x9b9   :  { %1756 = vadd.xlane.f32.xlu0 %v1755_v3 }
 0x9c4   :  { %1779 = vrot.lane.b32.xlu1 %v6246_v54, %s6091_s26 }
 0x9c8   :  { %2076 = vrot.lane.b32.xlu1 %v6232_v40, %s6089_s2 }
 0x9cc   :  { %2078 = vrot.lane.b32.xlu1 %v6253_v63, %s6089_s2 }
 0x9cf   :  { %1777 = vrot.lane.b32.xlu0 %v6248_v55, %s6091_s26 }
 0x9d0   :  { %2072 = vrot.lane.b32.xlu1 %v6250_v58, %s6089_s2 }
 0x9d3   :  { %2070 = vrot.lane.b32.xlu0 %v6230_v36, %s6089_s2 }
 0xa34   :  { %v1996_v22 = vpop.xlane.xlu1 %1995 }
 0xa35   :  { %5796 = vrcp.f32 %v1996_v22 }
 0xa38   :  { %v2002_v28 = vpop.xlane.xlu1 %2001 }
 0xa3a   :  { %v1993_v46 = vpop.xlane.xlu0 %1992 }
 0xa3b   :  { %5798 = vrcp.f32 %v1993_v46 }
 0xa3c   :  { %v1766_v62 = vpop.xlane.xlu1 %1765 }
 0xa3e   :  { %v1999_v54 = vpop.xlane.xlu0 %1998 }
 0xa3f   :  { %v5797_v42 = vpop.eup %5796 }
 0xa40   :  { %v1760_v4 = vpop.xlane.xlu1 %1759  ;;  %v2008_v22 = vmul.f32 %v5797_v42, %v6470_v26 }
 0xa42   :  { %v1763_v59 = vpop.xlane.xlu0 %1762 }
 0xa43   :  { %5800 = vrcp.f32 %v1763_v59 }
 0xa44   :  { %5802 = vrcp.f32 %v1760_v4  ;;  %v1780_v20 = vpop.permute.xlu1 %1779 }
 0xa45   :  { %5804 = vrcp.f32 %v1766_v62  ;;  %v5799_v6 = vpop.eup %5798 }
 0xa46   :  { %v1757_v45 = vpop.xlane.xlu0 %1756  ;;  %v2007_v11 = vmul.f32 %v5799_v6, %v5787_v50 }
 0xa47   :  { %5806 = vrcp.f32 %v1757_v45 }
 0xa48   :  { %5808 = vrcp.f32 %v1999_v54  ;;  %v2011_v54 = vpack.c.bf16 %v2008_v22, %v2007_v11  ;;  %v2077_v50 = vpop.permute.xlu1 %2076 }
 0xa49   :  { %5810 = vrcp.f32 %v2002_v28 }
 0xa4a   :  { %v1778_v55 = vpop.permute.xlu0 %1777 }
 0xa4b   :  { %5143 = vmatprep.subr.bf16.mxu1 %v1778_v55 }
 0xa4c   :  { %5144 = vmatpush3.bf16.msra.mxu1 %v1778_v55  ;;  %v2079_v4 = vpop.permute.xlu1 %2078 }
 0xa4d   :  { %5145 = vmatprep.subr.bf16.mxu1 %v1780_v20  ;;  %v5801_v39 = vpop.eup %5800 }
 0xa4e   :  { %v5803_v5 = vpop.eup %5802  ;;  %v1773_v0 = vmul.f32 %v5801_v39, %v5793_v23 }
 0xa4f   :  { %v5805_v43 = vpop.eup %5804  ;;  %v1772_v30 = vmul.f32 %v5803_v5, %v5789_v57  ;;  %v2071_v57 = vpop.permute.xlu0 %2070 }
 0xa50   :  { %5146 = vmatpush3.bf16.msra.mxu1 %v1780_v20  ;;  %v1774_v13 = vmul.f32 %v5805_v43, %v5785_v51 }
 0xa51   :  { %v5807_v24 = vpop.eup %5806  ;;  %5159 = vmatprep.subr.bf16.mxu1 %v6268_v47 }
 0xa52   :  { %v1771_v25 = vmul.f32 %v5807_v24, %v5795_v8  ;;  %v1776_v46 = vpack.c.bf16 %v1774_v13, %v1773_v0  ;;  %v5809_v62 = vpop.eup %5808  ;;  %v2087_v8 = vsel %vm1141_vm0, %v2077_v50, 0 }
 0xa53   :  { %v5811_v28 = vpop.eup %5810  ;;  %v2009_v23 = vmul.f32 %v5809_v62, %v5791_v21  ;;  %v2090_v21 = vsel %vm1141_vm0, %v2079_v4, 0 }
 0xa54   :  { %v1775_v3 = vpack.c.bf16 %v1772_v30, %v1771_v25  ;;  %v2010_v51 = vmul.f32 %v5811_v28, %v6474_v16  ;;  %v2073_v16 = vpop.permute.xlu1 %2072 }
 0xa56   :  { %5147 = vmatprep.mubr.msk.bf16.mxu1 %vm1141_vm0, %v1775_v3  ;;  %v2012_v26 = vpack.c.bf16 %v2010_v51, %v2009_v23 }
 0xa57   :  { %5148 = vmatmul.mubr.msk.bf16.vlgmr.msra.gmra.mrb[76].mxu1 %vm1141_vm0, %v1776_v46 }
 0xa58   :  { %5160 = vmatpush3.bf16.msra.mxu1 %v6268_v47  ;;  %5163 = vmatprep.mubr.msk.bf16.mxu1 %vm1141_vm0, %v2011_v54 }
 0xa59   :  { %5161 = vmatprep.subr.bf16.mxu1 %v6266_v53 }
 0xa5c   :  { %5162 = vmatpush3.bf16.msra.mxu1 %v6266_v53 }
 0xa5d   :  { %5417 = vmatprep.subr.msk.bf16.mxu1 %vm1141_vm0, %v2077_v50 }
 0xa5f   :  { %5164 = vmatmul.mubr.msk.bf16.vlgmr.msra.gmra.mrb[80].mxu1 %vm1141_vm0, %v2012_v26 }
 0xa60   :  { %5171 = vmatprep.mubr.msk.bf16.mxu1 %vm1141_vm0, %v2071_v57 }
 0xa65   :  { %5168 = vmatpush3.bf16.xpose.msra.mxu1 %v2087_v8 }
 0xa66   :  { %5418 = vmatprep.subr.msk.bf16.mxu1 %vm1141_vm0, %v2079_v4 }
 0xa6d   :  { %5170 = vmatpush3.bf16.xpose.msra.mxu1 %v2090_v21 }
 0xa74   :  { %5172 = vmatmul.mubr.msk.bf16.vlgmr.msra.gmra.mrb[84].mxu1 %vm1141_vm0, %v2073_v16 }
 0xb2a   :  { %v6512_v59 = vpop.f32.mrb[76].mxu1 }
 0xb2b   :  { %v6514_v45 = vpop.f32.mrb[77].mxu1 }
 0xb2c   :  { %v6516_v55 = vpop.f32.mrb[78].mxu1 }
 0xb2d   :  { %v6520_v20 = vpop.f32.mrb[79].mxu1 }
 0xb32   :  { %v6524_v39 = vpop.f32.mrb[80].mxu1 }
 0xb33   :  { %7259 = vst [vmem:[#allocation17_spill] sm:$0xff] %v6524_v39  ;;  %v6526_v5 = vpop.f32.mrb[81].mxu1 }
 0xb34   :  { %7260 = vst [vmem:[#allocation18_spill] sm:$0xff] %v6526_v5  ;;  %v6528_v43 = vpop.f32.mrb[82].mxu1 }
 0xb35   :  { %7261 = vst [vmem:[#allocation19_spill] sm:$0xff] %v6528_v43  ;;  %v6530_v24 = vpop.f32.mrb[83].mxu1 }
 0xb36   :  { %7262 = vst [vmem:[#allocation20_spill] sm:$0xff] %v6530_v24 }
 0xb47   :  { %v5173_v0 = vpop.f32.mrb[84].mxu1 }
 0xb48   :  { %v2126_v25 = vpop.f32.mrb[85].mxu1  ;;  %v2135_v3 = vadd.f32 %v5173_v0, %v6310_v9 }
 0xb49   :  { %v2127_v30 = vadd.f32 %v2126_v25, %v6312_v10  ;;  %v5174_v11 = vpop.f32.mrb[86].mxu1 }
 0xb4a   :  { %v2129_v13 = vpop.f32.mrb[87].mxu1  ;;  %v2138_v54 = vadd.f32 %v5174_v11, %v6314_v15  ;;  %v2147_v28 = vsel %vm1141_vm0, %v2135_v3, -inf }
 0xb4b   :  { %v2130_v22 = vadd.f32 %v2129_v13, %v6317_v19  ;;  %v2141_v46 = vsel %vm1141_vm0, %v2127_v30, -inf }
 0xb4c   :  { %2142 = vmax.xlane.f32.xlu0 %v2141_v46  ;;  %v2150_v23 = vsel %vm1141_vm0, %v2138_v54, -inf }
 0xb4d   :  { %v2144_v62 = vsel %vm1141_vm0, %v2130_v22, -inf }
 0xb4e   :  { %2145 = vmax.xlane.f32.xlu1 %v2144_v62 }
 0xb50   :  { %2148 = vmax.xlane.f32.xlu0 %v2147_v28 }
 0xb54   :  { %2151 = vmax.xlane.f32.xlu0 %v2150_v23 }
 0xb5f   :  { %2191 = vrot.lane.b32.xlu1 %v6266_v53, %s6089_s2 }
 0xbd9   :  { %v2143_v51 = vpop.xlane.xlu0 %2142 }
 0xbda   :  { %v2153_v50 = vsub.f32 %v2127_v30, %v2143_v51 }
 0xbdb   :  { %v2146_v26 = vpop.xlane.xlu1 %2145 }
 0xbdc   :  { %v2157_v4 = vmul.f32 1.442695, %v2153_v50  ;;  %v2154_v21 = vsub.f32 %v2130_v22, %v2146_v26 }
 0xbdd   :  { %v2149_v57 = vpop.xlane.xlu0 %2148 }
 0xbde   :  { %v2155_v8 = vsub.f32 %v2135_v3, %v2149_v57  ;;  %v2159_v11 = vmul.f32 1.442695, %v2154_v21 }
 0xbdf   :  { %v2192_v51 = vpop.permute.xlu1 %2191 }
 0xbe0   :  { %v2161_v16 = vmul.f32 1.442695, %v2155_v8 }
 0xbe1   :  { %v2152_v0 = vpop.xlane.xlu0 %2151 }
 0xbe2   :  { %5812 = vpow2.f32 %v2161_v16  ;;  %v2156_v25 = vsub.f32 %v2138_v54, %v2152_v0 }
 0xbe3   :  { %5814 = vpow2.f32 %v2157_v4 }
 0xbe4   :  { %v2163_v13 = vmul.f32 1.442695, %v2156_v25 }
 0xbe6   :  { %5816 = vpow2.f32 %v2163_v13 }
 0xbe7   :  { %5818 = vpow2.f32 %v2159_v11 }
 0xbec   :  { %v5813_v46 = vpop.eup %5812 }
 0xbed   :  { %v2171_v62 = vsel %vm1141_vm0, %v5813_v46, 0.0  ;;  %v5815_v28 = vpop.eup %5814 }
 0xbee   :  { %2172 = vadd.xlane.f32.xlu0 %v2171_v62  ;;  %v2165_v23 = vsel %vm1141_vm0, %v5815_v28, 0.0 }
 0xbf0   :  { %v5817_v30 = vpop.eup %5816 }
 0xbf1   :  { %v2174_v3 = vsel %vm1141_vm0, %v5817_v30, 0.0  ;;  %v5819_v22 = vpop.eup %5818 }
 0xbf2   :  { %2166 = vadd.xlane.f32.xlu0 %v2165_v23  ;;  %2175 = vadd.xlane.f32.xlu1 %v2174_v3  ;;  %v2168_v54 = vsel %vm1141_vm0, %v5819_v22, 0.0 }
 0xbf6   :  { %2169 = vadd.xlane.f32.xlu1 %v2168_v54 }
 0xc07   :  { %2254 = vrot.lane.b32.xlu1 %v6232_v40, %s6090_s25 }
 0xc08   :  { %2189 = vrot.lane.b32.xlu0 %v6268_v47, %s6089_s2 }
 0xc0b   :  { %2256 = vrot.lane.b32.xlu1 %v6253_v63, %s6090_s25 }
 0xc0c   :  { %2250 = vrot.lane.b32.xlu0 %v6230_v36, %s6090_s25 }
 0xc0f   :  { %2252 = vrot.lane.b32.xlu1 %v6250_v58, %s6090_s25 }
 0xc7b   :  { %v2173_v50 = vpop.xlane.xlu0 %2172 }
 0xc7f   :  { %v2176_v26 = vpop.xlane.xlu1 %2175  ;;  %v2167_v57 = vpop.xlane.xlu0 %2166 }
 0xc80   :  { %5820 = vrcp.f32 %v2176_v26 }
 0xc81   :  { %5822 = vrcp.f32 %v2167_v57 }
 0xc82   :  { %5824 = vrcp.f32 %v2173_v50 }
 0xc83   :  { %v2170_v8 = vpop.xlane.xlu1 %2169  ;;  %v2190_v4 = vpop.permute.xlu0 %2189 }
 0xc84   :  { %5826 = vrcp.f32 %v2170_v8  ;;  %5175 = vmatprep.subr.bf16.mxu0 %v2190_v4 }
 0xc85   :  { %5176 = vmatpush3.bf16.msra.mxu0 %v2190_v4 }
 0xc86   :  { %5177 = vmatprep.subr.bf16.mxu0 %v2192_v51 }
 0xc87   :  { %v2255_v21 = vpop.permute.xlu1 %2254  ;;  %v2251_v26 = vpop.permute.xlu0 %2250 }
 0xc88   :  { %v2265_v57 = vsel %vm1141_vm0, %v2255_v21, 0 }
 0xc89   :  { %5178 = vmatpush3.bf16.msra.mxu0 %v2192_v51 }
 0xc8a   :  { %5419 = vmatprep.subr.msk.bf16.mxu0 %vm1141_vm0, %v2255_v21  ;;  %v5821_v16 = vpop.eup %5820 }
 0xc8b   :  { %v5823_v0 = vpop.eup %5822  ;;  %v2184_v13 = vmul.f32 %v5821_v16, %v5817_v30  ;;  %v2257_v51 = vpop.permute.xlu1 %2256 }
 0xc8c   :  { %v5825_v25 = vpop.eup %5824  ;;  %v2181_v62 = vmul.f32 %v5823_v0, %v5815_v28  ;;  %v2268_v30 = vsel %vm1141_vm0, %v2257_v51, 0 }
 0xc8d   :  { %v2183_v3 = vmul.f32 %v5825_v25, %v5813_v46 }
 0xc8e   :  { %v5827_v11 = vpop.eup %5826 }
 0xc8f   :  { %v2182_v23 = vmul.f32 %v5827_v11, %v5819_v22  ;;  %v2186_v50 = vpack.c.bf16 %v2184_v13, %v2183_v3  ;;  %v2253_v28 = vpop.permute.xlu1 %2252 }
 0xc91   :  { %v2185_v54 = vpack.c.bf16 %v2182_v23, %v2181_v62 }
 0xc93   :  { %5179 = vmatprep.mubr.msk.bf16.mxu0 %vm1141_vm0, %v2185_v54 }
 0xc94   :  { %5180 = vmatmul.mubr.msk.bf16.vlgmr.msra.gmra.mrb[36].mxu0 %vm1141_vm0, %v2186_v50 }
 0xc95   :  { %5184 = vmatpush3.bf16.xpose.msra.mxu0 %v2265_v57  ;;  %5187 = vmatprep.mubr.msk.bf16.mxu0 %vm1141_vm0, %v2251_v26 }
 0xc96   :  { %5420 = vmatprep.subr.msk.bf16.mxu0 %vm1141_vm0, %v2257_v51 }
 0xc9d   :  { %5186 = vmatpush3.bf16.xpose.msra.mxu0 %v2268_v30 }
 0xca4   :  { %5188 = vmatmul.mubr.msk.bf16.vlgmr.msra.gmra.mrb[40].mxu0 %vm1141_vm0, %v2253_v28 }
 0xd67   :  { %v6564_v46 = vpop.f32.mrb[36].mxu0 }
 0xd68   :  { %v6566_v22 = vpop.f32.mrb[37].mxu0 }
 0xd69   :  { %v6568_v8 = vpop.f32.mrb[38].mxu0 }
 0xd6a   :  { %v6572_v21 = vpop.f32.mrb[39].mxu0 }
 0xd77   :  { %v5189_v0 = vpop.f32.mrb[40].mxu0 }
 0xd78   :  { %v2304_v25 = vpop.f32.mrb[41].mxu0  ;;  %v2313_v23 = vadd.f32 %v5189_v0, %v6310_v9 }
 0xd79   :  { %v2305_v11 = vadd.f32 %v2304_v25, %v6312_v10  ;;  %v5190_v13 = vpop.f32.mrb[42].mxu0 }
 0xd7a   :  { %v2307_v62 = vpop.f32.mrb[43].mxu0  ;;  %v2316_v26 = vadd.f32 %v5190_v13, %v6314_v15  ;;  %v2325_v57 = vsel %vm1141_vm0, %v2313_v23, -inf }
 0xd7b   :  { %v2308_v3 = vadd.f32 %v2307_v62, %v6317_v19  ;;  %v2319_v54 = vsel %vm1141_vm0, %v2305_v11, -inf }
 0xd7c   :  { %2320 = vmax.xlane.f32.xlu0 %v2319_v54  ;;  %v2328_v51 = vsel %vm1141_vm0, %v2316_v26, -inf }
 0xd7d   :  { %v2322_v50 = vsel %vm1141_vm0, %v2308_v3, -inf }
 0xd7e   :  { %2323 = vmax.xlane.f32.xlu1 %v2322_v50 }
 0xd80   :  { %2326 = vmax.xlane.f32.xlu0 %v2325_v57 }
 0xd84   :  { %2329 = vmax.xlane.f32.xlu0 %v2328_v51 }
 0xd8f   :  { %2367 = vrot.lane.b32.xlu1 %v6266_v53, %s6090_s25 }
 0xe09   :  { %v2321_v30 = vpop.xlane.xlu0 %2320 }
 0xe0a   :  { %v2331_v28 = vsub.f32 %v2305_v11, %v2321_v30 }
 0xe0b   :  { %v2324_v0 = vpop.xlane.xlu1 %2323 }
 0xe0c   :  { %v2335_v54 = vmul.f32 1.442695, %v2331_v28  ;;  %v2332_v4 = vsub.f32 %v2308_v3, %v2324_v0 }
 0xe0d   :  { %v2327_v25 = vpop.xlane.xlu0 %2326 }
 0xe0e   :  { %v2333_v62 = vsub.f32 %v2313_v23, %v2327_v25  ;;  %v2337_v16 = vmul.f32 1.442695, %v2332_v4 }
 0xe10   :  { %v2339_v42 = vmul.f32 1.442695, %v2333_v62 }
 0xe11   :  { %v2330_v50 = vpop.xlane.xlu0 %2329 }
 0xe12   :  { %5828 = vpow2.f32 %v2339_v42  ;;  %v2334_v13 = vsub.f32 %v2316_v26, %v2330_v50 }
 0xe13   :  { %5830 = vpow2.f32 %v2335_v54 }
 0xe14   :  { %v2341_v57 = vmul.f32 1.442695, %v2334_v13 }
 0xe16   :  { %5832 = vpow2.f32 %v2341_v57 }
 0xe17   :  { %5834 = vpow2.f32 %v2337_v16 }
 0xe1c   :  { %v5829_v51 = vpop.eup %5828 }
 0xe1d   :  { %v2349_v6 = vsel %vm1141_vm0, %v5829_v51, 0.0  ;;  %v5831_v39 = vpop.eup %5830 }
 0xe1e   :  { %2350 = vadd.xlane.f32.xlu0 %v2349_v6  ;;  %v2343_v30 = vsel %vm1141_vm0, %v5831_v39, 0.0  ;;  %v2368_v6 = vpop.permute.xlu1 %2367 }
 0xe20   :  { %v5833_v11 = vpop.eup %5832 }
 0xe21   :  { %v2352_v23 = vsel %vm1141_vm0, %v5833_v11, 0.0  ;;  %v5835_v3 = vpop.eup %5834 }
 0xe22   :  { %2344 = vadd.xlane.f32.xlu0 %v2343_v30  ;;  %2353 = vadd.xlane.f32.xlu1 %v2352_v23  ;;  %v2346_v42 = vsel %vm1141_vm0, %v5835_v3, 0.0 }
 0xe26   :  { %2347 = vadd.xlane.f32.xlu1 %v2346_v42 }
 0xe37   :  { %2430 = vrot.lane.b32.xlu1 %v6232_v40, %s6091_s26 }
 0xe38   :  { %2365 = vrot.lane.b32.xlu0 %v6268_v47, %s6090_s25 }
 0xe3b   :  { %2432 = vrot.lane.b32.xlu1 %v6253_v63, %s6091_s26 }
 0xe3c   :  { %2426 = vrot.lane.b32.xlu0 %v6230_v36, %s6091_s26 }
 0xe3f   :  { %2428 = vrot.lane.b32.xlu1 %v6250_v58, %s6091_s26 }
 0xeab   :  { %v2351_v4 = vpop.xlane.xlu0 %2350 }
 0xeaf   :  { %v2354_v16 = vpop.xlane.xlu1 %2353  ;;  %v2345_v26 = vpop.xlane.xlu0 %2344 }
 0xeb0   :  { %5836 = vrcp.f32 %v2354_v16 }
 0xeb1   :  { %5838 = vrcp.f32 %v2345_v26 }
 0xeb2   :  { %5840 = vrcp.f32 %v2351_v4 }
 0xeb3   :  { %v2348_v40 = vpop.xlane.xlu1 %2347  ;;  %v2366_v28 = vpop.permute.xlu0 %2365 }
 0xeb4   :  { %5842 = vrcp.f32 %v2348_v40  ;;  %5191 = vmatprep.subr.bf16.mxu1 %v2366_v28 }
 0xeb5   :  { %5192 = vmatpush3.bf16.msra.mxu1 %v2366_v28 }
 0xeb6   :  { %5193 = vmatprep.subr.bf16.mxu1 %v2368_v6 }
 0xeb7   :  { %v2431_v63 = vpop.permute.xlu1 %2430  ;;  %v2427_v23 = vpop.permute.xlu0 %2426 }
 0xeb8   :  { %v2441_v42 = vsel %vm1141_vm0, %v2431_v63, 0 }
 0xeb9   :  { %5194 = vmatpush3.bf16.msra.mxu1 %v2368_v6 }
 0xeba   :  { %5421 = vmatprep.subr.msk.bf16.mxu1 %vm1141_vm0, %v2431_v63  ;;  %v5837_v36 = vpop.eup %5836 }
 0xebb   :  { %v5839_v0 = vpop.eup %5838  ;;  %v2362_v62 = vmul.f32 %v5837_v36, %v5833_v11  ;;  %v2433_v6 = vpop.permute.xlu1 %2432 }
 0xebc   :  { %v5841_v58 = vpop.eup %5840  ;;  %v2359_v54 = vmul.f32 %v5839_v0, %v5831_v39  ;;  %v2444_v11 = vsel %vm1141_vm0, %v2433_v6, 0 }
 0xebd   :  { %v2361_v13 = vmul.f32 %v5841_v58, %v5829_v51 }
 0xebe   :  { %v5843_v25 = vpop.eup %5842 }
 0xebf   :  { %v2360_v50 = vmul.f32 %v5843_v25, %v5835_v3  ;;  %v2364_v30 = vpack.c.bf16 %v2362_v62, %v2361_v13  ;;  %v2429_v39 = vpop.permute.xlu1 %2428 }
 0xec1   :  { %v2363_v57 = vpack.c.bf16 %v2360_v50, %v2359_v54 }
 0xec3   :  { %5195 = vmatprep.mubr.msk.bf16.mxu1 %vm1141_vm0, %v2363_v57 }
 0xec4   :  { %5196 = vmatmul.mubr.msk.bf16.vlgmr.msra.gmra.mrb[88].mxu1 %vm1141_vm0, %v2364_v30 }
 0xec5   :  { %5200 = vmatpush3.bf16.xpose.msra.mxu1 %v2441_v42  ;;  %5203 = vmatprep.mubr.msk.bf16.mxu1 %vm1141_vm0, %v2427_v23 }
 0xec6   :  { %5422 = vmatprep.subr.msk.bf16.mxu1 %vm1141_vm0, %v2433_v6 }
 0xecd   :  { %5202 = vmatpush3.bf16.xpose.msra.mxu1 %v2444_v11 }
 0xece   :  { %5223 = vmatprep.subr.bf16.mxu1 %v6282_v32 }
 0xed4   :  { %5204 = vmatmul.mubr.msk.bf16.vlgmr.msra.gmra.mrb[92].mxu1 %vm1141_vm0, %v2429_v39 }
 0xed5   :  { %5224 = vmatpush3.bf16.msra.mxu1 %v6282_v32 }
 0xed6   :  { %5225 = vmatprep.subr.bf16.mxu1 %v6280_v29 }
 0xed9   :  { %5226 = vmatpush3.bf16.msra.mxu1 %v6280_v29 }
 0xf97   :  { %v6612_v51 = vpop.f32.mrb[88].mxu1 }
 0xf98   :  { %v6614_v3 = vpop.f32.mrb[89].mxu1 }
 0xf99   :  { %v6616_v4 = vpop.f32.mrb[90].mxu1 }
 0xf9a   :  { %v6620_v26 = vpop.f32.mrb[91].mxu1 }
 0xfa7   :  { %v5205_v28 = vpop.f32.mrb[92].mxu1 }
 0xfa8   :  { %v2480_v63 = vpop.f32.mrb[93].mxu1  ;;  %v2489_v25 = vadd.f32 %v5205_v28, %v6310_v9 }
 0xfa9   :  { %v2481_v36 = vadd.f32 %v2480_v63, %v6312_v10  ;;  %v5206_v0 = vpop.f32.mrb[94].mxu1 }
 0xfaa   :  { %v2483_v58 = vpop.f32.mrb[95].mxu1  ;;  %v2492_v13 = vadd.f32 %v5206_v0, %v6314_v15  ;;  %v2501_v57 = vsel %vm1141_vm0, %v2489_v25, -inf }
 0xfab   :  { %v2484_v62 = vadd.f32 %v2483_v58, %v6317_v19  ;;  %v2495_v54 = vsel %vm1141_vm0, %v2481_v36, -inf }
 0xfac   :  { %2496 = vmax.xlane.f32.xlu0 %v2495_v54  ;;  %v2504_v30 = vsel %vm1141_vm0, %v2492_v13, -inf }
 0xfad   :  { %v2498_v50 = vsel %vm1141_vm0, %v2484_v62, -inf }
 0xfae   :  { %2499 = vmax.xlane.f32.xlu1 %v2498_v50 }
 0xfb0   :  { %2502 = vmax.xlane.f32.xlu0 %v2501_v57 }
 0xfb4   :  { %2505 = vmax.xlane.f32.xlu0 %v2504_v30 }
0x1039   :  { %v2497_v23 = vpop.xlane.xlu0 %2496 }
0x103a   :  { %v2507_v42 = vsub.f32 %v2481_v36, %v2497_v23 }
0x103b   :  { %v2500_v6 = vpop.xlane.xlu1 %2499 }
0x103c   :  { %v2511_v28 = vmul.f32 1.442695, %v2507_v42  ;;  %v2508_v63 = vsub.f32 %v2484_v62, %v2500_v6 }
0x103d   :  { %v2503_v11 = vpop.xlane.xlu0 %2502 }
0x103e   :  { %v2509_v39 = vsub.f32 %v2489_v25, %v2503_v11  ;;  %v2513_v50 = vmul.f32 1.442695, %v2508_v63 }
0x1040   :  { %v2515_v58 = vmul.f32 1.442695, %v2509_v39 }
0x1041   :  { %v2506_v54 = vpop.xlane.xlu0 %2505 }
0x1042   :  { %5844 = vpow2.f32 %v2515_v58  ;;  %v2510_v16 = vsub.f32 %v2492_v13, %v2506_v54 }
0x1043   :  { %5846 = vpow2.f32 %v2511_v28 }
0x1044   :  { %v2517_v0 = vmul.f32 1.442695, %v2510_v16 }
0x1046   :  { %5848 = vpow2.f32 %v2517_v0 }
0x1047   :  { %5850 = vpow2.f32 %v2513_v50 }
0x104c   :  { %v5845_v57 = vpop.eup %5844 }
0x104d   :  { %v2525_v40 = vsel %vm1141_vm0, %v5845_v57, 0.0  ;;  %v5847_v30 = vpop.eup %5846 }
0x104e   :  { %2526 = vadd.xlane.f32.xlu0 %v2525_v40  ;;  %v2519_v23 = vsel %vm1141_vm0, %v5847_v30, 0.0 }
0x1050   :  { %v5849_v36 = vpop.eup %5848 }
0x1051   :  { %v2528_v25 = vsel %vm1141_vm0, %v5849_v36, 0.0  ;;  %v5851_v62 = vpop.eup %5850 }
0x1052   :  { %2520 = vadd.xlane.f32.xlu0 %v2519_v23  ;;  %2529 = vadd.xlane.f32.xlu1 %v2528_v25  ;;  %v2522_v13 = vsel %vm1141_vm0, %v5851_v62, 0.0 }
0x1056   :  { %2523 = vadd.xlane.f32.xlu1 %v2522_v13  ;;  %v2675_v13 = vsel %vm1141_vm0, %v6272_v18, 0 }
0x1067   :  { %2543 = vrot.lane.b32.xlu1 %v6266_v53, %s6091_s26 }
0x1068   :  { %2541 = vrot.lane.b32.xlu0 %v6268_v47, %s6091_s26 }
0x10db   :  { %v2527_v16 = vpop.xlane.xlu0 %2526 }
0x10df   :  { %v2530_v42 = vpop.xlane.xlu1 %2529  ;;  %v2521_v40 = vpop.xlane.xlu0 %2520 }
0x10e0   :  { %5852 = vrcp.f32 %v2530_v42 }
0x10e1   :  { %5854 = vrcp.f32 %v2521_v40 }
0x10e2   :  { %5856 = vrcp.f32 %v2527_v16 }
0x10e3   :  { %v2524_v6 = vpop.xlane.xlu1 %2523  ;;  %v2542_v11 = vpop.permute.xlu0 %2541 }
0x10e4   :  { %5858 = vrcp.f32 %v2524_v6  ;;  %5207 = vmatprep.subr.bf16.mxu0 %v2542_v11 }
0x10e5   :  { %5208 = vmatpush3.bf16.msra.mxu0 %v2542_v11 }
0x10e7   :  { %v2544_v39 = vpop.permute.xlu1 %2543 }
0x10e8   :  { %5209 = vmatprep.subr.bf16.mxu0 %v2544_v39 }
0x10e9   :  { %5210 = vmatpush3.bf16.msra.mxu0 %v2544_v39 }
0x10ea   :  { %5423 = vmatprep.subr.msk.bf16.mxu0 %vm1141_vm0, %v6272_v18  ;;  %v5853_v53 = vpop.eup %5852 }
0x10eb   :  { %v5855_v28 = vpop.eup %5854  ;;  %v2538_v58 = vmul.f32 %v5853_v53, %v5849_v36 }
0x10ec   :  { %v5857_v47 = vpop.eup %5856  ;;  %v2535_v54 = vmul.f32 %v5855_v28, %v5847_v30  ;;  %v2678_v30 = vsel %vm1141_vm0, %v6286_v37, 0 }
0x10ed   :  { %v2537_v0 = vmul.f32 %v5857_v47, %v5845_v57 }
0x10ee   :  { %v5859_v63 = vpop.eup %5858 }
0x10ef   :  { %v2536_v50 = vmul.f32 %v5859_v63, %v5851_v62  ;;  %v2540_v25 = vpack.c.bf16 %v2538_v58, %v2537_v0 }
0x10f1   :  { %v2539_v23 = vpack.c.bf16 %v2536_v50, %v2535_v54 }
0x10f3   :  { %5211 = vmatprep.mubr.msk.bf16.mxu0 %vm1141_vm0, %v2539_v23 }
0x10f4   :  { %5212 = vmatmul.mubr.msk.bf16.vlgmr.msra.gmra.mrb[44].mxu0 %vm1141_vm0, %v2540_v25 }
0x10f5   :  { %5216 = vmatpush3.bf16.xpose.msra.mxu0 %v2675_v13  ;;  %5219 = vmatprep.mubr.msk.bf16.mxu0 %vm1141_vm0, %v6270_v14 }
0x10f6   :  { %5424 = vmatprep.subr.msk.bf16.mxu0 %vm1141_vm0, %v6286_v37 }
0x10fd   :  { %5218 = vmatpush3.bf16.xpose.msra.mxu0 %v2678_v30 }
0x1104   :  { %5220 = vmatmul.mubr.msk.bf16.vlgmr.msra.gmra.mrb[48].mxu0 %vm1141_vm0, %v6284_v1 }
0x11c7   :  { %v6654_v57 = vpop.f32.mrb[44].mxu0 }
0x11c8   :  { %v6656_v36 = vpop.f32.mrb[45].mxu0 }
0x11c9   :  { %v6658_v62 = vpop.f32.mrb[46].mxu0 }
0x11ca   :  { %v6662_v42 = vpop.f32.mrb[47].mxu0 }
0x11d7   :  { %v5221_v6 = vpop.f32.mrb[48].mxu0 }
0x11d8   :  { %v2714_v11 = vpop.f32.mrb[49].mxu0  ;;  %v2723_v54 = vadd.f32 %v5221_v6, %v6310_v9 }
0x11d9   :  { %v2715_v39 = vadd.f32 %v2714_v11, %v6312_v10  ;;  %v5222_v53 = vpop.f32.mrb[50].mxu0 }
0x11da   :  { %v2717_v28 = vpop.f32.mrb[51].mxu0  ;;  %v2726_v47 = vadd.f32 %v5222_v53, %v6314_v15  ;;  %v2735_v23 = vsel %vm1141_vm0, %v2723_v54, -inf }
0x11db   :  { %v2718_v63 = vadd.f32 %v2717_v28, %v6317_v19  ;;  %v2729_v58 = vsel %vm1141_vm0, %v2715_v39, -inf }
0x11dc   :  { %2730 = vmax.xlane.f32.xlu1 %v2729_v58  ;;  %v2738_v0 = vsel %vm1141_vm0, %v2726_v47, -inf }
0x11dd   :  { %v2732_v50 = vsel %vm1141_vm0, %v2718_v63, -inf }
0x11de   :  { %2733 = vmax.xlane.f32.xlu0 %v2732_v50 }
0x11e0   :  { %2739 = vmax.xlane.f32.xlu1 %v2738_v0 }
0x11e2   :  { %2736 = vmax.xlane.f32.xlu0 %v2735_v23 }
0x1269   :  { %v2731_v25 = vpop.xlane.xlu1 %2730 }
0x126a   :  { %v2741_v53 = vsub.f32 %v2715_v39, %v2731_v25 }
0x126b   :  { %v2734_v13 = vpop.xlane.xlu0 %2733 }
0x126c   :  { %v2742_v30 = vsub.f32 %v2718_v63, %v2734_v13  ;;  %v2745_v43 = vmul.f32 1.442695, %v2741_v53 }
0x126d   :  { %v2740_v11 = vpop.xlane.xlu1 %2739 }
0x126e   :  { %v2747_v28 = vmul.f32 1.442695, %v2742_v30  ;;  %v2744_v16 = vsub.f32 %v2726_v47, %v2740_v11 }
0x126f   :  { %v2737_v40 = vpop.xlane.xlu0 %2736 }
0x1270   :  { %5860 = vpow2.f32 %v2747_v28  ;;  %v2751_v58 = vmul.f32 1.442695, %v2744_v16  ;;  %v2743_v6 = vsub.f32 %v2723_v54, %v2737_v40 }
0x1272   :  { %5862 = vpow2.f32 %v2751_v58  ;;  %v2749_v50 = vmul.f32 1.442695, %v2743_v6 }
0x1274   :  { %5864 = vpow2.f32 %v2749_v50 }
0x1275   :  { %5866 = vpow2.f32 %v2745_v43 }
0x127a   :  { %v5861_v0 = vpop.eup %5860 }
0x127b   :  { %v2756_v5 = vsel %vm1141_vm0, %v5861_v0, 0.0 }
0x127c   :  { %v5863_v23 = vpop.eup %5862  ;;  %2757 = vadd.xlane.f32.xlu1 %v2756_v5 }
0x127d   :  { %v2762_v39 = vsel %vm1141_vm0, %v5863_v23, 0.0 }
0x127e   :  { %v5865_v24 = vpop.eup %5864 }
0x127f   :  { %v2759_v63 = vsel %vm1141_vm0, %v5865_v24, 0.0  ;;  %v5867_v47 = vpop.eup %5866 }
0x1280   :  { %2760 = vadd.xlane.f32.xlu0 %v2759_v63  ;;  %2763 = vadd.xlane.f32.xlu1 %v2762_v39  ;;  %v2753_v16 = vsel %vm1141_vm0, %v5867_v47, 0.0 }
0x1284   :  { %2754 = vadd.xlane.f32.xlu0 %v2753_v16 }
0x1291   :  { %2840 = vrot.lane.b32.xlu1 %v6286_v37, %s6089_s2 }
0x1295   :  { %2832 = vrot.lane.b32.xlu1 %v6270_v14, %s6089_s2 }
0x1299   :  { %2834 = vrot.lane.b32.xlu1 %v6284_v1, %s6089_s2 }
0x129a   :  { %2838 = vrot.lane.b32.xlu0 %v6272_v18, %s6089_s2 }
0x1309   :  { %v2758_v5 = vpop.xlane.xlu1 %2757 }
0x130d   :  { %v2761_v43 = vpop.xlane.xlu0 %2760  ;;  %v2764_v40 = vpop.xlane.xlu1 %2763 }
0x130e   :  { %5868 = vrcp.f32 %v2761_v43 }
0x130f   :  { %5870 = vrcp.f32 %v2764_v40 }
0x1310   :  { %5872 = vrcp.f32 %v2758_v5 }
0x1311   :  { %v2755_v54 = vpop.xlane.xlu0 %2754  ;;  %v2841_v6 = vpop.permute.xlu1 %2840 }
0x1312   :  { %5874 = vrcp.f32 %v2755_v54 }
0x1315   :  { %v2839_v25 = vpop.permute.xlu0 %2838  ;;  %v2833_v43 = vpop.permute.xlu1 %2832 }
0x1316   :  { %5425 = vmatprep.subr.msk.bf16.mxu1 %vm1141_vm0, %v2839_v25  ;;  %v2849_v5 = vsel %vm1141_vm0, %v2839_v25, 0 }
0x1318   :  { %v5869_v13 = vpop.eup %5868 }
0x1319   :  { %v5871_v30 = vpop.eup %5870  ;;  %v2771_v28 = vmul.f32 %v5869_v13, %v5865_v24  ;;  %v2852_v24 = vsel %vm1141_vm0, %v2841_v6, 0 }
0x131a   :  { %v5873_v11 = vpop.eup %5872  ;;  %v2772_v58 = vmul.f32 %v5871_v30, %v5863_v23  ;;  %v2835_v23 = vpop.permute.xlu1 %2834 }
0x131b   :  { %v2770_v63 = vmul.f32 %v5873_v11, %v5861_v0 }
0x131c   :  { %v5875_v53 = vpop.eup %5874  ;;  %v2774_v16 = vpack.c.bf16 %v2772_v58, %v2771_v28 }
0x131d   :  { %v2769_v50 = vmul.f32 %v5875_v53, %v5867_v47 }
0x131f   :  { %v2773_v39 = vpack.c.bf16 %v2770_v63, %v2769_v50 }
0x1321   :  { %5227 = vmatprep.mubr.msk.bf16.mxu1 %vm1141_vm0, %v2773_v39 }
0x1322   :  { %5228 = vmatmul.mubr.msk.bf16.vlgmr.msra.gmra.mrb[96].mxu1 %vm1141_vm0, %v2774_v16 }
0x1323   :  { %5232 = vmatpush3.bf16.xpose.msra.mxu1 %v2849_v5  ;;  %5235 = vmatprep.mubr.msk.bf16.mxu1 %vm1141_vm0, %v2833_v43 }
0x1324   :  { %5426 = vmatprep.subr.msk.bf16.mxu1 %vm1141_vm0, %v2841_v6 }
0x132b   :  { %5234 = vmatpush3.bf16.xpose.msra.mxu1 %v2852_v24 }
0x1332   :  { %5236 = vmatmul.mubr.msk.bf16.vlgmr.msra.gmra.mrb[100].mxu1 %vm1141_vm0, %v2835_v23 }
0x13f5   :  { %v6694_v0 = vpop.f32.mrb[96].mxu1 }
0x13f6   :  { %7263 = vst [vmem:[#allocation21_spill] sm:$0xff] %v6694_v0  ;;  %v6696_v47 = vpop.f32.mrb[97].mxu1 }
0x13f7   :  { %7264 = vst [vmem:[#allocation22_spill] sm:$0xff] %v6696_v47  ;;  %v6698_v40 = vpop.f32.mrb[98].mxu1 }
0x13f8   :  { %7265 = vst [vmem:[#allocation23_spill] sm:$0xff] %v6698_v40  ;;  %v6700_v54 = vpop.f32.mrb[99].mxu1 }
0x13f9   :  { %7266 = vst [vmem:[#allocation24_spill] sm:$0xff] %v6700_v54 }
0x1405   :  { %v5237_v25 = vpop.f32.mrb[100].mxu1 }
0x1406   :  { %v2888_v13 = vpop.f32.mrb[101].mxu1  ;;  %v2897_v28 = vadd.f32 %v5237_v25, %v6310_v9 }
0x1407   :  { %v2889_v30 = vadd.f32 %v2888_v13, %v6312_v10  ;;  %v5238_v11 = vpop.f32.mrb[102].mxu1 }
0x1408   :  { %v2891_v53 = vpop.f32.mrb[103].mxu1  ;;  %v2900_v63 = vadd.f32 %v5238_v11, %v6314_v15  ;;  %v2909_v39 = vsel %vm1141_vm0, %v2897_v28, -inf }
0x1409   :  { %v2892_v58 = vadd.f32 %v2891_v53, %v6317_v19  ;;  %v2903_v6 = vsel %vm1141_vm0, %v2889_v30, -inf }
0x140a   :  { %2904 = vmax.xlane.f32.xlu0 %v2903_v6  ;;  %v2912_v16 = vsel %vm1141_vm0, %v2900_v63, -inf }
0x140b   :  { %v2906_v50 = vsel %vm1141_vm0, %v2892_v58, -inf }
0x140c   :  { %2907 = vmax.xlane.f32.xlu1 %v2906_v50 }
0x140e   :  { %2910 = vmax.xlane.f32.xlu0 %v2909_v39 }
0x1412   :  { %2913 = vmax.xlane.f32.xlu0 %v2912_v16 }
0x141d   :  { %2953 = vrot.lane.b32.xlu1 %v6280_v29, %s6089_s2 }
0x1497   :  { %v2905_v43 = vpop.xlane.xlu0 %2904 }
0x1498   :  { %v2915_v5 = vsub.f32 %v2889_v30, %v2905_v43 }
0x1499   :  { %v2908_v24 = vpop.xlane.xlu1 %2907 }
0x149a   :  { %v2919_v13 = vmul.f32 1.442695, %v2915_v5  ;;  %v2916_v53 = vsub.f32 %v2892_v58, %v2908_v24 }
0x149b   :  { %v2911_v23 = vpop.xlane.xlu0 %2910 }
0x149c   :  { %v2917_v25 = vsub.f32 %v2897_v28, %v2911_v23  ;;  %v2921_v0 = vmul.f32 1.442695, %v2916_v53 }
0x149e   :  { %v2923_v6 = vmul.f32 1.442695, %v2917_v25 }
0x149f   :  { %v2914_v50 = vpop.xlane.xlu0 %2913 }
0x14a0   :  { %5876 = vpow2.f32 %v2923_v6  ;;  %v2918_v11 = vsub.f32 %v2900_v63, %v2914_v50 }
0x14a1   :  { %5878 = vpow2.f32 %v2919_v13 }
0x14a2   :  { %v2925_v39 = vmul.f32 1.442695, %v2918_v11 }
0x14a4   :  { %5880 = vpow2.f32 %v2925_v39 }
0x14a5   :  { %5882 = vpow2.f32 %v2921_v0  ;;  %v2954_v0 = vpop.permute.xlu1 %2953 }
0x14aa   :  { %v5877_v16 = vpop.eup %5876 }
0x14ab   :  { %v2933_v40 = vsel %vm1141_vm0, %v5877_v16, 0.0  ;;  %v5879_v47 = vpop.eup %5878 }
0x14ac   :  { %2934 = vadd.xlane.f32.xlu0 %v2933_v40  ;;  %v2927_v43 = vsel %vm1141_vm0, %v5879_v47, 0.0 }
0x14ae   :  { %v5881_v30 = vpop.eup %5880 }
0x14af   :  { %v2936_v28 = vsel %vm1141_vm0, %v5881_v30, 0.0  ;;  %v5883_v58 = vpop.eup %5882 }
0x14b0   :  { %2928 = vadd.xlane.f32.xlu0 %v2927_v43  ;;  %2937 = vadd.xlane.f32.xlu1 %v2936_v28  ;;  %v2930_v63 = vsel %vm1141_vm0, %v5883_v58, 0.0 }
0x14b4   :  { %2931 = vadd.xlane.f32.xlu1 %v2930_v63 }
0x14c5   :  { %3016 = vrot.lane.b32.xlu1 %v6272_v18, %s6090_s25 }
0x14c6   :  { %2951 = vrot.lane.b32.xlu0 %v6282_v32, %s6089_s2 }
0x14c9   :  { %3018 = vrot.lane.b32.xlu1 %v6286_v37, %s6090_s25 }
0x14ca   :  { %3012 = vrot.lane.b32.xlu0 %v6270_v14, %s6090_s25 }
0x14cd   :  { %3014 = vrot.lane.b32.xlu1 %v6284_v1, %s6090_s25 }
0x1539   :  { %v2935_v40 = vpop.xlane.xlu0 %2934 }
0x153d   :  { %v2938_v5 = vpop.xlane.xlu1 %2937  ;;  %v2929_v24 = vpop.xlane.xlu0 %2928 }
0x153e   :  { %5884 = vrcp.f32 %v2938_v5 }
0x153f   :  { %5886 = vrcp.f32 %v2929_v24 }
0x1540   :  { %5888 = vrcp.f32 %v2935_v40 }
0x1541   :  { %v2932_v23 = vpop.xlane.xlu1 %2931  ;;  %v2952_v25 = vpop.permute.xlu0 %2951 }
0x1542   :  { %5890 = vrcp.f32 %v2932_v23  ;;  %5239 = vmatprep.subr.bf16.mxu0 %v2952_v25 }
0x1543   :  { %5240 = vmatpush3.bf16.msra.mxu0 %v2952_v25 }
0x1544   :  { %5241 = vmatprep.subr.bf16.mxu0 %v2954_v0 }
0x1545   :  { %v3017_v13 = vpop.permute.xlu1 %3016  ;;  %v3013_v24 = vpop.permute.xlu0 %3012 }
0x1546   :  { %v3027_v23 = vsel %vm1141_vm0, %v3017_v13, 0 }
0x1547   :  { %5242 = vmatpush3.bf16.msra.mxu0 %v2954_v0 }
0x1548   :  { %5427 = vmatprep.subr.msk.bf16.mxu0 %vm1141_vm0, %v3017_v13  ;;  %v5885_v53 = vpop.eup %5884 }
0x1549   :  { %v5887_v6 = vpop.eup %5886  ;;  %v2946_v39 = vmul.f32 %v5885_v53, %v5881_v30  ;;  %v3019_v0 = vpop.permute.xlu1 %3018 }
0x154a   :  { %v5889_v50 = vpop.eup %5888  ;;  %v2943_v43 = vmul.f32 %v5887_v6, %v5879_v47  ;;  %v3030_v30 = vsel %vm1141_vm0, %v3019_v0, 0 }
0x154b   :  { %v2945_v63 = vmul.f32 %v5889_v50, %v5877_v16 }
0x154c   :  { %v5891_v11 = vpop.eup %5890 }
0x154d   :  { %v2944_v28 = vmul.f32 %v5891_v11, %v5883_v58  ;;  %v2948_v40 = vpack.c.bf16 %v2946_v39, %v2945_v63  ;;  %v3015_v47 = vpop.permute.xlu1 %3014 }
0x154f   :  { %v2947_v5 = vpack.c.bf16 %v2944_v28, %v2943_v43 }
0x1551   :  { %5243 = vmatprep.mubr.msk.bf16.mxu0 %vm1141_vm0, %v2947_v5 }
0x1552   :  { %5244 = vmatmul.mubr.msk.bf16.vlgmr.msra.gmra.mrb[52].mxu0 %vm1141_vm0, %v2948_v40 }
0x1553   :  { %5248 = vmatpush3.bf16.xpose.msra.mxu0 %v3027_v23  ;;  %5251 = vmatprep.mubr.msk.bf16.mxu0 %vm1141_vm0, %v3013_v24 }
0x1554   :  { %5428 = vmatprep.subr.msk.bf16.mxu0 %vm1141_vm0, %v3019_v0 }
0x155b   :  { %5250 = vmatpush3.bf16.xpose.msra.mxu0 %v3030_v30 }
0x1562   :  { %5252 = vmatmul.mubr.msk.bf16.vlgmr.msra.gmra.mrb[56].mxu0 %vm1141_vm0, %v3015_v47 }
0x1625   :  { %v6734_v16 = vpop.f32.mrb[52].mxu0 }
0x1626   :  { %v6736_v58 = vpop.f32.mrb[53].mxu0 }
0x1627   :  { %v6738_v25 = vpop.f32.mrb[54].mxu0 }
0x1628   :  { %v6742_v53 = vpop.f32.mrb[55].mxu0 }
0x1635   :  { %v5253_v50 = vpop.f32.mrb[56].mxu0 }
0x1636   :  { %v3066_v11 = vpop.f32.mrb[57].mxu0  ;;  %v3075_v63 = vadd.f32 %v5253_v50, %v6310_v9 }
0x1637   :  { %v3067_v39 = vadd.f32 %v3066_v11, %v6312_v10  ;;  %v5254_v43 = vpop.f32.mrb[58].mxu0 }
0x1638   :  { %v3069_v28 = vpop.f32.mrb[59].mxu0  ;;  %v3078_v23 = vadd.f32 %v5254_v43, %v6314_v15  ;;  %v3087_v0 = vsel %vm1141_vm0, %v3075_v63, -inf }
0x1639   :  { %v3070_v5 = vadd.f32 %v3069_v28, %v6317_v19  ;;  %v3081_v40 = vsel %vm1141_vm0, %v3067_v39, -inf }
0x163a   :  { %3082 = vmax.xlane.f32.xlu0 %v3081_v40  ;;  %v3090_v30 = vsel %vm1141_vm0, %v3078_v23, -inf }
0x163b   :  { %v3084_v24 = vsel %vm1141_vm0, %v3070_v5, -inf }
0x163c   :  { %3085 = vmax.xlane.f32.xlu1 %v3084_v24 }
0x163e   :  { %3088 = vmax.xlane.f32.xlu0 %v3087_v0 }
0x1642   :  { %3091 = vmax.xlane.f32.xlu0 %v3090_v30 }
0x164d   :  { %3129 = vrot.lane.b32.xlu1 %v6280_v29, %s6090_s25 }
0x16c7   :  { %v3083_v47 = vpop.xlane.xlu0 %3082 }
0x16c8   :  { %v3093_v50 = vsub.f32 %v3067_v39, %v3083_v47 }
0x16c9   :  { %v3086_v11 = vpop.xlane.xlu1 %3085 }
0x16ca   :  { %v3097_v40 = vmul.f32 1.442695, %v3093_v50  ;;  %v3094_v6 = vsub.f32 %v3070_v5, %v3086_v11 }
0x16cb   :  { %v3089_v28 = vpop.xlane.xlu0 %3088 }
0x16cc   :  { %v3095_v13 = vsub.f32 %v3075_v63, %v3089_v28  ;;  %v3099_v61 = vmul.f32 1.442695, %v3094_v6 }
0x16ce   :  { %v3101_v54 = vmul.f32 1.442695, %v3095_v13 }
0x16cf   :  { %v3092_v24 = vpop.xlane.xlu0 %3091 }
0x16d0   :  { %5892 = vpow2.f32 %v3101_v54  ;;  %v3096_v43 = vsub.f32 %v3078_v23, %v3092_v24 }
0x16d1   :  { %5894 = vpow2.f32 %v3097_v40 }
0x16d2   :  { %v3103_v0 = vmul.f32 1.442695, %v3096_v43 }
0x16d4   :  { %5896 = vpow2.f32 %v3103_v0 }
0x16d5   :  { %5898 = vpow2.f32 %v3099_v61  ;;  %v3130_v61 = vpop.permute.xlu1 %3129 }
0x16da   :  { %v5893_v30 = vpop.eup %5892 }
0x16db   :  { %v3111_v17 = vsel %vm1141_vm0, %v5893_v30, 0.0  ;;  %v5895_v31 = vpop.eup %5894 }
0x16dc   :  { %3112 = vadd.xlane.f32.xlu0 %v3111_v17  ;;  %v3105_v47 = vsel %vm1141_vm0, %v5895_v31, 0.0 }
0x16de   :  { %v5897_v39 = vpop.eup %5896 }
0x16df   :  { %v3114_v63 = vsel %vm1141_vm0, %v5897_v39, 0.0  ;;  %v5899_v5 = vpop.eup %5898 }
0x16e0   :  { %3106 = vadd.xlane.f32.xlu0 %v3105_v47  ;;  %3115 = vadd.xlane.f32.xlu1 %v3114_v63  ;;  %v3108_v54 = vsel %vm1141_vm0, %v5899_v5, 0.0 }
0x16e4   :  { %3109 = vadd.xlane.f32.xlu1 %v3108_v54 }
0x16f5   :  { %3192 = vrot.lane.b32.xlu1 %v6272_v18, %s6091_s26 }
0x16f6   :  { %3127 = vrot.lane.b32.xlu0 %v6282_v32, %s6090_s25 }
0x16f9   :  { %3194 = vrot.lane.b32.xlu1 %v6286_v37, %s6091_s26 }
0x16fa   :  { %3188 = vrot.lane.b32.xlu0 %v6270_v14, %s6091_s26 }
0x16fd   :  { %3190 = vrot.lane.b32.xlu1 %v6284_v1, %s6091_s26 }
0x1769   :  { %v3113_v17 = vpop.xlane.xlu0 %3112 }
0x176d   :  { %v3116_v13 = vpop.xlane.xlu1 %3115  ;;  %v3107_v6 = vpop.xlane.xlu0 %3106 }
0x176e   :  { %5900 = vrcp.f32 %v3116_v13 }
0x176f   :  { %5902 = vrcp.f32 %v3107_v6 }
0x1770   :  { %5904 = vrcp.f32 %v3113_v17 }
0x1771   :  { %v3110_v18 = vpop.xlane.xlu1 %3109  ;;  %v3128_v23 = vpop.permute.xlu0 %3127 }
0x1772   :  { %5906 = vrcp.f32 %v3110_v18  ;;  %5255 = vmatprep.subr.bf16.mxu1 %v3128_v23 }
0x1773   :  { %5256 = vmatpush3.bf16.msra.mxu1 %v3128_v23 }
0x1774   :  { %5257 = vmatprep.subr.bf16.mxu1 %v3130_v61 }
0x1775   :  { %v3193_v37 = vpop.permute.xlu1 %3192  ;;  %v3189_v54 = vpop.permute.xlu0 %3188 }
0x1776   :  { %v3203_v63 = vsel %vm1141_vm0, %v3193_v37, 0 }
0x1777   :  { %5258 = vmatpush3.bf16.msra.mxu1 %v3130_v61 }
0x1778   :  { %5429 = vmatprep.subr.msk.bf16.mxu1 %vm1141_vm0, %v3193_v37  ;;  %v5901_v14 = vpop.eup %5900 }
0x1779   :  { %v5903_v50 = vpop.eup %5902  ;;  %v3124_v28 = vmul.f32 %v5901_v14, %v5897_v39  ;;  %v3195_v61 = vpop.permute.xlu1 %3194 }
0x177a   :  { %v5905_v1 = vpop.eup %5904  ;;  %v3121_v40 = vmul.f32 %v5903_v50, %v5895_v31  ;;  %v3206_v39 = vsel %vm1141_vm0, %v3195_v61, 0 }
0x177b   :  { %v3123_v43 = vmul.f32 %v5905_v1, %v5893_v30 }
0x177c   :  { %v5907_v11 = vpop.eup %5906 }
0x177d   :  { %v3122_v24 = vmul.f32 %v5907_v11, %v5899_v5  ;;  %v3126_v47 = vpack.c.bf16 %v3124_v28, %v3123_v43  ;;  %v3191_v31 = vpop.permute.xlu1 %3190 }
0x177f   :  { %v3125_v0 = vpack.c.bf16 %v3122_v24, %v3121_v40 }
0x1781   :  { %5259 = vmatprep.mubr.msk.bf16.mxu1 %vm1141_vm0, %v3125_v0 }
0x1782   :  { %5260 = vmatmul.mubr.msk.bf16.vlgmr.msra.gmra.mrb[104].mxu1 %vm1141_vm0, %v3126_v47 }
0x1783   :  { %5264 = vmatpush3.bf16.xpose.msra.mxu1 %v3203_v63  ;;  %5267 = vmatprep.mubr.msk.bf16.mxu1 %vm1141_vm0, %v3189_v54 }
0x1784   :  { %5430 = vmatprep.subr.msk.bf16.mxu1 %vm1141_vm0, %v3195_v61 }
0x178b   :  { %5266 = vmatpush3.bf16.xpose.msra.mxu1 %v3206_v39 }
0x178c   :  { %5287 = vmatprep.subr.bf16.mxu1 %v6294_v41 }
0x1792   :  { %5268 = vmatmul.mubr.msk.bf16.vlgmr.msra.gmra.mrb[108].mxu1 %vm1141_vm0, %v3191_v31 }
0x1793   :  { %5288 = vmatpush3.bf16.msra.mxu1 %v6294_v41 }
0x1794   :  { %5289 = vmatprep.subr.bf16.mxu1 %v6292_v49 }
0x1797   :  { %5290 = vmatpush3.bf16.msra.mxu1 %v6292_v49 }
0x1855   :  { %v6782_v30 = vpop.f32.mrb[104].mxu1 }
0x1856   :  { %v6784_v5 = vpop.f32.mrb[105].mxu1 }
0x1857   :  { %v6786_v17 = vpop.f32.mrb[106].mxu1 }
0x1858   :  { %v6790_v6 = vpop.f32.mrb[107].mxu1 }
0x1865   :  { %v5269_v23 = vpop.f32.mrb[108].mxu1 }
0x1866   :  { %v3242_v37 = vpop.f32.mrb[109].mxu1  ;;  %v3251_v11 = vadd.f32 %v5269_v23, %v6310_v9 }
0x1867   :  { %v3243_v14 = vadd.f32 %v3242_v37, %v6312_v10  ;;  %v5270_v50 = vpop.f32.mrb[110].mxu1 }
0x1868   :  { %v3245_v1 = vpop.f32.mrb[111].mxu1  ;;  %v3254_v43 = vadd.f32 %v5270_v50, %v6314_v15  ;;  %v3263_v0 = vsel %vm1141_vm0, %v3251_v11, -inf }
0x1869   :  { %v3246_v28 = vadd.f32 %v3245_v1, %v6317_v19  ;;  %v3257_v40 = vsel %vm1141_vm0, %v3243_v14, -inf }
0x186a   :  { %3258 = vmax.xlane.f32.xlu0 %v3257_v40  ;;  %v3266_v47 = vsel %vm1141_vm0, %v3254_v43, -inf }
0x186b   :  { %v3260_v24 = vsel %vm1141_vm0, %v3246_v28, -inf }
0x186c   :  { %3261 = vmax.xlane.f32.xlu1 %v3260_v24 }
0x186e   :  { %3264 = vmax.xlane.f32.xlu0 %v3263_v0 }
0x1872   :  { %3267 = vmax.xlane.f32.xlu0 %v3266_v47 }
0x18f7   :  { %v3259_v63 = vpop.xlane.xlu0 %3258 }
0x18f8   :  { %v3269_v54 = vsub.f32 %v3243_v14, %v3259_v63 }
0x18f9   :  { %v3262_v61 = vpop.xlane.xlu1 %3261 }
0x18fa   :  { %v3273_v23 = vmul.f32 1.442695, %v3269_v54  ;;  %v3270_v37 = vsub.f32 %v3246_v28, %v3262_v61 }
0x18fb   :  { %v3265_v39 = vpop.xlane.xlu0 %3264 }
0x18fc   :  { %v3271_v31 = vsub.f32 %v3251_v11, %v3265_v39  ;;  %v3275_v24 = vmul.f32 1.442695, %v3270_v37 }
0x18fe   :  { %v3277_v1 = vmul.f32 1.442695, %v3271_v31 }
0x18ff   :  { %v3268_v40 = vpop.xlane.xlu0 %3267 }
0x1900   :  { %5908 = vpow2.f32 %v3277_v1  ;;  %v3272_v13 = vsub.f32 %v3254_v43, %v3268_v40 }
0x1901   :  { %5910 = vpow2.f32 %v3273_v23 }
0x1902   :  { %v3279_v50 = vmul.f32 1.442695, %v3272_v13 }
0x1904   :  { %5912 = vpow2.f32 %v3279_v50 }
0x1905   :  { %5914 = vpow2.f32 %v3275_v24 }
0x190a   :  { %v5909_v0 = vpop.eup %5908 }
0x190b   :  { %v3287_v18 = vsel %vm1141_vm0, %v5909_v0, 0.0  ;;  %v5911_v47 = vpop.eup %5910 }
0x190c   :  { %3288 = vadd.xlane.f32.xlu0 %v3287_v18  ;;  %v3281_v63 = vsel %vm1141_vm0, %v5911_v47, 0.0 }
0x190e   :  { %v5913_v14 = vpop.eup %5912 }
0x190f   :  { %v3290_v11 = vsel %vm1141_vm0, %v5913_v14, 0.0  ;;  %v5915_v28 = vpop.eup %5914 }
0x1910   :  { %3282 = vadd.xlane.f32.xlu0 %v3281_v63  ;;  %3291 = vadd.xlane.f32.xlu1 %v3290_v11  ;;  %v3284_v43 = vsel %vm1141_vm0, %v5915_v28, 0.0 }
0x1914   :  { %3285 = vadd.xlane.f32.xlu1 %v3284_v43  ;;  %v3437_v43 = vsel %vm1141_vm0, %v6298_v27, 0 }
0x1925   :  { %3305 = vrot.lane.b32.xlu1 %v6280_v29, %s6091_s26 }
0x1926   :  { %3303 = vrot.lane.b32.xlu0 %v6282_v32, %s6091_s26 }
0x1999   :  { %v3289_v13 = vpop.xlane.xlu0 %3288 }
0x199d   :  { %v3292_v54 = vpop.xlane.xlu1 %3291  ;;  %v3283_v18 = vpop.xlane.xlu0 %3282 }
0x199e   :  { %5916 = vrcp.f32 %v3292_v54 }
0x199f   :  { %5918 = vrcp.f32 %v3283_v18 }
0x19a0   :  { %5920 = vrcp.f32 %v3289_v13 }
0x19a1   :  { %v3286_v61 = vpop.xlane.xlu1 %3285  ;;  %v3304_v39 = vpop.permute.xlu0 %3303 }
0x19a2   :  { %5922 = vrcp.f32 %v3286_v61  ;;  %5271 = vmatprep.subr.bf16.mxu0 %v3304_v39 }
0x19a3   :  { %5272 = vmatpush3.bf16.msra.mxu0 %v3304_v39 }
0x19a5   :  { %v3306_v31 = vpop.permute.xlu1 %3305 }
0x19a6   :  { %5273 = vmatprep.subr.bf16.mxu0 %v3306_v31 }
0x19a7   :  { %5274 = vmatpush3.bf16.msra.mxu0 %v3306_v31 }
0x19a8   :  { %5431 = vmatprep.subr.msk.bf16.mxu0 %vm1141_vm0, %v6298_v27  ;;  %v5917_v29 = vpop.eup %5916 }
0x19a9   :  { %v5919_v23 = vpop.eup %5918  ;;  %v3300_v1 = vmul.f32 %v5917_v29, %v5913_v14 }
0x19aa   :  { %v5921_v32 = vpop.eup %5920  ;;  %v3297_v40 = vmul.f32 %v5919_v23, %v5911_v47  ;;  %v3440_v47 = vsel %vm1141_vm0, %v6302_v38, 0 }
0x19ab   :  { %v3299_v50 = vmul.f32 %v5921_v32, %v5909_v0 }
0x19ac   :  { %v5923_v37 = vpop.eup %5922 }
0x19ad   :  { %v3298_v24 = vmul.f32 %v5923_v37, %v5915_v28  ;;  %v3302_v11 = vpack.c.bf16 %v3300_v1, %v3299_v50 }
0x19af   :  { %v3301_v63 = vpack.c.bf16 %v3298_v24, %v3297_v40 }
0x19b1   :  { %5275 = vmatprep.mubr.msk.bf16.mxu0 %vm1141_vm0, %v3301_v63 }
0x19b2   :  { %5276 = vmatmul.mubr.msk.bf16.vlgmr.msra.gmra.mrb[60].mxu0 %vm1141_vm0, %v3302_v11 }
0x19b3   :  { %5280 = vmatpush3.bf16.xpose.msra.mxu0 %v3437_v43  ;;  %5283 = vmatprep.mubr.msk.bf16.mxu0 %vm1141_vm0, %v6296_v35 }
0x19b4   :  { %5432 = vmatprep.subr.msk.bf16.mxu0 %vm1141_vm0, %v6302_v38 }
0x19bb   :  { %5282 = vmatpush3.bf16.xpose.msra.mxu0 %v3440_v47 }
0x19c2   :  { %5284 = vmatmul.mubr.msk.bf16.vlgmr.msra.gmra.mrb[64].mxu0 %vm1141_vm0, %v6300_v44 }
0x1a85   :  { %v6824_v0 = vpop.f32.mrb[60].mxu0 }
0x1a86   :  { %7267 = vst [vmem:[#allocation25_spill] sm:$0xff] %v6824_v0  ;;  %v6826_v14 = vpop.f32.mrb[61].mxu0 }
0x1a87   :  { %v6828_v28 = vpop.f32.mrb[62].mxu0 }
0x1a88   :  { %7268 = vst [vmem:[#allocation26_spill] sm:$0xff] %v6828_v28  ;;  %v6832_v54 = vpop.f32.mrb[63].mxu0 }
0x1a95   :  { %v5285_v61 = vpop.f32.mrb[64].mxu0 }
0x1a96   :  { %v3476_v39 = vpop.f32.mrb[65].mxu0  ;;  %v3485_v40 = vadd.f32 %v5285_v61, %v6310_v9 }
0x1a97   :  { %v3477_v31 = vadd.f32 %v3476_v39, %v6312_v10  ;;  %v5286_v29 = vpop.f32.mrb[66].mxu0 }
0x1a98   :  { %v3479_v23 = vpop.f32.mrb[67].mxu0  ;;  %v3488_v32 = vadd.f32 %v5286_v29, %v6314_v15  ;;  %v3497_v63 = vsel %vm1141_vm0, %v3485_v40, -inf }
0x1a99   :  { %v3480_v37 = vadd.f32 %v3479_v23, %v6317_v19  ;;  %v3491_v1 = vsel %vm1141_vm0, %v3477_v31, -inf }
0x1a9a   :  { %3492 = vmax.xlane.f32.xlu1 %v3491_v1  ;;  %v3500_v50 = vsel %vm1141_vm0, %v3488_v32, -inf }
0x1a9b   :  { %v3494_v24 = vsel %vm1141_vm0, %v3480_v37, -inf }
0x1a9c   :  { %3495 = vmax.xlane.f32.xlu0 %v3494_v24 }
0x1a9e   :  { %3501 = vmax.xlane.f32.xlu1 %v3500_v50 }
0x1aa0   :  { %3498 = vmax.xlane.f32.xlu0 %v3497_v63 }
0x1b27   :  { %v3493_v11 = vpop.xlane.xlu1 %3492 }
0x1b28   :  { %v3503_v29 = vsub.f32 %v3477_v31, %v3493_v11 }
0x1b29   :  { %v3496_v43 = vpop.xlane.xlu0 %3495 }
0x1b2a   :  { %v3504_v47 = vsub.f32 %v3480_v37, %v3496_v43  ;;  %v3507_v2 = vmul.f32 1.442695, %v3503_v29 }
0x1b2b   :  { %v3502_v39 = vpop.xlane.xlu1 %3501 }
0x1b2c   :  { %v3509_v23 = vmul.f32 1.442695, %v3504_v47  ;;  %v3506_v13 = vsub.f32 %v3488_v32, %v3502_v39 }
0x1b2d   :  { %v3499_v18 = vpop.xlane.xlu0 %3498 }
0x1b2e   :  { %5924 = vpow2.f32 %v3509_v23  ;;  %v3513_v1 = vmul.f32 1.442695, %v3506_v13  ;;  %v3505_v61 = vsub.f32 %v3485_v40, %v3499_v18 }
0x1b30   :  { %5926 = vpow2.f32 %v3513_v1  ;;  %v3511_v24 = vmul.f32 1.442695, %v3505_v61 }
0x1b32   :  { %5928 = vpow2.f32 %v3511_v24 }
0x1b33   :  { %5930 = vpow2.f32 %v3507_v2 }
0x1b38   :  { %v5925_v50 = vpop.eup %5924 }
0x1b39   :  { %v3518_v0 = vsel %vm1141_vm0, %v5925_v50, 0.0 }
0x1b3a   :  { %v5927_v63 = vpop.eup %5926  ;;  %3519 = vadd.xlane.f32.xlu1 %v3518_v0 }
0x1b3b   :  { %v3524_v31 = vsel %vm1141_vm0, %v5927_v63, 0.0 }
0x1b3c   :  { %v5929_v28 = vpop.eup %5928 }
0x1b3d   :  { %v3521_v37 = vsel %vm1141_vm0, %v5929_v28, 0.0  ;;  %v5931_v32 = vpop.eup %5930 }
0x1b3e   :  { %3522 = vadd.xlane.f32.xlu0 %v3521_v37  ;;  %3525 = vadd.xlane.f32.xlu1 %v3524_v31  ;;  %v3515_v13 = vsel %vm1141_vm0, %v5931_v32, 0.0 }
0x1b42   :  { %3516 = vadd.xlane.f32.xlu0 %v3515_v13 }
0x1b4f   :  { %3602 = vrot.lane.b32.xlu1 %v6302_v38, %s6089_s2 }
0x1b53   :  { %3594 = vrot.lane.b32.xlu1 %v6296_v35, %s6089_s2 }
0x1b57   :  { %3596 = vrot.lane.b32.xlu1 %v6300_v44, %s6089_s2 }
0x1b58   :  { %3600 = vrot.lane.b32.xlu0 %v6298_v27, %s6089_s2 }
0x1bc7   :  { %v3520_v2 = vpop.xlane.xlu1 %3519 }
0x1bcb   :  { %v3523_v0 = vpop.xlane.xlu0 %3522  ;;  %v3526_v18 = vpop.xlane.xlu1 %3525 }
0x1bcc   :  { %5932 = vrcp.f32 %v3523_v0 }
0x1bcd   :  { %5934 = vrcp.f32 %v3526_v18 }
0x1bce   :  { %5936 = vrcp.f32 %v3520_v2 }
0x1bcf   :  { %v3517_v40 = vpop.xlane.xlu0 %3516  ;;  %v3603_v61 = vpop.permute.xlu1 %3602 }
0x1bd0   :  { %5938 = vrcp.f32 %v3517_v40 }
0x1bd3   :  { %v3601_v11 = vpop.permute.xlu0 %3600  ;;  %v3595_v0 = vpop.permute.xlu1 %3594 }
0x1bd4   :  { %5433 = vmatprep.subr.msk.bf16.mxu1 %vm1141_vm0, %v3601_v11  ;;  %v3611_v2 = vsel %vm1141_vm0, %v3601_v11, 0 }
0x1bd6   :  { %v5933_v43 = vpop.eup %5932 }
0x1bd7   :  { %v5935_v47 = vpop.eup %5934  ;;  %v3533_v23 = vmul.f32 %v5933_v43, %v5929_v28  ;;  %v3614_v28 = vsel %vm1141_vm0, %v3603_v61, 0 }
0x1bd8   :  { %v5937_v39 = vpop.eup %5936  ;;  %v3534_v1 = vmul.f32 %v5935_v47, %v5927_v63  ;;  %v3597_v63 = vpop.permute.xlu1 %3596 }
0x1bd9   :  { %v3532_v37 = vmul.f32 %v5937_v39, %v5925_v50 }
0x1bda   :  { %v5939_v29 = vpop.eup %5938  ;;  %v3536_v13 = vpack.c.bf16 %v3534_v1, %v3533_v23 }
0x1bdb   :  { %v3531_v24 = vmul.f32 %v5939_v29, %v5931_v32 }
0x1bdd   :  { %v3535_v31 = vpack.c.bf16 %v3532_v37, %v3531_v24 }
0x1bdf   :  { %5291 = vmatprep.mubr.msk.bf16.mxu1 %vm1141_vm0, %v3535_v31 }
0x1be0   :  { %5292 = vmatmul.mubr.msk.bf16.vlgmr.msra.gmra.mrb[112].mxu1 %vm1141_vm0, %v3536_v13 }
0x1be1   :  { %5296 = vmatpush3.bf16.xpose.msra.mxu1 %v3611_v2  ;;  %5299 = vmatprep.mubr.msk.bf16.mxu1 %vm1141_vm0, %v3595_v0 }
0x1be2   :  { %5434 = vmatprep.subr.msk.bf16.mxu1 %vm1141_vm0, %v3603_v61 }
0x1be9   :  { %5298 = vmatpush3.bf16.xpose.msra.mxu1 %v3614_v28 }
0x1bf0   :  { %5300 = vmatmul.mubr.msk.bf16.vlgmr.msra.gmra.mrb[116].mxu1 %vm1141_vm0, %v3597_v63 }
0x1cb3   :  { %v6864_v50 = vpop.f32.mrb[112].mxu1 }
0x1cb4   :  { %7269 = vst [vmem:[#allocation27_spill] sm:$0xff] %v6864_v50  ;;  %v6866_v32 = vpop.f32.mrb[113].mxu1 }
0x1cb5   :  { %7270 = vst [vmem:[#allocation28_spill] sm:$0xff] %v6866_v32  ;;  %v6868_v18 = vpop.f32.mrb[114].mxu1 }
0x1cb6   :  { %7271 = vst [vmem:[#allocation29_spill] sm:$0xff] %v6868_v18  ;;  %v6870_v40 = vpop.f32.mrb[115].mxu1 }
0x1cb7   :  { %7272 = vst [vmem:[#allocation30_spill] sm:$0xff] %v6870_v40 }
0x1cc3   :  { %v5301_v11 = vpop.f32.mrb[116].mxu1 }
0x1cc4   :  { %v3650_v43 = vpop.f32.mrb[117].mxu1  ;;  %v3659_v23 = vadd.f32 %v5301_v11, %v6310_v9 }
0x1cc5   :  { %v3651_v47 = vadd.f32 %v3650_v43, %v6312_v10  ;;  %v5302_v39 = vpop.f32.mrb[118].mxu1 }
0x1cc6   :  { %v3653_v29 = vpop.f32.mrb[119].mxu1  ;;  %v3662_v37 = vadd.f32 %v5302_v39, %v6314_v15  ;;  %v3671_v31 = vsel %vm1141_vm0, %v3659_v23, -inf }
0x1cc7   :  { %v3654_v1 = vadd.f32 %v3653_v29, %v6317_v19  ;;  %v3665_v61 = vsel %vm1141_vm0, %v3651_v47, -inf }
0x1cc8   :  { %3666 = vmax.xlane.f32.xlu0 %v3665_v61  ;;  %v3674_v13 = vsel %vm1141_vm0, %v3662_v37, -inf }
0x1cc9   :  { %v3668_v24 = vsel %vm1141_vm0, %v3654_v1, -inf }
0x1cca   :  { %3669 = vmax.xlane.f32.xlu1 %v3668_v24 }
0x1ccc   :  { %3672 = vmax.xlane.f32.xlu0 %v3671_v31 }
0x1cd0   :  { %3675 = vmax.xlane.f32.xlu0 %v3674_v13 }
0x1cdb   :  { %3715 = vrot.lane.b32.xlu1 %v6292_v49, %s6089_s2 }
0x1d55   :  { %v3667_v2 = vpop.xlane.xlu0 %3666 }
0x1d56   :  { %v3677_v0 = vsub.f32 %v3651_v47, %v3667_v2 }
0x1d57   :  { %v3670_v28 = vpop.xlane.xlu1 %3669 }
0x1d58   :  { %v3681_v43 = vmul.f32 1.442695, %v3677_v0  ;;  %v3678_v29 = vsub.f32 %v3654_v1, %v3670_v28 }
0x1d59   :  { %v3673_v63 = vpop.xlane.xlu0 %3672 }
0x1d5a   :  { %v3679_v11 = vsub.f32 %v3659_v23, %v3673_v63  ;;  %v3683_v50 = vmul.f32 1.442695, %v3678_v29 }
0x1d5c   :  { %v3685_v61 = vmul.f32 1.442695, %v3679_v11 }
0x1d5d   :  { %v3676_v24 = vpop.xlane.xlu0 %3675 }
0x1d5e   :  { %5940 = vpow2.f32 %v3685_v61  ;;  %v3680_v39 = vsub.f32 %v3662_v37, %v3676_v24 }
0x1d5f   :  { %5942 = vpow2.f32 %v3681_v43 }
0x1d60   :  { %v3687_v31 = vmul.f32 1.442695, %v3680_v39 }
0x1d62   :  { %5944 = vpow2.f32 %v3687_v31 }
0x1d63   :  { %5946 = vpow2.f32 %v3683_v50  ;;  %v3716_v50 = vpop.permute.xlu1 %3715 }
0x1d68   :  { %v5941_v13 = vpop.eup %5940 }
0x1d69   :  { %v3695_v18 = vsel %vm1141_vm0, %v5941_v13, 0.0  ;;  %v5943_v32 = vpop.eup %5942 }
0x1d6a   :  { %3696 = vadd.xlane.f32.xlu0 %v3695_v18  ;;  %v3689_v2 = vsel %vm1141_vm0, %v5943_v32, 0.0 }
0x1d6c   :  { %v5945_v47 = vpop.eup %5944 }
0x1d6d   :  { %v3698_v23 = vsel %vm1141_vm0, %v5945_v47, 0.0  ;;  %v5947_v1 = vpop.eup %5946 }
0x1d6e   :  { %3690 = vadd.xlane.f32.xlu0 %v3689_v2  ;;  %3699 = vadd.xlane.f32.xlu1 %v3698_v23  ;;  %v3692_v37 = vsel %vm1141_vm0, %v5947_v1, 0.0 }
0x1d72   :  { %3693 = vadd.xlane.f32.xlu1 %v3692_v37 }
0x1d83   :  { %3778 = vrot.lane.b32.xlu1 %v6298_v27, %s6090_s25 }
0x1d84   :  { %3713 = vrot.lane.b32.xlu0 %v6294_v41, %s6089_s2 }
0x1d87   :  { %3780 = vrot.lane.b32.xlu1 %v6302_v38, %s6090_s25 }
0x1d88   :  { %3774 = vrot.lane.b32.xlu0 %v6296_v35, %s6090_s25 }
0x1d8b   :  { %3776 = vrot.lane.b32.xlu1 %v6300_v44, %s6090_s25 }
0x1df7   :  { %v3697_v18 = vpop.xlane.xlu0 %3696 }
0x1dfb   :  { %v3700_v0 = vpop.xlane.xlu1 %3699  ;;  %v3691_v28 = vpop.xlane.xlu0 %3690 }
0x1dfc   :  { %5948 = vrcp.f32 %v3700_v0 }
0x1dfd   :  { %5950 = vrcp.f32 %v3691_v28 }
0x1dfe   :  { %5952 = vrcp.f32 %v3697_v18 }
0x1dff   :  { %v3694_v63 = vpop.xlane.xlu1 %3693  ;;  %v3714_v11 = vpop.permute.xlu0 %3713 }
0x1e00   :  { %5954 = vrcp.f32 %v3694_v63  ;;  %5303 = vmatprep.subr.bf16.mxu0 %v3714_v11 }
0x1e01   :  { %5304 = vmatpush3.bf16.msra.mxu0 %v3714_v11 }
0x1e02   :  { %5305 = vmatprep.subr.bf16.mxu0 %v3716_v50 }
0x1e03   :  { %v3779_v43 = vpop.permute.xlu1 %3778  ;;  %v3775_v63 = vpop.permute.xlu0 %3774 }
0x1e04   :  { %v3789_v28 = vsel %vm1141_vm0, %v3779_v43, 0 }
0x1e05   :  { %5306 = vmatpush3.bf16.msra.mxu0 %v3716_v50 }
0x1e06   :  { %5435 = vmatprep.subr.msk.bf16.mxu0 %vm1141_vm0, %v3779_v43  ;;  %v5949_v29 = vpop.eup %5948 }
0x1e07   :  { %v5951_v61 = vpop.eup %5950  ;;  %v3708_v31 = vmul.f32 %v5949_v29, %v5945_v47  ;;  %v3781_v50 = vpop.permute.xlu1 %3780 }
0x1e08   :  { %v5953_v24 = vpop.eup %5952  ;;  %v3705_v2 = vmul.f32 %v5951_v61, %v5943_v32  ;;  %v3792_v47 = vsel %vm1141_vm0, %v3781_v50, 0 }
0x1e09   :  { %v3707_v37 = vmul.f32 %v5953_v24, %v5941_v13 }
0x1e0a   :  { %v5955_v39 = vpop.eup %5954 }
0x1e0b   :  { %v3706_v23 = vmul.f32 %v5955_v39, %v5947_v1  ;;  %v3710_v18 = vpack.c.bf16 %v3708_v31, %v3707_v37  ;;  %v3777_v32 = vpop.permute.xlu1 %3776 }
0x1e0d   :  { %v3709_v0 = vpack.c.bf16 %v3706_v23, %v3705_v2 }
0x1e0f   :  { %5307 = vmatprep.mubr.msk.bf16.mxu0 %vm1141_vm0, %v3709_v0 }
0x1e10   :  { %5308 = vmatmul.mubr.msk.bf16.vlgmr.msra.gmra.mrb[68].mxu0 %vm1141_vm0, %v3710_v18 }
0x1e11   :  { %5312 = vmatpush3.bf16.xpose.msra.mxu0 %v3789_v28  ;;  %5315 = vmatprep.mubr.msk.bf16.mxu0 %vm1141_vm0, %v3775_v63 }
0x1e12   :  { %5436 = vmatprep.subr.msk.bf16.mxu0 %vm1141_vm0, %v3781_v50 }
0x1e19   :  { %5314 = vmatpush3.bf16.xpose.msra.mxu0 %v3792_v47 }
0x1e20   :  { %5316 = vmatmul.mubr.msk.bf16.vlgmr.msra.gmra.mrb[72].mxu0 %vm1141_vm0, %v3777_v32 }
0x1ee3   :  { %v6904_v13 = vpop.f32.mrb[68].mxu0 }
0x1ee4   :  { %7273 = vst [vmem:[#allocation31_spill] sm:$0xff] %v6904_v13  ;;  %v6906_v1 = vpop.f32.mrb[69].mxu0 }
0x1ee5   :  { %7274 = vst [vmem:[#allocation32_spill] sm:$0xff] %v6906_v1  ;;  %v6908_v11 = vpop.f32.mrb[70].mxu0 }
0x1ee6   :  { %7275 = vst [vmem:[#allocation33_spill] sm:$0xff] %v6908_v11  ;;  %v6912_v29 = vpop.f32.mrb[71].mxu0 }
0x1ef3   :  { %v5317_v24 = vpop.f32.mrb[72].mxu0 }
0x1ef4   :  { %v3828_v39 = vpop.f32.mrb[73].mxu0  ;;  %v3837_v37 = vadd.f32 %v5317_v24, %v6310_v9 }
0x1ef5   :  { %v3829_v31 = vadd.f32 %v3828_v39, %v6312_v10  ;;  %v5318_v2 = vpop.f32.mrb[74].mxu0 }
0x1ef6   :  { %v3831_v23 = vpop.f32.mrb[75].mxu0  ;;  %v3840_v63 = vadd.f32 %v5318_v2, %v6314_v15  ;;  %v3849_v50 = vsel %vm1141_vm0, %v3837_v37, -inf }
0x1ef7   :  { %v3832_v0 = vadd.f32 %v3831_v23, %v6317_v19  ;;  %v3843_v18 = vsel %vm1141_vm0, %v3829_v31, -inf }
0x1ef8   :  { %3844 = vmax.xlane.f32.xlu0 %v3843_v18  ;;  %v3852_v47 = vsel %vm1141_vm0, %v3840_v63, -inf }
0x1ef9   :  { %v3846_v28 = vsel %vm1141_vm0, %v3832_v0, -inf }
0x1efa   :  { %3847 = vmax.xlane.f32.xlu1 %v3846_v28 }
0x1efc   :  { %3850 = vmax.xlane.f32.xlu0 %v3849_v50 }
0x1f00   :  { %3853 = vmax.xlane.f32.xlu0 %v3852_v47 }
0x1f0b   :  { %3891 = vrot.lane.b32.xlu1 %v6292_v49, %s6090_s25 }
0x1f85   :  { %v3845_v32 = vpop.xlane.xlu0 %3844 }
0x1f86   :  { %v3855_v24 = vsub.f32 %v3829_v31, %v3845_v32 }
0x1f87   :  { %v3848_v39 = vpop.xlane.xlu1 %3847 }
0x1f88   :  { %v3859_v18 = vmul.f32 1.442695, %v3855_v24  ;;  %v3856_v61 = vsub.f32 %v3832_v0, %v3848_v39 }
0x1f89   :  { %v3851_v23 = vpop.xlane.xlu0 %3850 }
0x1f8a   :  { %v3857_v43 = vsub.f32 %v3837_v37, %v3851_v23  ;;  %v3861_v13 = vmul.f32 1.442695, %v3856_v61 }
0x1f8c   :  { %v3863_v40 = vmul.f32 1.442695, %v3857_v43 }
0x1f8d   :  { %v3854_v28 = vpop.xlane.xlu0 %3853 }
0x1f8e   :  { %5956 = vpow2.f32 %v3863_v40  ;;  %v3858_v2 = vsub.f32 %v3840_v63, %v3854_v28 }
0x1f8f   :  { %5958 = vpow2.f32 %v3859_v18 }
0x1f90   :  { %v3865_v50 = vmul.f32 1.442695, %v3858_v2 }
0x1f92   :  { %5960 = vpow2.f32 %v3865_v50 }
0x1f93   :  { %5962 = vpow2.f32 %v3861_v13  ;;  %v3892_v13 = vpop.permute.xlu1 %3891 }
0x1f98   :  { %v5957_v47 = vpop.eup %5956 }
0x1f99   :  { %v3873_v11 = vsel %vm1141_vm0, %v5957_v47, 0.0  ;;  %v5959_v1 = vpop.eup %5958 }
0x1f9a   :  { %3874 = vadd.xlane.f32.xlu0 %v3873_v11  ;;  %v3867_v32 = vsel %vm1141_vm0, %v5959_v1, 0.0 }
0x1f9c   :  { %v5961_v31 = vpop.eup %5960 }
0x1f9d   :  { %v3876_v37 = vsel %vm1141_vm0, %v5961_v31, 0.0  ;;  %v5963_v0 = vpop.eup %5962 }
0x1f9e   :  { %3868 = vadd.xlane.f32.xlu0 %v3867_v32  ;;  %3877 = vadd.xlane.f32.xlu1 %v3876_v37  ;;  %v3870_v40 = vsel %vm1141_vm0, %v5963_v0, 0.0 }
0x1fa2   :  { %3871 = vadd.xlane.f32.xlu1 %v3870_v40 }
0x1fb3   :  { %3954 = vrot.lane.b32.xlu1 %v6298_v27, %s6091_s26 }
0x1fb4   :  { %3889 = vrot.lane.b32.xlu0 %v6294_v41, %s6090_s25 }
0x1fb7   :  { %3956 = vrot.lane.b32.xlu1 %v6302_v38, %s6091_s26 }
0x1fb8   :  { %3950 = vrot.lane.b32.xlu0 %v6296_v35, %s6091_s26 }
0x1fbb   :  { %3952 = vrot.lane.b32.xlu1 %v6300_v44, %s6091_s26 }
0x2027   :  { %v3875_v11 = vpop.xlane.xlu0 %3874 }
0x202b   :  { %v3878_v43 = vpop.xlane.xlu1 %3877  ;;  %v3869_v61 = vpop.xlane.xlu0 %3868 }
0x202c   :  { %5964 = vrcp.f32 %v3878_v43 }
0x202d   :  { %5966 = vrcp.f32 %v3869_v61 }
0x202e   :  { %5968 = vrcp.f32 %v3875_v11 }
0x202f   :  { %v3872_v27 = vpop.xlane.xlu1 %3871  ;;  %v3890_v63 = vpop.permute.xlu0 %3889 }
0x2030   :  { %5970 = vrcp.f32 %v3872_v27  ;;  %5319 = vmatprep.subr.bf16.mxu1 %v3890_v63 }
0x2031   :  { %5320 = vmatpush3.bf16.msra.mxu1 %v3890_v63 }
0x2032   :  { %5321 = vmatprep.subr.bf16.mxu1 %v3892_v13 }
0x2033   :  { %v3955_v38 = vpop.permute.xlu1 %3954  ;;  %v3951_v40 = vpop.permute.xlu0 %3950 }
0x2034   :  { %v3965_v37 = vsel %vm1141_vm0, %v3955_v38, 0 }
0x2035   :  { %5322 = vmatpush3.bf16.msra.mxu1 %v3892_v13 }
0x2036   :  { %5437 = vmatprep.subr.msk.bf16.mxu1 %vm1141_vm0, %v3955_v38  ;;  %v5965_v35 = vpop.eup %5964 }
0x2037   :  { %v5967_v24 = vpop.eup %5966  ;;  %v3886_v23 = vmul.f32 %v5965_v35, %v5961_v31  ;;  %v3957_v13 = vpop.permute.xlu1 %3956 }
0x2038   :  { %v5969_v44 = vpop.eup %5968  ;;  %v3883_v18 = vmul.f32 %v5967_v24, %v5959_v1  ;;  %v3968_v31 = vsel %vm1141_vm0, %v3957_v13, 0 }
0x2039   :  { %v3885_v2 = vmul.f32 %v5969_v44, %v5957_v47 }
0x203a   :  { %v5971_v39 = vpop.eup %5970 }
0x203b   :  { %v3884_v28 = vmul.f32 %v5971_v39, %v5963_v0  ;;  %v3888_v32 = vpack.c.bf16 %v3886_v23, %v3885_v2  ;;  %v3953_v1 = vpop.permute.xlu1 %3952 }
0x203d   :  { %v3887_v50 = vpack.c.bf16 %v3884_v28, %v3883_v18 }
0x203f   :  { %5323 = vmatprep.mubr.msk.bf16.mxu1 %vm1141_vm0, %v3887_v50 }
0x2040   :  { %5324 = vmatmul.mubr.msk.bf16.vlgmr.msra.gmra.mrb[120].mxu1 %vm1141_vm0, %v3888_v32 }
0x2041   :  { %5328 = vmatpush3.bf16.xpose.msra.mxu1 %v3965_v37  ;;  %5331 = vmatprep.mubr.msk.bf16.mxu1 %vm1141_vm0, %v3951_v40 }
0x2042   :  { %5438 = vmatprep.subr.msk.bf16.mxu1 %vm1141_vm0, %v3957_v13 }
0x2049   :  { %5330 = vmatpush3.bf16.xpose.msra.mxu1 %v3968_v31 }
0x2050   :  { %5332 = vmatmul.mubr.msk.bf16.vlgmr.msra.gmra.mrb[124].mxu1 %vm1141_vm0, %v3953_v1 }
0x2113   :  { %v6948_v47 = vpop.f32.mrb[120].mxu1 }
0x2114   :  { %v6950_v0 = vpop.f32.mrb[121].mxu1 }
0x2115   :  { %v6952_v11 = vpop.f32.mrb[122].mxu1 }
0x2116   :  { %v5562_v43 = vpack.i.bf16 %v6952_v11, %v6948_v47  ;;  %v6956_v61 = vpop.f32.mrb[123].mxu1 }
0x2117   :  { %v5547_v27 = vpack.i.bf16 %v6956_v61, %v6950_v0 }
0x2123   :  { %v5333_v63 = vpop.f32.mrb[124].mxu1 }
0x2124   :  { %v4004_v38 = vpop.f32.mrb[125].mxu1  ;;  %v4013_v39 = vadd.f32 %v5333_v63, %v6310_v9 }
0x2125   :  { %v4005_v35 = vadd.f32 %v4004_v38, %v6312_v10  ;;  %v5334_v24 = vpop.f32.mrb[126].mxu1 }
0x2126   :  { %v4007_v44 = vpop.f32.mrb[127].mxu1  ;;  %v4016_v2 = vadd.f32 %v5334_v24, %v6314_v15  ;;  %v4025_v50 = vsel %vm1141_vm0, %v4013_v39, -inf }
0x2127   :  { %v4008_v23 = vadd.f32 %v4007_v44, %v6317_v19  ;;  %v4019_v18 = vsel %vm1141_vm0, %v4005_v35, -inf }
0x2128   :  { %4020 = vmax.xlane.f32.xlu0 %v4019_v18  ;;  %v4028_v32 = vsel %vm1141_vm0, %v4016_v2, -inf }
0x2129   :  { %v4022_v28 = vsel %vm1141_vm0, %v4008_v23, -inf }
0x212a   :  { %4023 = vmax.xlane.f32.xlu1 %v4022_v28 }
0x212c   :  { %4026 = vmax.xlane.f32.xlu0 %v4025_v50 }
0x2130   :  { %4029 = vmax.xlane.f32.xlu0 %v4028_v32  ;;  %v5700_v32 = vld [vmem:[#allocation7 + $0x8] ss:$12 sps:$4 sm:$0xff]  }
0x2131   :  { %5343 = vmatprep.subr.bf16.mxu1 %v5700_v32 }
0x2132   :  { %5344 = vmatpush3.bf16.msra.mxu1 %v5700_v32 }
0x21b5   :  { %v4021_v10 = vpop.xlane.xlu0 %4020 }
0x21b6   :  { %v4031_v37 = vsub.f32 %v4005_v35, %v4021_v10  ;;  %v5701_v10 = vld [vmem:[#allocation7 + $0x20] ss:$12 sps:$4 sm:$0xff]  }
0x21b7   :  { %v4024_v40 = vpop.xlane.xlu1 %4023  ;;  %5345 = vmatprep.subr.bf16.mxu1 %v5701_v10 }
0x21b8   :  { %v4035_v19 = vmul.f32 1.442695, %v4031_v37  ;;  %v4032_v31 = vsub.f32 %v4008_v23, %v4024_v40  ;;  %5346 = vmatpush3.bf16.msra.mxu1 %v5701_v10  ;;  %v5702_v37 = vld [vmem:[#allocation7 + $0x38] ss:$12 sps:$4 sm:$0xff]   ;;  %v5703_v40 = vld [vmem:[#allocation7 + $0x50] ss:$12 sps:$4 sm:$0xff]  }
0x21b9   :  { %v4027_v9 = vpop.xlane.xlu0 %4026  ;;  %5347 = vmatprep.subr.bf16.mxu1 %v5702_v37 }
0x21ba   :  { %v4033_v13 = vsub.f32 %v4013_v39, %v4027_v9  ;;  %v4037_v44 = vmul.f32 1.442695, %v4032_v31  ;;  %v7276_v9 = vpack.i.bf16 %v6402_v56, %v6396_v7  ;;  %v5705_v7 = vld [vmem:[#allocation7 + $0x80] ss:$12 sps:$4 sm:$0xff]   ;;  %v7280_v56 = vpack.i.bf16 %v6398_v12, %v6394_v60  ;;  %v5713_v60 = vld [vmem:[#allocation7 + $0xb0] ss:$12 sps:$4 sm:$0xff]  }
0x21bb   :  { %v7284_v12 = vpack.i.bf16 %v6620_v26, %v6614_v3  ;;  %v7296_v26 = vld [vmem:[#allocation25_spill] sm:$0xff] }
0x21bc   :  { %v4039_v1 = vmul.f32 1.442695, %v4033_v13  ;;  %5348 = vmatpush3.bf16.msra.mxu1 %v5702_v37  ;;  %v7277_v13 = vpack.i.bf16 %v6520_v20, %v6514_v45  ;;  %v7281_v45 = vpack.i.bf16 %v6572_v21, %v6566_v22  ;;  %v7288_v20 = vpack.i.bf16 %v6658_v62, %v6654_v57  ;;  %v7299_v62 = vld [vmem:[#allocation31_spill] sm:$0xff]  ;;  %v7301_v37 = vld [vmem:[#allocation16_spill] sm:$0xff] }
0x21bd   :  { %v4030_v63 = vpop.xlane.xlu0 %4029  ;;  %5349 = vmatprep.subr.bf16.mxu1 %v5703_v40  ;;  %v7289_v22 = vpack.i.bf16 %v6832_v54, %v6826_v14  ;;  %v7292_v21 = vpack.i.bf16 %v6738_v25, %v6734_v16 }
0x21be   :  { %5972 = vpow2.f32 %v4039_v1  ;;  %v4034_v38 = vsub.f32 %v4016_v2, %v4030_v63 }
0x21bf   :  { %5974 = vpow2.f32 %v4035_v19  ;;  %v5704_v19 = vld [vmem:[#allocation7 + $0x68] ss:$12 sps:$4 sm:$0xff]  }
0x21c0   :  { %v4041_v15 = vmul.f32 1.442695, %v4034_v38  ;;  %5350 = vmatpush3.bf16.msra.mxu1 %v5703_v40 }
0x21c1   :  { %5351 = vmatprep.subr.bf16.mxu1 %v5704_v19 }
0x21c2   :  { %5976 = vpow2.f32 %v4041_v15 }
0x21c3   :  { %5978 = vpow2.f32 %v4037_v44 }
0x21c4   :  { %5352 = vmatpush3.bf16.msra.mxu1 %v5704_v19  ;;  %v5706_v19 = vld [vmem:[#allocation7] ss:$12 sps:$4 sm:$0xff]  }
0x21c5   :  { %5353 = vmatprep.subr.bf16.mxu1 %v5705_v7 }
0x21c8   :  { %v6968_v24 = vpop.eup %5972  ;;  %5354 = vmatpush3.bf16.msra.mxu1 %v5705_v7 }
0x21c9   :  { %v4049_v18 = vsel %vm1141_vm0, %v6968_v24, 0.0  ;;  %v6972_v35 = vpop.eup %5974 }
0x21ca   :  { %4050 = vadd.xlane.f32.xlu0 %v4049_v18  ;;  %v4043_v23 = vsel %vm1141_vm0, %v6972_v35, 0.0 }
0x21cc   :  { %v6974_v39 = vpop.eup %5976 }
0x21cd   :  { %v4052_v28 = vsel %vm1141_vm0, %v6974_v39, 0.0  ;;  %v6980_v2 = vpop.eup %5978 }
0x21ce   :  { %4044 = vadd.xlane.f32.xlu0 %v4043_v23  ;;  %4053 = vadd.xlane.f32.xlu1 %v4052_v28  ;;  %v4046_v50 = vsel %vm1141_vm0, %v6980_v2, 0.0 }
0x21d2   :  { %4047 = vadd.xlane.f32.xlu1 %v4046_v50 }
0x21e3   :  { %4067 = vrot.lane.b32.xlu1 %v6292_v49, %s6091_s26  ;;  %v7278_v49 = vpack.i.bf16 %v6446_v52, %v6440_v33  ;;  %v5709_v33 = vld [vmem:[#allocation7 + $0x98] ss:$12 sps:$4 sm:$0xff]   ;;  %v7282_v52 = vpack.i.bf16 %v6516_v55, %v6512_v59  ;;  %v7286_v59 = vpack.i.bf16 %v6568_v8, %v6564_v46  ;;  %v7287_v55 = vpack.i.bf16 %v6742_v53, %v6736_v58 }
0x21e4   :  { %4065 = vrot.lane.b32.xlu0 %v6294_v41, %s6091_s26  ;;  %v7279_v41 = vpack.i.bf16 %v6442_v48, %v6438_v34  ;;  %5355 = vmatprep.subr.bf16.mxu1 %v5709_v33  ;;  %v7283_v34 = vpack.i.bf16 %v6662_v42, %v6656_v36  ;;  %v7285_v48 = vpack.i.bf16 %v6616_v4, %v6612_v51  ;;  %v7293_v51 = vld [vmem:[#allocation32_spill] sm:$0xff]  ;;  %v7295_v4 = vld [vmem:[#allocation26_spill] sm:$0xff]  ;;  %v7298_v36 = vld [vmem:[#allocation33_spill] sm:$0xff] }
0x21e5   :  { %5356 = vmatpush3.bf16.msra.mxu1 %v5709_v33  ;;  %v7290_v46 = vpack.i.bf16 %v6790_v6, %v6784_v5  ;;  %v7291_v8 = vpack.i.bf16 %v6786_v17, %v6782_v30  ;;  %v7294_v3 = vpack.i.bf16 %v6912_v29, %v7293_v51  ;;  %v7297_v57 = vpack.i.bf16 %v7295_v4, %v7296_v26  ;;  %v5708_v5 = vld [vmem:[#allocation7 + $0x4] ss:$12 sps:$4 sm:$0xff]  }
0x21e6   :  { %5357 = vmatprep.subr.bf16.mxu1 %v5713_v60  ;;  %v7300_v42 = vpack.i.bf16 %v7298_v36, %v7299_v62  ;;  %v5714_v62 = vld [vmem:[#allocation7 + $0x30] ss:$12 sps:$4 sm:$0xff]  }
0x21e7   :  { %5453 = vrot.lane.b32.xlu1 %v7276_v9, %s6091_s26  ;;  %v7302_v9 = vld [vmem:[#allocation14_spill] sm:$0xff] }
0x21e8   :  { %5463 = vrot.lane.b32.xlu0 %v7277_v13, %s6089_s2 }
0x21e9   :  { %5358 = vmatpush3.bf16.msra.mxu1 %v5713_v60  ;;  %v5710_v60 = vld [vmem:[#allocation7 + $0x18] ss:$12 sps:$4 sm:$0xff]  }
0x21eb   :  { %5458 = vrot.lane.b32.xlu1 %v7278_v49, %s6090_s25 }
0x21ec   :  { %5473 = vrot.lane.b32.xlu0 %v7279_v41, %s6090_s25  ;;  %v5712_v41 = vld [vmem:[#allocation7 + $0x1c] ss:$12 sps:$4 sm:$0xff]  }
0x21ef   :  { %5468 = vrot.lane.b32.xlu1 %v7280_v56, %s6091_s26 }
0x21f0   :  { %5483 = vrot.lane.b32.xlu0 %v7281_v45, %s6091_s26 }
0x21f3   :  { %5478 = vrot.lane.b32.xlu1 %v7282_v52, %s6089_s2 }
0x21f4   :  { %5493 = vrot.lane.b32.xlu0 %v7283_v34, %s6089_s2 }
0x21f7   :  { %5488 = vrot.lane.b32.xlu1 %v7284_v12, %s6090_s25  ;;  %v7303_v12 = vmov 0  }
0x21f8   :  { %5503 = vrot.lane.b32.xlu0 %v7285_v48, %s6090_s25  ;;  %v7304_v48 = vld [vmem:[#allocation15_spill] sm:$0xff] }
0x21fb   :  { %5498 = vrot.lane.b32.xlu1 %v7286_v59, %s6091_s26 }
0x21fc   :  { %5513 = vrot.lane.b32.xlu0 %v7287_v55, %s6091_s26  ;;  %v7305_v55 = vld [vmem:[#allocation13_spill] sm:$0xff] }
0x21ff   :  { %5508 = vrot.lane.b32.xlu1 %v7288_v20, %s6089_s2 }
0x2200   :  { %5523 = vrot.lane.b32.xlu0 %v7289_v22, %s6089_s2  ;;  %v5716_v22 = vld [vmem:[#allocation7 + $0x34] ss:$12 sps:$4 sm:$0xff]  }
0x2203   :  { %5518 = vrot.lane.b32.xlu1 %v7290_v46, %s6090_s25 }
0x2204   :  { %5533 = vrot.lane.b32.xlu0 %v7291_v8, %s6090_s25 }
0x2207   :  { %5528 = vrot.lane.b32.xlu1 %v7292_v21, %s6091_s26 }
0x2208   :  { %5543 = vrot.lane.b32.xlu0 %v7294_v3, %s6091_s26 }
0x220b   :  { %5538 = vrot.lane.b32.xlu1 %v7297_v57, %s6089_s2 }
0x220f   :  { %5548 = vrot.lane.b32.xlu1 %v5547_v27, %s6090_s25 }
0x2213   :  { %5558 = vrot.lane.b32.xlu1 %v7300_v42, %s6091_s26 }
0x2257   :  { %v4051_v16 = vpop.xlane.xlu0 %4050 }
0x225b   :  { %v4054_v58 = vpop.xlane.xlu1 %4053  ;;  %v4045_v25 = vpop.xlane.xlu0 %4044 }
0x225c   :  { %5980 = vrcp.f32 %v4054_v58 }
0x225d   :  { %5982 = vrcp.f32 %v4045_v25  ;;  %v5719_v25 = vld [vmem:[#allocation7 + $0x4c] ss:$12 sps:$4 sm:$0xff]  }
0x225e   :  { %5984 = vrcp.f32 %v4051_v16 }
0x225f   :  { %v4048_v53 = vpop.xlane.xlu1 %4047  ;;  %v4066_v30 = vpop.permute.xlu0 %4065 }
0x2260   :  { %5986 = vrcp.f32 %v4048_v53  ;;  %5335 = vmatprep.subr.bf16.mxu0 %v4066_v30 }
0x2261   :  { %5336 = vmatpush3.bf16.msra.mxu0 %v4066_v30 }
0x2263   :  { %v4068_v17 = vpop.permute.xlu1 %4067  ;;  %v5464_v6 = vpop.permute.xlu0 %5463 }
0x2264   :  { %5337 = vmatprep.subr.bf16.mxu0 %v4068_v17  ;;  %v5466_v28 = vunpack.i.h.bf16 %v5464_v6  ;;  %v5465_v10 = vunpack.i.l.bf16 %v5464_v6  ;;  %v7306_v6 = vld [vmem:[#allocation20_spill] sm:$0xff] }
0x2265   :  { %5338 = vmatpush3.bf16.msra.mxu0 %v4068_v17 }
0x2266   :  { %4371 = vmatprep.subr.bf16.mxu0 %v5708_v5  ;;  %v5981_v14 = vpop.eup %5980 }
0x2267   :  { %v5454_v54 = vpop.permute.xlu1 %5453  ;;  %v5474_v29 = vpop.permute.xlu0 %5473  ;;  %v4062_v63 = vmul.f32 %v5981_v14, %v6974_v39 }
0x2268   :  { %v5983_v0 = vpop.eup %5982  ;;  %v5456_v27 = vunpack.i.h.bf16 %v5454_v54  ;;  %v5455_v31 = vunpack.i.l.bf16 %v5454_v54  ;;  %v5476_v46 = vunpack.i.h.bf16 %v5474_v29  ;;  %v5475_v8 = vunpack.i.l.bf16 %v5474_v29  ;;  %v7307_v54 = vld [vmem:[#allocation18_spill] sm:$0xff] }
0x2269   :  { %v5985_v61 = vpop.eup %5984  ;;  %v4059_v15 = vmul.f32 %v5983_v0, %v6972_v35 }
0x226a   :  { %v5987_v1 = vpop.eup %5986  ;;  %v4061_v23 = vmul.f32 %v5985_v61, %v6968_v24  ;;  %v1887_v40 = vsel %vm1141_vm0, %v7301_v37, %v5456_v27  ;;  %v1886_v39 = vsel %vm1141_vm0, %v7302_v9, %v5455_v31  ;;  %v5717_v27 = vld [vmem:[#allocation7 + $0x48] ss:$12 sps:$4 sm:$0xff]  }
0x226b   :  { %v5459_v38 = vpop.permute.xlu1 %5458  ;;  %v5484_v44 = vpop.permute.xlu0 %5483  ;;  %v4060_v18 = vmul.f32 %v5987_v1, %v6980_v2 }
0x226c   :  { %v5461_v50 = vunpack.i.h.bf16 %v5459_v38  ;;  %v5460_v32 = vunpack.i.l.bf16 %v5459_v38  ;;  %v4064_v2 = vpack.c.bf16 %v4062_v63, %v4061_v23  ;;  %v5486_v4 = vunpack.i.h.bf16 %v5484_v44  ;;  %v5722_v63 = vld [vmem:[#allocation7 + $0x64] ss:$12 sps:$4 sm:$0xff]  }
0x226d   :  { %v4063_v13 = vpack.c.bf16 %v4060_v18, %v4059_v15  ;;  %v5485_v26 = vunpack.i.l.bf16 %v5484_v44 }
0x226e   :  { %v1891_v49 = vsel %vm1890_vm5, %v1886_v39, %v5460_v32  ;;  %v1892_v35 = vsel %vm1890_vm5, %v1887_v40, %v5461_v50  ;;  %v2651_v14 = vsel %vm1141_vm0, %v7306_v6, %v5486_v4  ;;  %v5720_v32 = vld [vmem:[#allocation7 + $0x60] ss:$12 sps:$4 sm:$0xff]   ;;  %v5725_v39 = vld [vmem:[#allocation7 + $0x7c] ss:$12 sps:$4 sm:$0xff]  }
0x226f   :  { %v5469_v7 = vpop.permute.xlu1 %5468  ;;  %5339 = vmatprep.mubr.msk.bf16.mxu0 %vm1141_vm0, %v4063_v13  ;;  %v1896_v24 = vsel %vm1895_vm6, %v1891_v49, %v5465_v10  ;;  %v1897_v56 = vsel %vm1895_vm6, %v1892_v35, %v5466_v28  ;;  %v5494_v52 = vpop.permute.xlu0 %5493  ;;  %v2650_v29 = vsel %vm1141_vm0, %v7307_v54, %v5485_v26  ;;  %v7308_v10 = vld [vmem:[#allocation19_spill] sm:$0xff]  ;;  %v7309_v40 = vld [vmem:[#allocation17_spill] sm:$0xff] }
0x2270   :  { %v5471_v45 = vunpack.i.h.bf16 %v5469_v7  ;;  %v5470_v33 = vunpack.i.l.bf16 %v5469_v7  ;;  %5340 = vmatmul.mubr.msk.bf16.vlgmr.msra.gmra.mrb[76].mxu0 %vm1141_vm0, %v4064_v2  ;;  %v7086_v34 = vpack.c.bf16 %v1897_v56, %v1896_v24  ;;  %v5496_v0 = vunpack.i.h.bf16 %v5494_v52  ;;  %v5723_v24 = vld [vmem:[#allocation7 + $0x78] ss:$12 sps:$4 sm:$0xff]   ;;  %v5726_v26 = vld [vmem:[#allocation7 + $0x90] ss:$12 sps:$4 sm:$0xff]   ;;  %v5729_v6 = vld [vmem:[#allocation7 + $0xa8] ss:$12 sps:$4 sm:$0xff]  }
0x2271   :  { %4372 = vmatpush1.bf16.msra.mxu0 %v5706_v19  ;;  %4403 = vmatprep.mubr.bf16.mxu0 %v7303_v12  ;;  %v5495_v61 = vunpack.i.l.bf16 %v5494_v52 }
0x2272   :  { %v1889_v59 = vsel %vm1141_vm0, %v7304_v48, %v5471_v45  ;;  %v1888_v20 = vsel %vm1141_vm0, %v7305_v55, %v5470_v33  ;;  %4373 = vmatprep.subr.bf16.mxu0 %v5712_v41  ;;  %5359 = vmatprep.mubr.bf16.mxu1 %v7086_v34  ;;  %v5728_v48 = vld [vmem:[#allocation7 + $0x94] ss:$12 sps:$4 sm:$0xff]  }
0x2273   :  { %v5479_v21 = vpop.permute.xlu1 %5478  ;;  %v1893_v57 = vsel %vm1890_vm5, %v1888_v20, %v5475_v8  ;;  %v1894_v36 = vsel %vm1890_vm5, %v1889_v59, %v5476_v46  ;;  %v5504_v58 = vpop.permute.xlu0 %5503  ;;  %v7310_v46 = vld [vmem:[#allocation24_spill] sm:$0xff] }
0x2274   :  { %v5481_v51 = vunpack.i.h.bf16 %v5479_v21  ;;  %v5480_v3 = vunpack.i.l.bf16 %v5479_v21  ;;  %v5506_v13 = vunpack.i.h.bf16 %v5504_v58  ;;  %v5505_v19 = vunpack.i.l.bf16 %v5504_v58  ;;  %v7311_v21 = vld [vmem:[#allocation22_spill] sm:$0xff] }
0x2275   :  { %4374 = vmatpush1.bf16.msra.mxu0 %v5710_v60 }
0x2276   :  { %v1898_v42 = vsel %vm1895_vm6, %v1893_v57, %v5480_v3  ;;  %v1899_v16 = vsel %vm1895_vm6, %v1894_v36, %v5481_v51  ;;  %4375 = vmatprep.subr.bf16.mxu0 %v5716_v22 }
0x2277   :  { %v7098_v53 = vpack.c.bf16 %v1899_v16, %v1898_v42  ;;  %v5489_v30 = vpop.permute.xlu1 %5488  ;;  %v5514_v18 = vpop.permute.xlu0 %5513 }
0x2278   :  { %v5491_v5 = vunpack.i.h.bf16 %v5489_v30  ;;  %v5490_v17 = vunpack.i.l.bf16 %v5489_v30  ;;  %v5516_v41 = vunpack.i.h.bf16 %v5514_v18  ;;  %v5515_v7 = vunpack.i.l.bf16 %v5514_v18 }
0x2279   :  { %4376 = vmatpush1.bf16.msra.mxu0 %v5714_v62  ;;  %5360 = vmatmul.mubr.bf16.vlgmr.msra.gmra.mrb[128].mxu1 %v7098_v53  ;;  %v5731_v62 = vld [vmem:[#allocation7 + $0xac] ss:$12 sps:$4 sm:$0xff]  }
0x227a   :  { %v2654_v31 = vsel %vm1890_vm5, %v2650_v29, %v5490_v17  ;;  %v2655_v1 = vsel %vm1890_vm5, %v2651_v14, %v5491_v5  ;;  %4377 = vmatprep.subr.bf16.mxu0 %v5719_v25  ;;  %v3413_v8 = vsel %vm1141_vm0, %v7310_v46, %v5516_v41  ;;  %v3412_v51 = vsel %vm1141_vm0, %v7311_v21, %v5515_v7  ;;  %v7312_v14 = vld [vmem:[#allocation23_spill] sm:$0xff]  ;;  %v7313_v29 = vld [vmem:[#allocation21_spill] sm:$0xff] }
0x227b   :  { %v5499_v38 = vpop.permute.xlu1 %5498  ;;  %v2658_v44 = vsel %vm1895_vm6, %v2654_v31, %v5495_v61  ;;  %v2659_v15 = vsel %vm1895_vm6, %v2655_v1, %v5496_v0  ;;  %v5524_v33 = vpop.permute.xlu0 %5523 }
0x227c   :  { %v5501_v23 = vunpack.i.h.bf16 %v5499_v38  ;;  %v5500_v28 = vunpack.i.l.bf16 %v5499_v38  ;;  %v7109_v50 = vpack.c.bf16 %v2659_v15, %v2658_v44  ;;  %v5526_v3 = vunpack.i.h.bf16 %v5524_v33 }
0x227d   :  { %4378 = vmatpush1.bf16.msra.mxu0 %v5717_v27  ;;  %v5525_v4 = vunpack.i.l.bf16 %v5524_v33 }
0x227e   :  { %v2653_v37 = vsel %vm1141_vm0, %v7308_v10, %v5501_v23  ;;  %v2652_v9 = vsel %vm1141_vm0, %v7309_v40, %v5500_v28  ;;  %4379 = vmatprep.subr.bf16.mxu0 %v5722_v63  ;;  %5363 = vmatprep.mubr.bf16.mxu1 %v7109_v50  ;;  %v7314_v10 = vld [vmem:[#allocation12_spill] sm:$0xff] }
0x227f   :  { %v5509_v49 = vpop.permute.xlu1 %5508  ;;  %v2656_v56 = vsel %vm1890_vm5, %v2652_v9, %v5505_v19  ;;  %v2657_v45 = vsel %vm1890_vm5, %v2653_v37, %v5506_v13  ;;  %v5534_v25 = vpop.permute.xlu0 %5533 }
0x2280   :  { %v5511_v35 = vunpack.i.h.bf16 %v5509_v49  ;;  %v5510_v2 = vunpack.i.l.bf16 %v5509_v49  ;;  %v5536_v61 = vunpack.i.h.bf16 %v5534_v25  ;;  %v5535_v27 = vunpack.i.l.bf16 %v5534_v25 }
0x2281   :  { %4380 = vmatpush1.bf16.msra.mxu0 %v5720_v32 }
0x2282   :  { %4381 = vmatprep.subr.bf16.mxu0 %v5725_v39  ;;  %v2660_v52 = vsel %vm1895_vm6, %v2656_v56, %v5510_v2  ;;  %v2661_v60 = vsel %vm1895_vm6, %v2657_v45, %v5511_v35 }
0x2283   :  { %v5519_v59 = vpop.permute.xlu1 %5518  ;;  %v4189_v55 = vpack.c.bf16 %v2661_v60, %v2660_v52 }
0x2284   :  { %v5521_v20 = vunpack.i.h.bf16 %v5519_v59  ;;  %v5520_v22 = vunpack.i.l.bf16 %v5519_v59  ;;  %v4234_v59 = vsub.s32 1, %v7314_v10 }
0x2285   :  { %4382 = vmatpush1.bf16.msra.mxu0 %v5723_v24  ;;  %5364 = vmatmul.mubr.bf16.gmra.mrb[132].mxu1 %v4189_v55 }
0x2286   :  { %v3416_v57 = vsel %vm1890_vm5, %v3412_v51, %v5520_v22  ;;  %v3417_v36 = vsel %vm1890_vm5, %v3413_v8, %v5521_v20  ;;  %4383 = vmatprep.subr.bf16.mxu0 %v5728_v48  ;;  %v4230_v48 = vsub.s32 0, %v7314_v10 }
0x2287   :  { %v5529_v42 = vpop.permute.xlu1 %5528  ;;  %v3420_v16 = vsel %vm1895_vm6, %v3416_v57, %v5525_v4  ;;  %v3421_v58 = vsel %vm1895_vm6, %v3417_v36, %v5526_v3 }
0x2288   :  { %v5531_v30 = vunpack.i.h.bf16 %v5529_v42  ;;  %v5530_v5 = vunpack.i.l.bf16 %v5529_v42  ;;  %v4190_v17 = vpack.c.bf16 %v3421_v58, %v3420_v16 }
0x2289   :  { %4384 = vmatpush1.bf16.msra.mxu0 %v5726_v26 }
0x228a   :  { %v3415_v54 = vsel %vm1141_vm0, %v7312_v14, %v5531_v30  ;;  %v3414_v0 = vsel %vm1141_vm0, %v7313_v29, %v5530_v5  ;;  %5367 = vmatprep.mubr.bf16.mxu1 %v4190_v17  ;;  %4385 = vmatprep.subr.bf16.mxu0 %v5731_v62 }
0x228b   :  { %v5539_v31 = vpop.permute.xlu1 %5538  ;;  %v3418_v38 = vsel %vm1890_vm5, %v3414_v0, %v5535_v27  ;;  %v3419_v44 = vsel %vm1890_vm5, %v3415_v54, %v5536_v61 }
0x228c   :  { %v5541_v1 = vunpack.i.h.bf16 %v5539_v31  ;;  %v5540_v63 = vunpack.i.l.bf16 %v5539_v31 }
0x228d   :  { %4386 = vmatpush1.bf16.msra.mxu0 %v5729_v6 }
0x228e   :  { %v3422_v15 = vsel %vm1895_vm6, %v3418_v38, %v5540_v63  ;;  %v3423_v18 = vsel %vm1895_vm6, %v3419_v44, %v5541_v1 }
0x228f   :  { %v4191_v23 = vpack.c.bf16 %v3423_v18, %v3422_v15 }
0x2290   :  { %4404 = vmatmul.mubr.bf16.vlgmr.msra.gmra.mrb[80].mxu0 %v7086_v34 }
0x2291   :  { %5368 = vmatmul.mubr.bf16.gmra.mrb[136].mxu1 %v4191_v23  ;;  %4413 = vmatprep.mubr.bf16.mxu0 %v7303_v12 }
0x2298   :  { %4414 = vmatmul.mubr.bf16.gmra.mrb[84].mxu0 %v7098_v53  ;;  %v4238_v53 = vsub.s32 2, %v7314_v10 }
0x2299   :  { %4423 = vmatprep.mubr.bf16.mxu0 %v7303_v12 }
0x22a0   :  { %4424 = vmatmul.mubr.bf16.gmra.mrb[88].mxu0 %v7109_v50  ;;  %v4226_v50 = vld [vmem:[%s7243_s3] sm:$0x7]  ;;  %s6092_s3 = smov [#allocation8]  }
0x22a1   :  { %4433 = vmatprep.mubr.bf16.mxu0 %v7303_v12  ;;  %v7151_v39 = vrot.slane %v4226_v50, %v4238_v53  ;;  %v7169_v20 = vrot.slane %v4226_v50, %v4234_v59  ;;  %s4634_s29 = sshll.u32 %s6092_s3, 4  ;;  %s4635_s29 = int_to_ptr.vmem [resolvable:$true] %s4634_s29 }
0x22a2   :  { %s6054_s30 = scalar_lea.vmem %s4635_s29, 6144  ;;  %p6059_p11 = scmp.lt.s32.totalorder %s4635_s29, %s4635_s29 }
0x22a3   :  { %p6055_p10 = scmp.ne.s32.totalorder %s4635_s29, %s6054_s30  ;;  %p6060_p12 = scmp.lt.s32.totalorder %s6054_s30, %s6054_s30 }
0x22a5   :  { %p6061_p13 = por %p6060_p12, %p6059_p11 }
0x22a7   :  { %p6062_p0 = pnand %p6061_p13, %p6055_p10 }
0x22a8   :  { %4434 = vmatmul.mubr.bf16.gmra.mrb[92].mxu0 %v4189_v55  ;;  %v7167_v55 = vrot.slane %v4226_v50, %v4230_v48 }
0x22a9   :  { %4443 = vmatprep.mubr.bf16.mxu0 %v7303_v12 }
0x22b0   :  { %4444 = vmatmul.mubr.bf16.gmra.mrb[96].mxu0 %v4190_v17 }
0x22b1   :  { %4453 = vmatprep.mubr.bf16.mxu0 %v7303_v12 }
0x22b8   :  { %4454 = vmatmul.mubr.bf16.gmra.mrb[100].mxu0 %v4191_v23 }
0x22b9   :  { %4463 = vmatprep.mubr.bf16.mxu0 %v7303_v12 }
0x2343   :  { %v5341_v34 = vpop.f32.mrb[76].mxu0 }
0x2344   :  { %v4111_v28 = vpop.f32.mrb[77].mxu0 }
0x2345   :  { %v5342_v32 = vpop.f32.mrb[78].mxu0 }
0x2346   :  { %v5567_v37 = vpack.i.bf16 %v5342_v32, %v5341_v34  ;;  %v4114_v40 = vpop.f32.mrb[79].mxu0 }
0x2347   :  { %v5552_v9 = vpack.i.bf16 %v4114_v40, %v4111_v28 }
0x2348   :  { %5568 = vrot.lane.b32.xlu1 %v5567_v37, %s6089_s2 }
0x2349   :  { %5553 = vrot.lane.b32.xlu0 %v5552_v9, %s6089_s2 }
0x234c   :  { %v5361_v13 = vpop.f32.mrb[128].mxu1 }
0x234d   :  { %v4527_v19 = vadd.f32 %v5361_v13, %v7151_v39  ;;  %5563 = vrot.lane.b32.xlu0 %v5562_v43, %s6090_s25  ;;  %v4518_v49 = vpop.f32.mrb[129].mxu1 }
0x234e   :  { %v4519_v35 = vadd.f32 %v4518_v49, %v7151_v39  ;;  %v5362_v2 = vpop.f32.mrb[130].mxu1 }
0x234f   :  { %4589 = vst [vmem:[#allocation8 + $0x40] sm:$0xff] %v4527_v19  ;;  %v4530_v41 = vadd.f32 %v5362_v2, %v7151_v39  ;;  %v4521_v7 = vpop.f32.mrb[131].mxu1 }
0x2350   :  { %4583 = vst [vmem:[#allocation8 + $0x10] sm:$0xff] %v4519_v35  ;;  %v4522_v24 = vadd.f32 %v4521_v7, %v7151_v39 }
0x2351   :  { %4592 = vst [vmem:[#allocation8 + $0x58] sm:$0xff] %v4530_v41 }
0x2352   :  { %4586 = vst [vmem:[#allocation8 + $0x28] sm:$0xff] %v4522_v24 }
0x2358   :  { %v5365_v56 = vpop.f32.mrb[132].mxu1 }
0x2359   :  { %v4543_v45 = vadd.f32 %v5365_v56, %v7151_v39  ;;  %v4534_v33 = vpop.f32.mrb[133].mxu1 }
0x235a   :  { %v4535_v47 = vadd.f32 %v4534_v33, %v7151_v39  ;;  %v5366_v11 = vpop.f32.mrb[134].mxu1 }
0x235b   :  { %4601 = vst [vmem:[#allocation8 + $0xa0] sm:$0xff] %v4543_v45  ;;  %v4546_v43 = vadd.f32 %v5366_v11, %v7151_v39  ;;  %v4537_v52 = vpop.f32.mrb[135].mxu1 }
0x235c   :  { %4595 = vst [vmem:[#allocation8 + $0x70] sm:$0xff] %v4535_v47  ;;  %v4538_v60 = vadd.f32 %v4537_v52, %v7151_v39  ;;  %v5549_v52 = vpop.permute.xlu1 %5548 }
0x235d   :  { %4604 = vst [vmem:[#allocation8 + $0xb8] sm:$0xff] %v4546_v43 }
0x235e   :  { %4598 = vst [vmem:[#allocation8 + $0x88] sm:$0xff] %v4538_v60  ;;  %v5544_v60 = vpop.permute.xlu0 %5543 }
0x235f   :  { %v5546_v48 = vunpack.i.h.bf16 %v5544_v60  ;;  %v5545_v59 = vunpack.i.l.bf16 %v5544_v60 }
0x2363   :  { %v4405_v22 = vpop.f32.mrb[80].mxu0 }
0x2364   :  { %v4406_v46 = vadd.f32 %v4405_v22, %v7167_v55  ;;  %v4407_v8 = vpop.f32.mrb[81].mxu0  ;;  %v5369_v21 = vpop.f32.mrb[136].mxu1  ;;  %v5551_v22 = vunpack.i.h.bf16 %v5549_v52 }
0x2365   :  { %v4408_v51 = vadd.f32 %v4407_v8, %v7169_v20  ;;  %v4409_v3 = vpop.f32.mrb[82].mxu0  ;;  %v4559_v4 = vadd.f32 %v5369_v21, %v7151_v39  ;;  %v4550_v26 = vpop.f32.mrb[137].mxu1 }
0x2366   :  { %4581 = vst [vmem:[#allocation8] sm:$0xff] %v4406_v46  ;;  %v4410_v57 = vadd.f32 %v4409_v3, %v7167_v55  ;;  %v4411_v36 = vpop.f32.mrb[83].mxu0  ;;  %v4551_v62 = vadd.f32 %v4550_v26, %v7151_v39  ;;  %v5370_v42 = vpop.f32.mrb[138].mxu1  ;;  %v5550_v46 = vunpack.i.l.bf16 %v5549_v52 }
0x2367   :  { %4582 = vst [vmem:[#allocation8 + $0x8] sm:$0xff] %v4408_v51  ;;  %4613 = vst [vmem:[#allocation8 + $0x100] sm:$0xff] %v4559_v4  ;;  %v4412_v16 = vadd.f32 %v4411_v36, %v7169_v20  ;;  %v4562_v58 = vadd.f32 %v5370_v42, %v7151_v39  ;;  %v4553_v25 = vpop.f32.mrb[139].mxu1  ;;  %v5559_v8 = vpop.permute.xlu1 %5558  ;;  %v7315_v51 = vld [vmem:[#allocation30_spill] sm:$0xff]  ;;  %v7316_v4 = vld [vmem:[#allocation28_spill] sm:$0xff] }
0x2368   :  { %4584 = vst [vmem:[#allocation8 + $0x18] sm:$0xff] %v4410_v57  ;;  %4607 = vst [vmem:[#allocation8 + $0xd0] sm:$0xff] %v4551_v62  ;;  %v4554_v30 = vadd.f32 %v4553_v25, %v7151_v39  ;;  %v4175_v3 = vsel %vm1141_vm0, %v7315_v51, %v5546_v48  ;;  %v4174_v26 = vsel %vm1141_vm0, %v7316_v4, %v5545_v59 }
0x2369   :  { %4585 = vst [vmem:[#allocation8 + $0x20] sm:$0xff] %v4412_v16  ;;  %4616 = vst [vmem:[#allocation8 + $0x118] sm:$0xff] %v4562_v58  ;;  %v4178_v62 = vsel %vm1890_vm5, %v4174_v26, %v5550_v46  ;;  %v4179_v42 = vsel %vm1890_vm5, %v4175_v3, %v5551_v22  ;;  %v5561_v16 = vunpack.i.h.bf16 %v5559_v8  ;;  %v5560_v58 = vunpack.i.l.bf16 %v5559_v8 }
0x236a   :  { %4610 = vst [vmem:[#allocation8 + $0xe8] sm:$0xff] %v4554_v30 }
0x236b   :  { %v4415_v5 = vpop.f32.mrb[84].mxu0 }
0x236c   :  { %v4416_v17 = vadd.f32 %v4415_v5, %v7167_v55  ;;  %v4417_v6 = vpop.f32.mrb[85].mxu0 }
0x236d   :  { %v4418_v14 = vadd.f32 %v4417_v6, %v7169_v20  ;;  %v4419_v54 = vpop.f32.mrb[86].mxu0 }
0x236e   :  { %4587 = vst [vmem:[#allocation8 + $0x30] sm:$0xff] %v4416_v17  ;;  %v4420_v29 = vadd.f32 %v4419_v54, %v7167_v55  ;;  %v4421_v0 = vpop.f32.mrb[87].mxu0 }
0x236f   :  { %4588 = vst [vmem:[#allocation8 + $0x38] sm:$0xff] %v4418_v14  ;;  %v4422_v61 = vadd.f32 %v4421_v0, %v7169_v20 }
0x2370   :  { %4590 = vst [vmem:[#allocation8 + $0x48] sm:$0xff] %v4420_v29  ;;  %v7317_v29 = vld [vmem:[#allocation29_spill] sm:$0xff] }
0x2371   :  { %4591 = vst [vmem:[#allocation8 + $0x50] sm:$0xff] %v4422_v61  ;;  %v4177_v0 = vsel %vm1141_vm0, %v7317_v29, %v5561_v16  ;;  %v7318_v61 = vld [vmem:[#allocation27_spill] sm:$0xff] }
0x2373   :  { %v4425_v27 = vpop.f32.mrb[88].mxu0 }
0x2374   :  { %v4426_v31 = vadd.f32 %v4425_v27, %v7167_v55  ;;  %v4427_v1 = vpop.f32.mrb[89].mxu0  ;;  %v4176_v27 = vsel %vm1141_vm0, %v7318_v61, %v5560_v58 }
0x2375   :  { %v4428_v63 = vadd.f32 %v4427_v1, %v7169_v20  ;;  %v4429_v38 = vpop.f32.mrb[90].mxu0 }
0x2376   :  { %4593 = vst [vmem:[#allocation8 + $0x60] sm:$0xff] %v4426_v31  ;;  %v4430_v44 = vadd.f32 %v4429_v38, %v7167_v55  ;;  %v4431_v15 = vpop.f32.mrb[91].mxu0 }
0x2377   :  { %4594 = vst [vmem:[#allocation8 + $0x68] sm:$0xff] %v4428_v63  ;;  %v4432_v18 = vadd.f32 %v4431_v15, %v7169_v20 }
0x2378   :  { %4596 = vst [vmem:[#allocation8 + $0x78] sm:$0xff] %v4430_v44 }
0x2379   :  { %4597 = vst [vmem:[#allocation8 + $0x80] sm:$0xff] %v4432_v18 }
0x237b   :  { %v4435_v23 = vpop.f32.mrb[92].mxu0 }
0x237c   :  { %v4436_v34 = vadd.f32 %v4435_v23, %v7167_v55  ;;  %v4437_v28 = vpop.f32.mrb[93].mxu0 }
0x237d   :  { %v4438_v32 = vadd.f32 %v4437_v28, %v7169_v20  ;;  %v4439_v10 = vpop.f32.mrb[94].mxu0 }
0x237e   :  { %4599 = vst [vmem:[#allocation8 + $0x90] sm:$0xff] %v4436_v34  ;;  %v4440_v53 = vadd.f32 %v4439_v10, %v7167_v55  ;;  %v4441_v37 = vpop.f32.mrb[95].mxu0 }
0x237f   :  { %4600 = vst [vmem:[#allocation8 + $0x98] sm:$0xff] %v4438_v32  ;;  %v4442_v40 = vadd.f32 %v4441_v37, %v7169_v20 }
0x2380   :  { %4602 = vst [vmem:[#allocation8 + $0xa8] sm:$0xff] %v4440_v53 }
0x2381   :  { %4603 = vst [vmem:[#allocation8 + $0xb0] sm:$0xff] %v4442_v40 }
0x2383   :  { %v4445_v50 = vpop.f32.mrb[96].mxu0 }
0x2384   :  { %v4446_v9 = vadd.f32 %v4445_v50, %v7167_v55  ;;  %v4447_v13 = vpop.f32.mrb[97].mxu0 }
0x2385   :  { %v4448_v19 = vadd.f32 %v4447_v13, %v7169_v20  ;;  %v4449_v49 = vpop.f32.mrb[98].mxu0 }
0x2386   :  { %4605 = vst [vmem:[#allocation8 + $0xc0] sm:$0xff] %v4446_v9  ;;  %v4450_v35 = vadd.f32 %v4449_v49, %v7167_v55  ;;  %v4451_v2 = vpop.f32.mrb[99].mxu0 }
0x2387   :  { %4606 = vst [vmem:[#allocation8 + $0xc8] sm:$0xff] %v4448_v19  ;;  %v4452_v41 = vadd.f32 %v4451_v2, %v7169_v20 }
0x2388   :  { %4608 = vst [vmem:[#allocation8 + $0xd8] sm:$0xff] %v4450_v35 }
0x2389   :  { %4609 = vst [vmem:[#allocation8 + $0xe0] sm:$0xff] %v4452_v41 }
0x238b   :  { %v4455_v7 = vpop.f32.mrb[100].mxu0 }
0x238c   :  { %v4456_v24 = vadd.f32 %v4455_v7, %v7167_v55  ;;  %v4457_v56 = vpop.f32.mrb[101].mxu0 }
0x238d   :  { %v4458_v45 = vadd.f32 %v4457_v56, %v7169_v20  ;;  %v4459_v33 = vpop.f32.mrb[102].mxu0 }
0x238e   :  { %4611 = vst [vmem:[#allocation8 + $0xf0] sm:$0xff] %v4456_v24  ;;  %v4460_v47 = vadd.f32 %v4459_v33, %v7167_v55  ;;  %v4461_v11 = vpop.f32.mrb[103].mxu0 }
0x238f   :  { %4612 = vst [vmem:[#allocation8 + $0xf8] sm:$0xff] %v4458_v45  ;;  %v4462_v43 = vadd.f32 %v4461_v11, %v7169_v20 }
0x2390   :  { %4614 = vst [vmem:[#allocation8 + $0x108] sm:$0xff] %v4460_v47 }
0x2391   :  { %4615 = vst [vmem:[#allocation8 + $0x110] sm:$0xff] %v4462_v43 }
0x23ba   :  { %v5569_v25 = vpop.permute.xlu1 %5568 }
0x23bb   :  { %v5554_v21 = vpop.permute.xlu0 %5553  ;;  %v5571_v31 = vunpack.i.h.bf16 %v5569_v25  ;;  %v5570_v1 = vunpack.i.l.bf16 %v5569_v25 }
0x23bc   :  { %v5556_v57 = vunpack.i.h.bf16 %v5554_v21  ;;  %v5555_v36 = vunpack.i.l.bf16 %v5554_v21 }
0x23be   :  { %v4182_v30 = vsel %vm1895_vm6, %v4178_v62, %v5555_v36  ;;  %v4183_v5 = vsel %vm1895_vm6, %v4179_v42, %v5556_v57 }
0x23bf   :  { %v5564_v17 = vpop.permute.xlu0 %5563  ;;  %v4192_v6 = vpack.c.bf16 %v4183_v5, %v4182_v30 }
0x23c0   :  { %v5566_v14 = vunpack.i.h.bf16 %v5564_v17  ;;  %v5565_v54 = vunpack.i.l.bf16 %v5564_v17 }
0x23c1   :  { %4464 = vmatmul.mubr.bf16.gmra.mrb[104].mxu0 %v4192_v6  ;;  %5371 = vmatprep.mubr.bf16.mxu1 %v4192_v6 }
0x23c2   :  { %v4181_v63 = vsel %vm1890_vm5, %v4177_v0, %v5566_v14  ;;  %v4180_v38 = vsel %vm1890_vm5, %v4176_v27, %v5565_v54  ;;  %4473 = vmatprep.mubr.bf16.mxu0 %v7303_v12 }
0x23c3   :  { %v4184_v44 = vsel %vm1895_vm6, %v4180_v38, %v5570_v1  ;;  %v4185_v15 = vsel %vm1895_vm6, %v4181_v63, %v5571_v31 }
0x23c4   :  { %v4193_v18 = vpack.c.bf16 %v4185_v15, %v4184_v44 }
0x23c6   :  { %5372 = vmatmul.mubr.bf16.gmra.mrb[140].mxu1 %v4193_v18 }
0x23c9   :  { %4474 = vmatmul.mubr.bf16.gmra.mrb[108].mxu0 %v4193_v18 }
0x2494   :  { %v4465_v23 = vpop.f32.mrb[104].mxu0 }
0x2495   :  { %v4466_v34 = vadd.f32 %v4465_v23, %v7167_v55  ;;  %v4467_v28 = vpop.f32.mrb[105].mxu0 }
0x2496   :  { %v4468_v32 = vadd.f32 %v4467_v28, %v7169_v20  ;;  %v4469_v10 = vpop.f32.mrb[106].mxu0 }
0x2497   :  { %4617 = vst [vmem:[#allocation8 + $0x120] sm:$0xff] %v4466_v34  ;;  %v4470_v53 = vadd.f32 %v4469_v10, %v7167_v55  ;;  %v4471_v37 = vpop.f32.mrb[107].mxu0 }
0x2498   :  { %4618 = vst [vmem:[#allocation8 + $0x128] sm:$0xff] %v4468_v32  ;;  %v4472_v12 = vadd.f32 %v4471_v37, %v7169_v20 }
0x2499   :  { %4620 = vst [vmem:[#allocation8 + $0x138] sm:$0xff] %v4470_v53  ;;  %v5373_v40 = vpop.f32.mrb[140].mxu1 }
0x249a   :  { %4621 = vst [vmem:[#allocation8 + $0x140] sm:$0xff] %v4472_v12  ;;  %v4575_v50 = vadd.f32 %v5373_v40, %v7151_v39  ;;  %v4566_v9 = vpop.f32.mrb[141].mxu1 }
0x249b   :  { %v4567_v13 = vadd.f32 %v4566_v9, %v7151_v39  ;;  %v5374_v19 = vpop.f32.mrb[142].mxu1 }
0x249c   :  { %4625 = vst [vmem:[#allocation8 + $0x160] sm:$0xff] %v4575_v50  ;;  %v4578_v49 = vadd.f32 %v5374_v19, %v7151_v39  ;;  %v4475_v35 = vpop.f32.mrb[108].mxu0  ;;  %v4569_v2 = vpop.f32.mrb[143].mxu1 }
0x249d   :  { %4619 = vst [vmem:[#allocation8 + $0x130] sm:$0xff] %v4567_v13  ;;  %v4476_v41 = vadd.f32 %v4475_v35, %v7167_v55  ;;  %v4570_v7 = vadd.f32 %v4569_v2, %v7151_v39  ;;  %v4477_v24 = vpop.f32.mrb[109].mxu0 }
0x249e   :  { %4628 = vst [vmem:[#allocation8 + $0x178] sm:$0xff] %v4578_v49  ;;  %v4478_v56 = vadd.f32 %v4477_v24, %v7169_v20  ;;  %v4479_v45 = vpop.f32.mrb[110].mxu0 }
0x249f   :  { %4623 = vst [vmem:[#allocation8 + $0x150] sm:$0xff] %v4476_v41  ;;  %4622 = vst [vmem:[#allocation8 + $0x148] sm:$0xff] %v4570_v7  ;;  %v4480_v33 = vadd.f32 %v4479_v45, %v7167_v55  ;;  %v4481_v47 = vpop.f32.mrb[111].mxu0 }
0x24a0   :  { %4624 = vst [vmem:[#allocation8 + $0x158] sm:$0xff] %v4478_v56  ;;  %v4482_v11 = vadd.f32 %v4481_v47, %v7169_v20 }
0x24a1   :  { %4626 = vst [vmem:[#allocation8 + $0x168] sm:$0xff] %v4480_v33 }
0x24a2   :  { %4627 = vst [vmem:[#allocation8 + $0x170] sm:$0xff] %v4482_v11 }
0x24a3   :  { %6065 = shalt.err (!%p6062_p0)
}
0x24a4   :  { %s6066_s7 = scalar_lea.hbm %s7244_s4, 6144 }
0x24a5   :  { %p6067_p1 = scmp.ne.s32.totalorder %s7244_s4, %s6066_s7  ;;  %p6070_p2 = scmp.lt.u32.totalorder %s6066_s7, %s7244_s4 }
0x24a7   :  { %p6072_p3 = pnand %p6070_p2, %p6067_p1 }
0x24a9   :  { %6075 = shalt.err (!%p6072_p3)
}
0x24aa   :  { %s6093_s12 = smov 384   ;;  %s6094_s1 = smov 24  }
0x24ab   :  { %4640 = dma.vmem_to_hbm [thread:$0]  %s4635_s29, 6144, %s7244_s4, [#allocation4], %s6093_s12, %s6093_s12, %s6094_s1  }
0x24ac   :  { %6080 = dma.done.wait [#allocation4], 6144  }
0x24ad   :  { %6081 = vsyncadd [#allocation4], 4294961152 }
0x24ae   :  { %4644 = vsyncpa [#allocation3], 1 }
0x24af   :  { %4645 = vsyncpa [#allocation6], 1 }
0x24b0   :  { %4646 = vsyncpa [#allocation4], 1 }

</bundles_post_ra>
